<compile_context>
chip_gen: v5e
topology: v5e:2x2
jax: 0.10.0
libtpu: 0.0.40
codegen_flags: <defaults>
</compile_context>

<pallas_src>
import functools

import numpy as np
import jax
import jax.numpy as jnp
from jax import lax
from jax.experimental import pallas as pl
from jax.experimental.pallas import tpu as pltpu

BN_EPS = 1e-5
BN_SCALE = float(1.0 / np.sqrt(1.0 + BN_EPS))   # eval-mode BN, default running stats


# -----------------------------------------------------------------------------
# Pallas kernel: cvx_weights_mlp head + skeletal point aggregation (hot path).
# Processes `bt` batches per grid step; points sit on the sublane axis
# (bt*n rows) and MLP output channels sit on the lane axis (384/256/128 wide),
# so every MXU matmul is lane-dense on v5e (128) and v6e/v7x (256).
# -----------------------------------------------------------------------------
def _cvx_head_kernel(feat_ref, xyz_ref,
                     w1, b1, w2, b2, w3, b3, w4, b4, w5, b5,
                     skelr_ref, cmb_ref, *, bt, n):
    x = feat_ref[...]                     # (bt*n, C) f32, points-major
    xyz = xyz_ref[...]                    # (bt, n, 3) f32

    # cvx_weights_mlp: 4 x [Dropout -> Conv1d -> BN -> ReLU], Conv1d -> BN -> Softmax.
    # Dropout = identity (eval); BN folded into (w, b) host-side; bf16 weights,
    # f32 MXU accumulation; ReLU / softmax in f32.
    def layer(h, w, b):
        return jnp.dot(h.astype(jnp.bfloat16), w[...],
                       preferred_element_type=jnp.float32) + b[...]

    h = jnp.maximum(layer(x, w1, b1), 0.0)
    h = jnp.maximum(layer(h, w2, b2), 0.0)
    h = jnp.maximum(layer(h, w3, b3), 0.0)
    h = jnp.maximum(layer(h, w4, b4), 0.0)
    logits = layer(h, w5, b5)             # (bt*n, K)

    k = logits.shape[-1]
    lg = logits.reshape(bt, n, k)

    # Softmax over the point axis (torch nn.Softmax(dim=2) applied to (B, K, N)).
    m = jnp.max(lg, axis=1, keepdims=True)
    e = jnp.exp(lg - m)
    s = jnp.sum(e, axis=1, keepdims=True)
    wgt = e * pl.reciprocal(s, approx=True)              # (bt, n, k)
    wgt_kn = jnp.swapaxes(wgt, 1, 2)                     # (bt, k, n)

    # skel_xyz[b, k, :] = sum_n w[b, k, n] * xyz[b, n, :]
    skel = jnp.einsum('bkn,bnd->bkd', wgt_kn, xyz,
                      preferred_element_type=jnp.float32)          # (bt, k, 3)

    # shape_cmb_features[b, k, c] = sum_n w[b, k, n] * feat[b, n, c]
    feat3 = x.reshape(bt, n, x.shape[-1])
    cmb = jnp.einsum('bkn,bnc->bkc', wgt_kn, feat3,
                     preferred_element_type=jnp.float32)           # (bt, k, C)

    # Min distance from every sampled point to its closest skeletal point via
    # d^2 = |skel|^2 + |xyz|^2 - 2 skel.xyz on lane-dense (k, n) tiles
    # (no (K, N, 3) broadcast tensor is ever materialized).
    sk2 = jnp.sum(skel * skel, axis=-1)                  # (bt, k)
    x2 = jnp.sum(xyz * xyz, axis=-1)                     # (bt, n)
    cross = (skel[:, :, None, 0] * xyz[:, None, :, 0]
             + skel[:, :, None, 1] * xyz[:, None, :, 1]
             + skel[:, :, None, 2] * xyz[:, None, :, 2])            # (bt, k, n)
    d2 = sk2[:, :, None] + x2[:, None, :] - 2.0 * cross
    md = jnp.min(jnp.sqrt(jnp.maximum(d2, 0.0)), axis=1)           # (bt, n)

    # skel_r[b, k] = sum_n w[b, k, n] * min_dist[b, n]
    r = jnp.sum(wgt_kn * md[:, None, :], axis=2)                   # (bt, k)

    # Packed output block: [:, :, 0:3] = skel_xyz, [:, :, 3] = skel_r.
    skelr_ref[:, :, 0:3] = skel
    skelr_ref[:, :, 3:4] = r[:, :, None]
    cmb_ref[...] = cmb


def _pick_batch_tile(batch, n, target=128, cap=1024):
    """Smallest divisor of `batch` whose bt*n reaches ~target sublane rows."""
    bt_best = 1
    for bt in range(1, batch + 1):
        if batch % bt:
            continue
        if bt > 1 and bt * n > cap:
            break
        bt_best = bt
        if bt * n >= target:
            break
    return bt_best


def cvx_head_pallas(context_features, sample_xyz, head_params):
    """context_features: (B, C, N) f32 (torch NCL); sample_xyz: (B, N, 3) f32."""
    B, C, N = context_features.shape
    K = head_params[-1][0].shape[1]            # weights stored (Cin, Cout)

    bt = _pick_batch_tile(B, N)
    grid = B // bt
    rows = bt * N
    assert rows % 8 == 0 or grid == 1, "batch tile must be sublane aligned"

    # Points-major layout (B*N, C): row b*N + p is point p of batch b.
    feat_rows = jnp.transpose(context_features, (0, 2, 1)).reshape(B * N, C)

    args = [feat_rows, sample_xyz]
    in_specs = [
        pl.BlockSpec((rows, C), lambda g: (g, 0)),
        pl.BlockSpec((bt, N, 3), lambda g: (g, 0, 0)),
    ]
    # Weights/biases: full blocks with a constant index_map -> fetched once,
    # never re-DMAed across grid steps.
    # TODO(synk): pipeline_mode=pl.Buffered(1) would single-buffer these
    #             (~0.8 MiB VMEM saved); kept at the default for portability.
    for (w, bias) in head_params:
        args += [w, bias]
        in_specs += [pl.BlockSpec(w.shape, lambda g: (0, 0)),
                     pl.BlockSpec(bias.shape, lambda g: (0, 0))]

    out_shape = (jax.ShapeDtypeStruct((B, K, 4), jnp.float32),   # packed xyz | r
                 jax.ShapeDtypeStruct((B, K, C), jnp.float32))
    out_specs = (pl.BlockSpec((bt, K, 4), lambda g: (g, 0, 0)),
                 pl.BlockSpec((bt, K, C), lambda g: (g, 0, 0)))

    skelr, cmb = pl.pallas_call(
        functools.partial(_cvx_head_kernel, bt=bt, n=N),
        out_shape=out_shape,
        grid_spec=pltpu.PrefetchScalarGridSpec(
            num_scalar_prefetch=0,
            grid=(grid,),
            in_specs=in_specs,
            out_specs=out_specs),
        compiler_params=pltpu.CompilerParams(
            # batch groups are independent -> sharded across v7x's 2 TensorCores
            dimension_semantics=("parallel",)),
    )(*args)

    return skelr[..., 0:3], skelr[..., 3:4], cmb


# -----------------------------------------------------------------------------
# Plain-JAX glue: PointNet++ MSG set-abstraction backbone (external pointnet2).
# -----------------------------------------------------------------------------
def _fps(xyz, npoint):
    """Deterministic farthest point sampling (starts at index 0). xyz: (N, 3)."""
    n = xyz.shape[0]

    def body(i, state):
        idxs, dists = state
        last = xyz[idxs[i - 1]]
        d = jnp.sum((xyz - last) ** 2, axis=-1)
        dists = jnp.minimum(dists, d)
        nxt = jnp.argmax(dists).astype(jnp.int32)
        return idxs.at[i].set(nxt), dists

    idxs = jnp.zeros((npoint,), jnp.int32)
    dists = jnp.full((n,), 1e10, jnp.float32)
    idxs, _ = lax.fori_loop(1, npoint, body, (idxs, dists))
    return idxs


def _ball_query(xyz, new_xyz, radius, nsample):
    """xyz: (N, 3), new_xyz: (P, 3) -> (P, nsample) neighbor indices."""
    n = xyz.shape[0]
    d2 = jnp.sum((new_xyz[:, None, :] - xyz[None, :, :]) ** 2, axis=-1)
    in_ball = d2 < radius * radius
    ar = jnp.arange(n, dtype=jnp.int32)
    keyed = jnp.where(in_ball, ar[None, :], n + ar[None, :])
    order = jnp.sort(keyed, axis=-1)[:, :nsample]
    cnt = jnp.sum(in_ball.astype(jnp.int32), axis=-1, keepdims=True)
    first = order[:, :1] % n
    return jnp.where(jnp.arange(nsample)[None, :] < cnt, order % n, first)


def _gather(points, idx):
    """points: (B, N, C); idx: (B, ...) int -> (B, ..., C)."""
    b = points.shape[0]
    flat = idx.reshape(b, -1)
    out = jnp.take_along_axis(points, flat[:, :, None], axis=1)
    return out.reshape(idx.shape + (points.shape[-1],))


def _sa_msg(xyz, features, scale_params, npoint, radii, nsamples):
    """One PointnetSAModuleMSG stage (channels-last features)."""
    fps_idx = jax.vmap(_fps, in_axes=(0, None))(xyz, npoint)      # (B, P)
    new_xyz = _gather(xyz, fps_idx)                               # (B, P, 3)
    outs = []
    for radius, nsample, layers in zip(radii, nsamples, scale_params):
        idx = jax.vmap(_ball_query, in_axes=(0, 0, None, None))(xyz, new_xyz, radius, nsample)
        g_xyz = _gather(xyz, idx) - new_xyz[:, :, None, :]        # (B, P, S, 3)
        if features is not None:
            g = jnp.concatenate([g_xyz, _gather(features, idx)], axis=-1)   # use_xyz=True
        else:
            g = g_xyz
        h = g
        for (w, bias) in layers:                                  # shared 1x1 Conv2d + BN + ReLU
            h = jnp.maximum((h @ w + bias) * BN_SCALE, 0.0)
        outs.append(jnp.max(h, axis=2))                           # max-pool over neighbors
    return new_xyz, jnp.concatenate(outs, axis=-1)


def run_backbone(input_pc, sa_cfgs, sa_params):
    # split_point_feature: xyz = pc[..., :3], extra channels are the features.
    xyz = input_pc[..., 0:3]
    features = input_pc[..., 3:] if input_pc.shape[-1] > 3 else None
    for cfg, p in zip(sa_cfgs, sa_params):
        xyz, features = _sa_msg(xyz, features, p,
                                npoint=cfg['npoint'],
                                radii=cfg['radii'],
                                nsamples=cfg['nsamples'])
    sample_xyz = xyz                                              # (B, P, 3)
    context_features = jnp.transpose(features, (0, 2, 1))         # (B, C=512, P)
    return sample_xyz, context_features


def skel_point_net_forward(input_pc, sa_cfgs, sa_params, head_params):
    sample_xyz, context_features = run_backbone(input_pc, sa_cfgs, sa_params)
    skel_xyz, skel_r, shape_cmb_features = cvx_head_pallas(
        context_features, sample_xyz, head_params)
    return skel_xyz, skel_r, shape_cmb_features


# -----------------------------------------------------------------------------
# Deterministic parameter initialization (shapes follow SkelPointNet.__init__).
# -----------------------------------------------------------------------------
def init_params(key, num_skel_points, input_channels=3, use_xyz=True):
    # npoint / nsample scaled down for the small demo; channel widths exact.
    sa_cfgs = [
        dict(npoint=64, radii=(0.1, 0.2), nsamples=(4, 8),
             mlps=((input_channels, 16, 16, 32), (input_channels, 16, 16, 32))),
        dict(npoint=48, radii=(0.2, 0.4), nsamples=(8, 16),
             mlps=((64, 32, 32, 64), (64, 32, 32, 64))),
        dict(npoint=32, radii=(0.4, 0.6), nsamples=(8, 16),
             mlps=((128, 64, 64, 128), (128, 64, 64, 128))),
        dict(npoint=32, radii=(0.6, 0.8), nsamples=(16, 32),
             mlps=((256, 128, 128, 256), (256, 128, 128, 256))),
    ]
    sa_params = []
    for cfg in sa_cfgs:
        scale_params = []
        for mlp in cfg['mlps']:
            spec = list(mlp)
            if use_xyz:
                spec[0] += 3
            layers = []
            for cin, cout in zip(spec[:-1], spec[1:]):
                key, sub = jax.random.split(key)
                w = jax.random.normal(sub, (cin, cout), jnp.float32) / np.sqrt(cin)
                layers.append((w, jnp.zeros((cout,), jnp.float32)))
            scale_params.append(layers)
        sa_params.append(scale_params)

    # cvx_weights_mlp: 512 -> 384 -> 256 -> 256 -> 128 -> K (Conv1d + BN folded).
    # Stored as (Cin, Cout) bf16 weights + lane-major (1, Cout) f32 biases so the
    # kernel matmul output lane axis carries the output channels.
    dims = (512, 384, 256, 256, 128, num_skel_points)
    head_params = []
    for cin, cout in zip(dims[:-1], dims[1:]):
        key, sub = jax.random.split(key)
        w = jax.random.normal(sub, (cout, cin), jnp.float32) / np.sqrt(cin)  # torch Conv1d (O, I, 1)
        key, sub = jax.random.split(key)
        bias = jax.random.normal(sub, (cout,), jnp.float32) * 0.01
        head_params.append(((w * BN_SCALE).T.astype(jnp.bfloat16),
                            (bias * BN_SCALE).reshape(1, cout)))
    return sa_cfgs, sa_params, head_params


# -----------------------------------------------------------------------------
# Pure-JAX reference for the Pallas head (emulates the kernel's bf16 numerics).
# -----------------------------------------------------------------------------
def cvx_head_reference(context_features, sample_xyz, head_params):
    hp = jax.lax.Precision.HIGHEST
    feat = jnp.transpose(context_features, (0, 2, 1))             # (B, N, C)
    h = feat
    for i, (w, b) in enumerate(head_params):
        h = jnp.einsum('bnc,co->bno',
                       h.astype(jnp.bfloat16).astype(jnp.float32),
                       w.astype(jnp.float32), precision=hp) + b[None]
        if i < len(head_params) - 1:
            h = jnp.maximum(h, 0.0)
    wgt = jax.nn.softmax(h, axis=1)                               # (B, N, K) over points
    skel = jnp.einsum('bnk,bnd->bkd', wgt, sample_xyz, precision=hp)
    cmb = jnp.einsum('bnk,bnc->bkc', wgt, feat, precision=hp)
    d2 = (jnp.sum(skel ** 2, -1)[:, :, None]
          + jnp.sum(sample_xyz ** 2, -1)[:, None, :]
          - 2.0 * jnp.einsum('bkd,bnd->bkn', skel, sample_xyz, precision=hp))
    md = jnp.min(jnp.sqrt(jnp.maximum(d2, 0.0)), axis=1)          # (B, N)
    r = jnp.sum(wgt * md[:, :, None], axis=1)                     # (B, K)
    return skel, r[..., None], cmb


if __name__ == "__main__":
    B, N_PTS, FEAT_CH, NUM_SKEL = 8, 128, 3, 16
    key = jax.random.PRNGKey(0)
    k_pc, k_par = jax.random.split(key)
    # input_pc: (B, N, 3 + input_channels) -> xyz + 3 extra feature channels
    input_pc = jax.random.normal(k_pc, (B, N_PTS, 3 + FEAT_CH), jnp.float32) * 0.5

    sa_cfgs, sa_params, head_params = init_params(k_par, NUM_SKEL, input_channels=FEAT_CH)

    # Full forward (plain-JAX backbone glue + Pallas head kernel).
    fwd = jax.jit(lambda pc: skel_point_net_forward(pc, sa_cfgs, sa_params, head_params))
    skel_xyz, skel_r, shape_cmb = fwd(input_pc)
    jax.block_until_ready((skel_xyz, skel_r, shape_cmb))

    # Correctness: compare the Pallas head against a bf16-weight-emulating JAX
    # reference on the same backbone outputs (tight tolerance — only summation
    # order / approximate reciprocal differ).
    sample_xyz, context_features = run_backbone(input_pc, sa_cfgs, sa_params)
    ref_skel, ref_r, ref_cmb = cvx_head_reference(context_features, sample_xyz, head_params)

    assert skel_xyz.shape == (B, NUM_SKEL, 3)
    assert skel_r.shape == (B, NUM_SKEL, 1)
    assert shape_cmb.shape == (B, NUM_SKEL, 512)
    for got, ref, name in ((skel_xyz, ref_skel, "skel_xyz"),
                           (skel_r, ref_r, "skel_r"),
                           (shape_cmb, ref_cmb, "shape_cmb_features")):
        assert bool(jnp.all(jnp.isfinite(got))), f"non-finite {name}"
        assert bool(jnp.allclose(got, ref, rtol=2e-2, atol=2e-2)), f"mismatch in {name}"

    print("KERNEL_OK")
</pallas_src>

<mosaic_0001>
module attributes {stable_mosaic.version = 11 : i64} {
  func.func @_cvx_head_kernel(%arg0: i32, %arg1: memref<128x512xf32, #tpu.memory_space<vmem>>, %arg2: memref<4x32x3xf32, #tpu.memory_space<vmem>>, %arg3: memref<512x384xbf16, #tpu.memory_space<vmem>>, %arg4: memref<1x384xf32, #tpu.memory_space<vmem>>, %arg5: memref<384x256xbf16, #tpu.memory_space<vmem>>, %arg6: memref<1x256xf32, #tpu.memory_space<vmem>>, %arg7: memref<256x256xbf16, #tpu.memory_space<vmem>>, %arg8: memref<1x256xf32, #tpu.memory_space<vmem>>, %arg9: memref<256x128xbf16, #tpu.memory_space<vmem>>, %arg10: memref<1x128xf32, #tpu.memory_space<vmem>>, %arg11: memref<128x16xbf16, #tpu.memory_space<vmem>>, %arg12: memref<1x16xf32, #tpu.memory_space<vmem>>, %arg13: memref<4x16x4xf32, #tpu.memory_space<vmem>>, %arg14: memref<4x16x512xf32, #tpu.memory_space<vmem>>) attributes {dimension_semantics = [#tpu.dimension_semantics<parallel>], iteration_bounds = array<i64: 2>, scalar_prefetch = 0 : i64, scratch_operands = 0 : i64, tpu.core_type = #tpu.core_type<tc>, window_params = [{transform_indices = @transform_0, window_bounds = array<i64: 128, 512>}, {transform_indices = @transform_1, window_bounds = array<i64: 4, 32, 3>}, {pipeline_mode = #tpu.pipeline_mode<synchronous>, transform_indices = @transform_2, window_bounds = array<i64: 512, 384>}, {pipeline_mode = #tpu.pipeline_mode<synchronous>, transform_indices = @transform_3, window_bounds = array<i64: 1, 384>}, {pipeline_mode = #tpu.pipeline_mode<synchronous>, transform_indices = @transform_4, window_bounds = array<i64: 384, 256>}, {pipeline_mode = #tpu.pipeline_mode<synchronous>, transform_indices = @transform_5, window_bounds = array<i64: 1, 256>}, {pipeline_mode = #tpu.pipeline_mode<synchronous>, transform_indices = @transform_6, window_bounds = array<i64: 256, 256>}, {pipeline_mode = #tpu.pipeline_mode<synchronous>, transform_indices = @transform_7, window_bounds = array<i64: 1, 256>}, {pipeline_mode = #tpu.pipeline_mode<synchronous>, transform_indices = @transform_8, window_bounds = array<i64: 256, 128>}, {pipeline_mode = #tpu.pipeline_mode<synchronous>, transform_indices = @transform_9, window_bounds = array<i64: 1, 128>}, {pipeline_mode = #tpu.pipeline_mode<synchronous>, transform_indices = @transform_10, window_bounds = array<i64: 128, 16>}, {pipeline_mode = #tpu.pipeline_mode<synchronous>, transform_indices = @transform_11, window_bounds = array<i64: 1, 16>}, {transform_indices = @transform_12, window_bounds = array<i64: 4, 16, 4>}, {transform_indices = @transform_13, window_bounds = array<i64: 4, 16, 512>}]} {
    %c0 = arith.constant 0 : index
    %c0_0 = arith.constant 0 : index
    %0 = vector.load %arg1[%c0, %c0_0] : memref<128x512xf32, #tpu.memory_space<vmem>>, vector<128x512xf32>
    %c0_1 = arith.constant 0 : index
    %c0_2 = arith.constant 0 : index
    %c0_3 = arith.constant 0 : index
    %1 = vector.load %arg2[%c0_1, %c0_2, %c0_3] : memref<4x32x3xf32, #tpu.memory_space<vmem>>, vector<4x32x3xf32>
    %2 = arith.truncf %0 : vector<128x512xf32> to vector<128x512xbf16>
    %c0_4 = arith.constant 0 : index
    %c0_5 = arith.constant 0 : index
    %3 = vector.load %arg3[%c0_4, %c0_5] : memref<512x384xbf16, #tpu.memory_space<vmem>>, vector<512x384xbf16>
    %cst = arith.constant dense<0.000000e+00> : vector<128x384xf32>
    %4 = tpu.matmul %2, %3, %cst {dimension_numbers = #tpu.dot_dimension_numbers<[1], [0], [0], [1], [0, 0, 1, 1], [], []>} : vector<128x512xbf16>, vector<512x384xbf16>, vector<128x384xf32> -> vector<128x384xf32>
    %c0_6 = arith.constant 0 : index
    %c0_7 = arith.constant 0 : index
    %5 = vector.load %arg4[%c0_6, %c0_7] : memref<1x384xf32, #tpu.memory_space<vmem>>, vector<1x384xf32>
    %6 = vector.broadcast %5 : vector<1x384xf32> to vector<128x384xf32>
    %7 = arith.addf %4, %6 : vector<128x384xf32>
    %cst_8 = arith.constant 0.000000e+00 : f32
    %8 = vector.broadcast %cst_8 : f32 to vector<128x384xf32>
    %9 = arith.maximumf %7, %8 : vector<128x384xf32>
    %10 = arith.truncf %9 : vector<128x384xf32> to vector<128x384xbf16>
    %c0_9 = arith.constant 0 : index
    %c0_10 = arith.constant 0 : index
    %11 = vector.load %arg5[%c0_9, %c0_10] : memref<384x256xbf16, #tpu.memory_space<vmem>>, vector<384x256xbf16>
    %cst_11 = arith.constant dense<0.000000e+00> : vector<128x256xf32>
    %12 = tpu.matmul %10, %11, %cst_11 {dimension_numbers = #tpu.dot_dimension_numbers<[1], [0], [0], [1], [0, 0, 1, 1], [], []>} : vector<128x384xbf16>, vector<384x256xbf16>, vector<128x256xf32> -> vector<128x256xf32>
    %c0_12 = arith.constant 0 : index
    %c0_13 = arith.constant 0 : index
    %13 = vector.load %arg6[%c0_12, %c0_13] : memref<1x256xf32, #tpu.memory_space<vmem>>, vector<1x256xf32>
    %14 = vector.broadcast %13 : vector<1x256xf32> to vector<128x256xf32>
    %15 = arith.addf %12, %14 : vector<128x256xf32>
    %cst_14 = arith.constant 0.000000e+00 : f32
    %16 = vector.broadcast %cst_14 : f32 to vector<128x256xf32>
    %17 = arith.maximumf %15, %16 : vector<128x256xf32>
    %18 = arith.truncf %17 : vector<128x256xf32> to vector<128x256xbf16>
    %c0_15 = arith.constant 0 : index
    %c0_16 = arith.constant 0 : index
    %19 = vector.load %arg7[%c0_15, %c0_16] : memref<256x256xbf16, #tpu.memory_space<vmem>>, vector<256x256xbf16>
    %cst_17 = arith.constant dense<0.000000e+00> : vector<128x256xf32>
    %20 = tpu.matmul %18, %19, %cst_17 {dimension_numbers = #tpu.dot_dimension_numbers<[1], [0], [0], [1], [0, 0, 1, 1], [], []>} : vector<128x256xbf16>, vector<256x256xbf16>, vector<128x256xf32> -> vector<128x256xf32>
    %c0_18 = arith.constant 0 : index
    %c0_19 = arith.constant 0 : index
    %21 = vector.load %arg8[%c0_18, %c0_19] : memref<1x256xf32, #tpu.memory_space<vmem>>, vector<1x256xf32>
    %22 = vector.broadcast %21 : vector<1x256xf32> to vector<128x256xf32>
    %23 = arith.addf %20, %22 : vector<128x256xf32>
    %cst_20 = arith.constant 0.000000e+00 : f32
    %24 = vector.broadcast %cst_20 : f32 to vector<128x256xf32>
    %25 = arith.maximumf %23, %24 : vector<128x256xf32>
    %26 = arith.truncf %25 : vector<128x256xf32> to vector<128x256xbf16>
    %c0_21 = arith.constant 0 : index
    %c0_22 = arith.constant 0 : index
    %27 = vector.load %arg9[%c0_21, %c0_22] : memref<256x128xbf16, #tpu.memory_space<vmem>>, vector<256x128xbf16>
    %cst_23 = arith.constant dense<0.000000e+00> : vector<128x128xf32>
    %28 = tpu.matmul %26, %27, %cst_23 {dimension_numbers = #tpu.dot_dimension_numbers<[1], [0], [0], [1], [0, 0, 1, 1], [], []>} : vector<128x256xbf16>, vector<256x128xbf16>, vector<128x128xf32> -> vector<128x128xf32>
    %c0_24 = arith.constant 0 : index
    %c0_25 = arith.constant 0 : index
    %29 = vector.load %arg10[%c0_24, %c0_25] : memref<1x128xf32, #tpu.memory_space<vmem>>, vector<1x128xf32>
    %30 = vector.broadcast %29 : vector<1x128xf32> to vector<128x128xf32>
    %31 = arith.addf %28, %30 : vector<128x128xf32>
    %cst_26 = arith.constant 0.000000e+00 : f32
    %32 = vector.broadcast %cst_26 : f32 to vector<128x128xf32>
    %33 = arith.maximumf %31, %32 : vector<128x128xf32>
    %34 = arith.truncf %33 : vector<128x128xf32> to vector<128x128xbf16>
    %c0_27 = arith.constant 0 : index
    %c0_28 = arith.constant 0 : index
    %35 = vector.load %arg11[%c0_27, %c0_28] : memref<128x16xbf16, #tpu.memory_space<vmem>>, vector<128x16xbf16>
    %cst_29 = arith.constant dense<0.000000e+00> : vector<128x16xf32>
    %36 = tpu.matmul %34, %35, %cst_29 {dimension_numbers = #tpu.dot_dimension_numbers<[1], [0], [0], [1], [0, 0, 1, 1], [], []>} : vector<128x128xbf16>, vector<128x16xbf16>, vector<128x16xf32> -> vector<128x16xf32>
    %c0_30 = arith.constant 0 : index
    %c0_31 = arith.constant 0 : index
    %37 = vector.load %arg12[%c0_30, %c0_31] : memref<1x16xf32, #tpu.memory_space<vmem>>, vector<1x16xf32>
    %38 = vector.broadcast %37 : vector<1x16xf32> to vector<128x16xf32>
    %39 = arith.addf %36, %38 : vector<128x16xf32>
    %40 = vector.shape_cast %39 : vector<128x16xf32> to vector<4x32x16xf32>
    %cst_32 = arith.constant dense<0xFF800000> : vector<4x16xf32>
    %41 = vector.multi_reduction <maximumf>, %40, %cst_32 [1] : vector<4x32x16xf32> to vector<4x16xf32>
    %42 = vector.shape_cast %41 : vector<4x16xf32> to vector<4x1x16xf32>
    %43 = vector.broadcast %42 : vector<4x1x16xf32> to vector<4x32x16xf32>
    %44 = arith.subf %40, %43 : vector<4x32x16xf32>
    %45 = math.exp %44 : vector<4x32x16xf32>
    %cst_33 = arith.constant dense<0.000000e+00> : vector<4x16xf32>
    %46 = vector.multi_reduction <add>, %45, %cst_33 [1] : vector<4x32x16xf32> to vector<4x16xf32>
    %47 = vector.shape_cast %46 : vector<4x16xf32> to vector<4x1x16xf32>
    %48 = tpu.reciprocal %47 {approx = true} : vector<4x1x16xf32> -> vector<4x1x16xf32>
    %49 = vector.broadcast %48 : vector<4x1x16xf32> to vector<4x32x16xf32>
    %50 = arith.mulf %45, %49 : vector<4x32x16xf32>
    %51 = tpu.transpose %50, [0, 2, 1] : vector<4x32x16xf32> -> vector<4x16x32xf32>
    "tpu.trace_start"() <{level = 10 : i32, message = "bkn,bnd->bkd"}> : () -> ()
    %cst_34 = arith.constant dense<0.000000e+00> : vector<4x16x3xf32>
    %52 = tpu.matmul %51, %1, %cst_34 {dimension_numbers = #tpu.dot_dimension_numbers<[2], [1], [1], [2], [0, 0, 0, 1, 1, 2], [0], [0]>} : vector<4x16x32xf32>, vector<4x32x3xf32>, vector<4x16x3xf32> -> vector<4x16x3xf32>
    "tpu.trace_stop"() : () -> ()
    %53 = vector.shape_cast %0 : vector<128x512xf32> to vector<4x32x512xf32>
    "tpu.trace_start"() <{level = 10 : i32, message = "bkn,bnc->bkc"}> : () -> ()
    %cst_35 = arith.constant dense<0.000000e+00> : vector<4x16x512xf32>
    %54 = tpu.matmul %51, %53, %cst_35 {dimension_numbers = #tpu.dot_dimension_numbers<[2], [1], [1], [2], [0, 0, 0, 1, 1, 2], [0], [0]>} : vector<4x16x32xf32>, vector<4x32x512xf32>, vector<4x16x512xf32> -> vector<4x16x512xf32>
    "tpu.trace_stop"() : () -> ()
    %55 = arith.mulf %52, %52 : vector<4x16x3xf32>
    %cst_36 = arith.constant dense<0.000000e+00> : vector<4x16xf32>
    %56 = vector.multi_reduction <add>, %55, %cst_36 [2] : vector<4x16x3xf32> to vector<4x16xf32>
    %57 = arith.mulf %1, %1 : vector<4x32x3xf32>
    %cst_37 = arith.constant dense<0.000000e+00> : vector<4x32xf32>
    %58 = vector.multi_reduction <add>, %57, %cst_37 [2] : vector<4x32x3xf32> to vector<4x32xf32>
    %59 = vector.extract_strided_slice %52 {offsets = [0, 0, 0], sizes = [4, 16, 1], strides = [1, 1, 1]} : vector<4x16x3xf32> to vector<4x16x1xf32>
    %60 = vector.shape_cast %59 : vector<4x16x1xf32> to vector<4x16xf32>
    %61 = vector.shape_cast %60 : vector<4x16xf32> to vector<4x16x1xf32>
    %62 = vector.extract_strided_slice %1 {offsets = [0, 0, 0], sizes = [4, 32, 1], strides = [1, 1, 1]} : vector<4x32x3xf32> to vector<4x32x1xf32>
    %63 = vector.shape_cast %62 : vector<4x32x1xf32> to vector<4x32xf32>
    %64 = vector.shape_cast %63 : vector<4x32xf32> to vector<4x1x32xf32>
    %65 = vector.broadcast %61 : vector<4x16x1xf32> to vector<4x16x32xf32>
    %66 = vector.broadcast %64 : vector<4x1x32xf32> to vector<4x16x32xf32>
    %67 = arith.mulf %65, %66 : vector<4x16x32xf32>
    %68 = vector.extract_strided_slice %52 {offsets = [0, 0, 1], sizes = [4, 16, 1], strides = [1, 1, 1]} : vector<4x16x3xf32> to vector<4x16x1xf32>
    %69 = vector.shape_cast %68 : vector<4x16x1xf32> to vector<4x16xf32>
    %70 = vector.shape_cast %69 : vector<4x16xf32> to vector<4x16x1xf32>
    %71 = vector.extract_strided_slice %1 {offsets = [0, 0, 1], sizes = [4, 32, 1], strides = [1, 1, 1]} : vector<4x32x3xf32> to vector<4x32x1xf32>
    %72 = vector.shape_cast %71 : vector<4x32x1xf32> to vector<4x32xf32>
    %73 = vector.shape_cast %72 : vector<4x32xf32> to vector<4x1x32xf32>
    %74 = vector.broadcast %70 : vector<4x16x1xf32> to vector<4x16x32xf32>
    %75 = vector.broadcast %73 : vector<4x1x32xf32> to vector<4x16x32xf32>
    %76 = arith.mulf %74, %75 : vector<4x16x32xf32>
    %77 = arith.addf %67, %76 : vector<4x16x32xf32>
    %78 = vector.extract_strided_slice %52 {offsets = [0, 0, 2], sizes = [4, 16, 1], strides = [1, 1, 1]} : vector<4x16x3xf32> to vector<4x16x1xf32>
    %79 = vector.shape_cast %78 : vector<4x16x1xf32> to vector<4x16xf32>
    %80 = vector.shape_cast %79 : vector<4x16xf32> to vector<4x16x1xf32>
    %81 = vector.extract_strided_slice %1 {offsets = [0, 0, 2], sizes = [4, 32, 1], strides = [1, 1, 1]} : vector<4x32x3xf32> to vector<4x32x1xf32>
    %82 = vector.shape_cast %81 : vector<4x32x1xf32> to vector<4x32xf32>
    %83 = vector.shape_cast %82 : vector<4x32xf32> to vector<4x1x32xf32>
    %84 = vector.broadcast %80 : vector<4x16x1xf32> to vector<4x16x32xf32>
    %85 = vector.broadcast %83 : vector<4x1x32xf32> to vector<4x16x32xf32>
    %86 = arith.mulf %84, %85 : vector<4x16x32xf32>
    %87 = arith.addf %77, %86 : vector<4x16x32xf32>
    %88 = vector.shape_cast %56 : vector<4x16xf32> to vector<4x16x1xf32>
    %89 = vector.shape_cast %58 : vector<4x32xf32> to vector<4x1x32xf32>
    %90 = vector.broadcast %88 : vector<4x16x1xf32> to vector<4x16x32xf32>
    %91 = vector.broadcast %89 : vector<4x1x32xf32> to vector<4x16x32xf32>
    %92 = arith.addf %90, %91 : vector<4x16x32xf32>
    %cst_38 = arith.constant 2.000000e+00 : f32
    %93 = vector.broadcast %cst_38 : f32 to vector<4x16x32xf32>
    %94 = arith.mulf %93, %87 : vector<4x16x32xf32>
    %95 = arith.subf %92, %94 : vector<4x16x32xf32>
    %cst_39 = arith.constant 0.000000e+00 : f32
    %96 = vector.broadcast %cst_39 : f32 to vector<4x16x32xf32>
    %97 = arith.maximumf %95, %96 : vector<4x16x32xf32>
    %98 = math.sqrt %97 : vector<4x16x32xf32>
    %cst_40 = arith.constant dense<0x7F800000> : vector<4x32xf32>
    %99 = vector.multi_reduction <minimumf>, %98, %cst_40 [1] : vector<4x16x32xf32> to vector<4x32xf32>
    %100 = vector.shape_cast %99 : vector<4x32xf32> to vector<4x1x32xf32>
    %101 = vector.broadcast %100 : vector<4x1x32xf32> to vector<4x16x32xf32>
    %102 = arith.mulf %51, %101 : vector<4x16x32xf32>
    %cst_41 = arith.constant dense<0.000000e+00> : vector<4x16xf32>
    %103 = vector.multi_reduction <add>, %102, %cst_41 [2] : vector<4x16x32xf32> to vector<4x16xf32>
    %c0_42 = arith.constant 0 : index
    %c0_43 = arith.constant 0 : index
    %c0_44 = arith.constant 0 : index
    %104 = vector.load %arg13[%c0_42, %c0_43, %c0_44] : memref<4x16x4xf32, #tpu.memory_space<vmem>>, vector<4x16x3xf32>
    tpu.vector_store %arg13[%c0_42, %c0_43, %c0_44], %52 {strides = array<i32>} : memref<4x16x4xf32, #tpu.memory_space<vmem>>, vector<4x16x3xf32>,
    %105 = vector.shape_cast %103 : vector<4x16xf32> to vector<4x16x1xf32>
    %c0_45 = arith.constant 0 : index
    %c0_46 = arith.constant 0 : index
    %c3 = arith.constant 3 : index
    %106 = vector.load %arg13[%c0_45, %c0_46, %c3] : memref<4x16x4xf32, #tpu.memory_space<vmem>>, vector<4x16x1xf32>
    tpu.vector_store %arg13[%c0_45, %c0_46, %c3], %105 {strides = array<i32>} : memref<4x16x4xf32, #tpu.memory_space<vmem>>, vector<4x16x1xf32>,
    %c0_47 = arith.constant 0 : index
    %c0_48 = arith.constant 0 : index
    %c0_49 = arith.constant 0 : index
    %107 = vector.load %arg14[%c0_47, %c0_48, %c0_49] : memref<4x16x512xf32, #tpu.memory_space<vmem>>, vector<4x16x512xf32>
    tpu.vector_store %arg14[%c0_47, %c0_48, %c0_49], %54 {strides = array<i32>} : memref<4x16x512xf32, #tpu.memory_space<vmem>>, vector<4x16x512xf32>,
    return
  }
  func.func @transform_0(%arg0: i32) -> (i32, i32) {
    %c0_i32 = arith.constant 0 : i32
    %c0_i32_0 = arith.constant 0 : i32
    return %arg0, %c0_i32 : i32, i32
  }
  func.func @transform_1(%arg0: i32) -> (i32, i32, i32) {
    %c0_i32 = arith.constant 0 : i32
    %c0_i32_0 = arith.constant 0 : i32
    %c0_i32_1 = arith.constant 0 : i32
    return %arg0, %c0_i32, %c0_i32_0 : i32, i32, i32
  }
  func.func @transform_2(%arg0: i32) -> (i32, i32) {
    %c0_i32 = arith.constant 0 : i32
    %c0_i32_0 = arith.constant 0 : i32
    %c0_i32_1 = arith.constant 0 : i32
    return %c0_i32, %c0_i32_0 : i32, i32
  }
  func.func @transform_3(%arg0: i32) -> (i32, i32) {
    %c0_i32 = arith.constant 0 : i32
    %c0_i32_0 = arith.constant 0 : i32
    %c0_i32_1 = arith.constant 0 : i32
    return %c0_i32, %c0_i32_0 : i32, i32
  }
  func.func @transform_4(%arg0: i32) -> (i32, i32) {
    %c0_i32 = arith.constant 0 : i32
    %c0_i32_0 = arith.constant 0 : i32
    %c0_i32_1 = arith.constant 0 : i32
    return %c0_i32, %c0_i32_0 : i32, i32
  }
  func.func @transform_5(%arg0: i32) -> (i32, i32) {
    %c0_i32 = arith.constant 0 : i32
    %c0_i32_0 = arith.constant 0 : i32
    %c0_i32_1 = arith.constant 0 : i32
    return %c0_i32, %c0_i32_0 : i32, i32
  }
  func.func @transform_6(%arg0: i32) -> (i32, i32) {
    %c0_i32 = arith.constant 0 : i32
    %c0_i32_0 = arith.constant 0 : i32
    %c0_i32_1 = arith.constant 0 : i32
    return %c0_i32, %c0_i32_0 : i32, i32
  }
  func.func @transform_7(%arg0: i32) -> (i32, i32) {
    %c0_i32 = arith.constant 0 : i32
    %c0_i32_0 = arith.constant 0 : i32
    %c0_i32_1 = arith.constant 0 : i32
    return %c0_i32, %c0_i32_0 : i32, i32
  }
  func.func @transform_8(%arg0: i32) -> (i32, i32) {
    %c0_i32 = arith.constant 0 : i32
    %c0_i32_0 = arith.constant 0 : i32
    %c0_i32_1 = arith.constant 0 : i32
    return %c0_i32, %c0_i32_0 : i32, i32
  }
  func.func @transform_9(%arg0: i32) -> (i32, i32) {
    %c0_i32 = arith.constant 0 : i32
    %c0_i32_0 = arith.constant 0 : i32
    %c0_i32_1 = arith.constant 0 : i32
    return %c0_i32, %c0_i32_0 : i32, i32
  }
  func.func @transform_10(%arg0: i32) -> (i32, i32) {
    %c0_i32 = arith.constant 0 : i32
    %c0_i32_0 = arith.constant 0 : i32
    %c0_i32_1 = arith.constant 0 : i32
    return %c0_i32, %c0_i32_0 : i32, i32
  }
  func.func @transform_11(%arg0: i32) -> (i32, i32) {
    %c0_i32 = arith.constant 0 : i32
    %c0_i32_0 = arith.constant 0 : i32
    %c0_i32_1 = arith.constant 0 : i32
    return %c0_i32, %c0_i32_0 : i32, i32
  }
  func.func @transform_12(%arg0: i32) -> (i32, i32, i32) {
    %c0_i32 = arith.constant 0 : i32
    %c0_i32_0 = arith.constant 0 : i32
    %c0_i32_1 = arith.constant 0 : i32
    return %arg0, %c0_i32, %c0_i32_0 : i32, i32, i32
  }
  func.func @transform_13(%arg0: i32) -> (i32, i32, i32) {
    %c0_i32 = arith.constant 0 : i32
    %c0_i32_0 = arith.constant 0 : i32
    %c0_i32_1 = arith.constant 0 : i32
    return %arg0, %c0_i32, %c0_i32_0 : i32, i32, i32
  }
}

</mosaic_0001>

<bundles_post_ra>
// kernel: custom-call.50
= control target key start
LH: loop header
LB: loop body
LE: loop exit
PB: predicated region body
PF: predicated region fallthrough
CT: control target
= control target key end

     0   :  { %s6_s0 = inlined_call_operand.vmem [shape: f32[8,48], index: 0, kind: output, shape index: {}]  }

// kernel: custom-call.49
= control target key start
LH: loop header
LB: loop body
LE: loop exit
PB: predicated region body
PF: predicated region fallthrough
CT: control target
= control target key end

     0   :  { %s6_s0 = inlined_call_operand.vmem [shape: f32[8,64], index: 0, kind: output, shape index: {}]  }

// kernel: custom-call.51
= control target key start
LH: loop header
LB: loop body
LE: loop exit
PB: predicated region body
PF: predicated region fallthrough
CT: control target
= control target key end

     0   :  { %s6_s0 = inlined_call_operand.vmem [shape: f32[8,32], index: 0, kind: output, shape index: {}]  }

// kernel: custom-call.48
= control target key start
LH: loop header
LB: loop body
LE: loop exit
PB: predicated region body
PF: predicated region fallthrough
CT: control target
= control target key end

     0   :  { %s6_s0 = inlined_call_operand.vmem [shape: f32[8,128], index: 0, kind: output, shape index: {}]  }

// kernel: _lambda_.1
= control target key start
LH: loop header
LB: loop body
LE: loop exit
PB: predicated region body
PF: predicated region fallthrough
CT: control target
= control target key end

     0   :  { %19 = vsyncpa [#allocation3], 0  ;;  %s9217_s0 = inlined_call_operand.vmem [shape: f32[256,512], index: 0, kind: input, shape index: {}]   ;;  %s9218_s1 = inlined_call_operand.vmem [shape: f32[8,32,3], index: 1, kind: input, shape index: {}]   ;;  %s9219_s2 = inlined_call_operand.vmem [shape: bf16[512,384], index: 2, kind: input, shape index: {}]   ;;  %s9220_s3 = inlined_call_operand.vmem [shape: f32[1,384], index: 3, kind: input, shape index: {}]   ;;  %s9221_s4 = inlined_call_operand.vmem [shape: bf16[384,256], index: 4, kind: input, shape index: {}]   ;;  %s9222_s5 = inlined_call_operand.vmem [shape: f32[1,256], index: 5, kind: input, shape index: {}]   ;;  %s9223_s6 = inlined_call_operand.vmem [shape: bf16[256,256], index: 6, kind: input, shape index: {}]   ;;  %s9224_s7 = inlined_call_operand.vmem [shape: f32[1,256], index: 7, kind: input, shape index: {}]   ;;  %s9225_s8 = inlined_call_operand.vmem [shape: bf16[256,128], index: 8, kind: input, shape index: {}]   ;;  %s9226_s9 = inlined_call_operand.vmem [shape: f32[1,128], index: 9, kind: input, shape index: {}]   ;;  %s9227_s10 = inlined_call_operand.vmem [shape: bf16[128,16], index: 10, kind: input, shape index: {}]   ;;  %s9228_s11 = inlined_call_operand.vmem [shape: f32[1,16], index: 11, kind: input, shape index: {}]   ;;  %s9229_s12 = inlined_call_operand.vmem [shape: f32[8,16,4], index: 12, kind: output, shape index: {0}]   ;;  %s9230_s13 = inlined_call_operand.hbm [shape: f32[8,16,512], index: 13, kind: output, shape index: {1}]  }
   0x1   :  { %21 = vsyncpa [#allocation3 + $0x1], 0  ;;  %s6585_s25 = smov 0   ;;  %s6587_s26 = smov 0  }
   0x2   :  { %s6589_s27 = smov 0   ;;  %s6591_s28 = smov 0  }
   0x3 LB: > { %9236 = sst [smem:[#allocation5_spill]] %s6496_s25  ;;  %s6606_s29 = sadd.s32 4294967295, %s6508_s28   ;;  %s6508_s28 = sphi %s6591_s28, %s9245_s28   ;;  %s6504_s27 = sphi %s6589_s27, %s9247_s27   ;;  %s6500_s26 = sphi %s6587_s26, %s9249_s26   ;;  %s6496_s25 = sphi %s6585_s25, %s9248_s25  }
   0x4   : > { %9237 = sst [smem:[#allocation6_spill]] %s6504_s27  ;;  %s5168_s30 = sadd.s32 4294967294, %s6508_s28  }
   0x5   : > { %s6610_s14 = sadd.s32 1, %s6508_s28   ;;  %s322_s15 = sadd.s32 1, %s6504_s27 }
   0x6   : > { %9238 = sst [smem:[#allocation7_spill]] %s6610_s14  ;;  %s319_s16 = ssub.s32 %s6508_s28, %s6610_s14 }
   0x7   : > { %p332_p0 = scmp.ne.s32.totalorder %s6504_s27, %s6500_s26  ;;  %p320_p1 = scmp.eq.s32.totalorder %s319_s16, 0 }
   0x8   : > { %p333_p2 = scmp.eq.s32.totalorder %s6606_s29, 1  ;;  %p338_p3 = scmp.ne.s32.totalorder %s6500_s26, %s6496_s25 }
   0x9   : > { %p339_p4 = scmp.eq.s32.totalorder %s5168_s30, 1  ;;  %p5171_p7 = scmp.ge.s32.totalorder %s6508_s28, 1 }
   0xa   : > { %s6621_s17 = scalar_select %p320_p1, %s6504_s27, %s322_s15  }
   0xb   : > { %p6623_p5 = por %p333_p2, %p332_p0  ;;  %p6627_p6 = por %p339_p4, %p338_p3 }
   0xc   : > { %9239 = sst [smem:[#allocation8_spill]] %s6621_s17  ;;  %p407_p8 = scmp.lt.s32.totalorder %s6508_s28, 3 }
   0xd   : > { %s9241_s19 = scalar_select %p6627_p6, 1, 0 }
   0xe   : > { %p408_p9 = pnand %p5171_p7, %p407_p8 }
   0xf   : > { %9242 = sst [smem:[#allocation9_spill]] %s9241_s19  ;;  %s5173_s22 = sshll.u32 (!%p408_p9), %s6606_s29, 4 }
  0x10   : > { %411 = sbr.rel (%p408_p9) target bundleno = 2159 (0x86f), region = 68  ;;  %p465_p10 = scmp.lt.s32.totalorder (!%p408_p9), %s5173_s22, 31 }
  0x11   : > { %s5176_s21 = sshll.u32 (!%p408_p9), %s6606_s29, 2 }
  0x12   : > { %p472_p11 = scmp.lt.s32.totalorder (!%p408_p9), %s5176_s21, 7 }
  0x15   : > { %v5268_v0 = vld [vmem:[%s9219_s2 + $0xa8] sm:$0xf]  ;;  %v6053_v1 = vld [vmem:[%s9219_s2 + $0xb0] sm:$0xf0]  ;;  %v5256_v11 = vld [vmem:[%s9219_s2 + $0x90] sm:$0xf] }
  0x16   : > { %v5364_v2 = vld [vmem:[%s9219_s2 + $0x168] sm:$0xf]  ;;  %v5269_v3 = vor.u32 %v6053_v1, %v5268_v0  ;;  %v6077_v4 = vld [vmem:[%s9219_s2 + $0x170] sm:$0xf0]  ;;  %v6050_v13 = vld [vmem:[%s9219_s2 + $0x98] sm:$0xf0] }
  0x17   : > { %v5460_v5 = vld [vmem:[%s9219_s2 + $0x228] sm:$0xf]  ;;  %v6101_v6 = vld [vmem:[%s9219_s2 + $0x230] sm:$0xf0]  ;;  %v5365_v7 = vor.u32 %v6077_v4, %v5364_v2  ;;  %v5352_v14 = vld [vmem:[%s9219_s2 + $0x150] sm:$0xf]  ;;  %v5257_v16 = vor.u32 %v6050_v13, %v5256_v11 }
  0x18   : > { %v5461_v8 = vor.u32 %v6101_v6, %v5460_v5  ;;  %v5556_v9 = vld [vmem:[%s9219_s2 + $0x2e8] sm:$0xf]  ;;  %v6125_v10 = vld [vmem:[%s9219_s2 + $0x2f0] sm:$0xf0]  ;;  %1246 = vmatpush.bf16.msra.mxu0 %v5269_v3  ;;  %v6074_v15 = vld [vmem:[%s9219_s2 + $0x158] sm:$0xf0] }
  0x19   : > { %v5557_v12 = vor.u32 %v6125_v10, %v5556_v9  ;;  %1295 = vmatpush.bf16.msra.mxu1 %v5365_v7  ;;  %v5353_v17 = vor.u32 %v6074_v15, %v5352_v14  ;;  %v5448_v18 = vld [vmem:[%s9219_s2 + $0x210] sm:$0xf]  ;;  %v6098_v19 = vld [vmem:[%s9219_s2 + $0x218] sm:$0xf0]  ;;  %v5244_v23 = vld [vmem:[%s9219_s2 + $0x78] sm:$0xf] }
  0x1a   : > { %1344 = vmatpush.bf16.msra.mxu2 %v5461_v8  ;;  %v5544_v20 = vld [vmem:[%s9219_s2 + $0x2d0] sm:$0xf]  ;;  %v5449_v21 = vor.u32 %v6098_v19, %v5448_v18  ;;  %v6122_v22 = vld [vmem:[%s9219_s2 + $0x2d8] sm:$0xf0]  ;;  %v6047_v24 = vld [vmem:[%s9219_s2 + $0x80] sm:$0xf0] }
  0x1b   : > { %1393 = vmatpush.bf16.msra.mxu3 %v5557_v12  ;;  %v5545_v25 = vor.u32 %v6122_v22, %v5544_v20  ;;  %v5340_v26 = vld [vmem:[%s9219_s2 + $0x138] sm:$0xf]  ;;  %v6071_v27 = vld [vmem:[%s9219_s2 + $0x140] sm:$0xf0]  ;;  %v5245_v29 = vor.u32 %v6047_v24, %v5244_v23  ;;  %v5232_v35 = vld [vmem:[%s9219_s2 + $0x60] sm:$0xf] }
  0x1c   : > { %v5436_v28 = vld [vmem:[%s9219_s2 + $0x1f8] sm:$0xf]  ;;  %1247 = vmatpush.bf16.msra.mxu0 %v5257_v16  ;;  %v6095_v30 = vld [vmem:[%s9219_s2 + $0x200] sm:$0xf0]  ;;  %v5341_v33 = vor.u32 %v6071_v27, %v5340_v26  ;;  %v6044_v36 = vld [vmem:[%s9219_s2 + $0x68] sm:$0xf0] }
  0x1d   : > { %v5532_v31 = vld [vmem:[%s9219_s2 + $0x2b8] sm:$0xf]  ;;  %v6119_v32 = vld [vmem:[%s9219_s2 + $0x2c0] sm:$0xf0]  ;;  %1296 = vmatpush.bf16.msra.mxu1 %v5353_v17  ;;  %v5437_v34 = vor.u32 %v6095_v30, %v5436_v28  ;;  %v5328_v37 = vld [vmem:[%s9219_s2 + $0x120] sm:$0xf]  ;;  %v5233_v44 = vor.u32 %v6044_v36, %v5232_v35 }
  0x1e   : > { %1345 = vmatpush.bf16.msra.mxu2 %v5449_v21  ;;  %v5533_v38 = vor.u32 %v6119_v32, %v5532_v31  ;;  %v6068_v39 = vld [vmem:[%s9219_s2 + $0x128] sm:$0xf0]  ;;  %v5424_v40 = vld [vmem:[%s9219_s2 + $0x1e0] sm:$0xf]  ;;  %v5220_v47 = vld [vmem:[%s9219_s2 + $0x48] sm:$0xf] }
  0x1f   : > { %1394 = vmatpush.bf16.msra.mxu3 %v5545_v25  ;;  %v6092_v41 = vld [vmem:[%s9219_s2 + $0x1e8] sm:$0xf0]  ;;  %v5520_v42 = vld [vmem:[%s9219_s2 + $0x2a0] sm:$0xf]  ;;  %v5329_v45 = vor.u32 %v6068_v39, %v5328_v37  ;;  %v6041_v48 = vld [vmem:[%s9219_s2 + $0x50] sm:$0xf0] }
  0x20   : > { %v6116_v43 = vld [vmem:[%s9219_s2 + $0x2a8] sm:$0xf0]  ;;  %1248 = vmatpush.bf16.msra.mxu0 %v5245_v29  ;;  %v5425_v46 = vor.u32 %v6092_v41, %v5424_v40  ;;  %v5316_v49 = vld [vmem:[%s9219_s2 + $0x108] sm:$0xf]  ;;  %v6065_v51 = vld [vmem:[%s9219_s2 + $0x110] sm:$0xf0]  ;;  %v5221_v56 = vor.u32 %v6041_v48, %v5220_v47 }
  0x21   : > { %1297 = vmatpush.bf16.msra.mxu1 %v5341_v33  ;;  %v5521_v50 = vor.u32 %v6116_v43, %v5520_v42  ;;  %v5412_v52 = vld [vmem:[%s9219_s2 + $0x1c8] sm:$0xf]  ;;  %v6089_v53 = vld [vmem:[%s9219_s2 + $0x1d0] sm:$0xf0]  ;;  %v5317_v57 = vor.u32 %v6065_v51, %v5316_v49  ;;  %v5208_v59 = vld [vmem:[%s9219_s2 + $0x30] sm:$0xf] }
  0x22   : > { %1346 = vmatpush.bf16.msra.mxu2 %v5437_v34  ;;  %v5508_v54 = vld [vmem:[%s9219_s2 + $0x288] sm:$0xf]  ;;  %v6113_v55 = vld [vmem:[%s9219_s2 + $0x290] sm:$0xf0]  ;;  %v5413_v58 = vor.u32 %v6089_v53, %v5412_v52  ;;  %v6038_v60 = vld [vmem:[%s9219_s2 + $0x38] sm:$0xf0] }
  0x23   : > { %1395 = vmatpush.bf16.msra.mxu3 %v5533_v38  ;;  %v5304_v61 = vld [vmem:[%s9219_s2 + $0xf0] sm:$0xf]  ;;  %v5509_v62 = vor.u32 %v6113_v55, %v5508_v54  ;;  %v6062_v63 = vld [vmem:[%s9219_s2 + $0xf8] sm:$0xf0]  ;;  %v5209_v4 = vor.u32 %v6038_v60, %v5208_v59  ;;  %v5196_v5 = vld [vmem:[%s9219_s2 + $0x18] sm:$0xf] }
  0x24   : > { %1249 = vmatpush.bf16.msra.mxu0 %v5233_v44  ;;  %v5400_v0 = vld [vmem:[%s9219_s2 + $0x1b0] sm:$0xf]  ;;  %v6086_v1 = vld [vmem:[%s9219_s2 + $0x1b8] sm:$0xf0]  ;;  %v6035_v6 = vld [vmem:[%s9219_s2 + $0x20] sm:$0xf0]  ;;  %v5305_v8 = vor.u32 %v6062_v63, %v5304_v61 }
  0x25   : > { %1298 = vmatpush.bf16.msra.mxu1 %v5329_v45  ;;  %v5496_v2 = vld [vmem:[%s9219_s2 + $0x270] sm:$0xf]  ;;  %v6110_v3 = vld [vmem:[%s9219_s2 + $0x278] sm:$0xf0]  ;;  %v5292_v7 = vld [vmem:[%s9219_s2 + $0xd8] sm:$0xf]  ;;  %v5401_v9 = vor.u32 %v6086_v1, %v5400_v0  ;;  %v5197_v18 = vor.u32 %v6035_v6, %v5196_v5 }
  0x26   : > { %1347 = vmatpush.bf16.msra.mxu2 %v5425_v46  ;;  %v6059_v10 = vld [vmem:[%s9219_s2 + $0xe0] sm:$0xf0]  ;;  %v5388_v11 = vld [vmem:[%s9219_s2 + $0x198] sm:$0xf]  ;;  %v5497_v13 = vor.u32 %v6110_v3, %v5496_v2  ;;  %v5184_v16 = vld [vmem:[%s9219_s2] sm:$0xf] }
  0x27   : > { %1396 = vmatpush.bf16.msra.mxu3 %v5521_v50  ;;  %v6083_v12 = vld [vmem:[%s9219_s2 + $0x1a0] sm:$0xf0]  ;;  %v5484_v14 = vld [vmem:[%s9219_s2 + $0x258] sm:$0xf]  ;;  %v6032_v17 = vld [vmem:[%s9219_s2 + $0x8] sm:$0xf0]  ;;  %v5293_v22 = vor.u32 %v6059_v10, %v5292_v7 }
  0x28   : > { %1250 = vmatpush.bf16.msra.mxu0 %v5221_v56  ;;  %v6107_v15 = vld [vmem:[%s9219_s2 + $0x260] sm:$0xf0]  ;;  %v5280_v19 = vld [vmem:[%s9219_s2 + $0xc0] sm:$0xf]  ;;  %v6056_v20 = vld [vmem:[%s9219_s2 + $0xc8] sm:$0xf0]  ;;  %v5389_v23 = vor.u32 %v6083_v12, %v5388_v11  ;;  %v5185_v30 = vor.u32 %v6032_v17, %v5184_v16 }
  0x29   : > { %1299 = vmatpush.bf16.msra.mxu1 %v5317_v57  ;;  %v5376_v21 = vld [vmem:[%s9219_s2 + $0x180] sm:$0xf]  ;;  %v6080_v24 = vld [vmem:[%s9219_s2 + $0x188] sm:$0xf0]  ;;  %s9251_s22 = smov (!%p465_p10, %s5173_s22), 31  ;;  %v5485_v26 = vor.u32 %v6107_v15, %v5484_v14  ;;  %v5281_v33 = vor.u32 %v6056_v20, %v5280_v19  ;;  %s9253_s21 = smov (!%p472_p11, %s5176_s21), 7 }
  0x2a   : > { %1348 = vmatpush.bf16.msra.mxu2 %v5413_v58  ;;  %v5472_v25 = vld [vmem:[%s9219_s2 + $0x240] sm:$0xf]  ;;  %v6104_v27 = vld [vmem:[%s9219_s2 + $0x248] sm:$0xf0]  ;;  %s6028_s14 = sshll.u32 %s9251_s22, 5  ;;  %v5377_v34 = vor.u32 %v6080_v24, %v5376_v21  ;;  %s6029_s23 = sshll.u32 %s9253_s21, 5 }
  0x2b   : > { %1397 = vmatpush.bf16.msra.mxu3 %v5509_v62  ;;  %v6052_v28 = vld [vmem:[%s9219_s2 + $0xac] sm:$0xf]  ;;  %v5270_v29 = vld [vmem:[%s9219_s2 + $0xb4] sm:$0xf0]  ;;  %s6835_s30 = scalar_lea.vmem %s9217_s0, %s6028_s14  ;;  %v6049_v38 = vld [vmem:[%s9219_s2 + $0x94] sm:$0xf]  ;;  %v5473_v39 = vor.u32 %v6104_v27, %v5472_v25  ;;  %s8254_s22 = scalar_lea.vmem %s9218_s1, %s6029_s23 }
  0x2c   : > { %1251 = vmatpush.bf16.msra.mxu0 %v5209_v4  ;;  %v6076_v31 = vld [vmem:[%s9219_s2 + $0x16c] sm:$0xf]  ;;  %v5366_v32 = vld [vmem:[%s9219_s2 + $0x174] sm:$0xf0]  ;;  %v486_v35 = vld [vmem:[%s6835_s30] sm:$0xff]  ;;  %v5273_v43 = vor.u32 %v6052_v28, %v5270_v29  ;;  %vm4149_vm0 = vcmask 23552  }
  0x2d   : > { %1300 = vmatpush.bf16.msra.mxu1 %v5305_v8  ;;  %v490_v36 = vld [vmem:[%s6835_s30 + $0x20] sm:$0xff]  ;;  %v487_v37 = vld [vmem:[%s6835_s30 + $0x8] sm:$0xff]  ;;  %v488_v41 = vld [vmem:[%s6835_s30 + $0x10] sm:$0xff]  ;;  %v5369_v47 = vor.u32 %v6076_v31, %v5366_v32  ;;  %vm4347_vm1 = vcmask 130112   ;;  %vm4351_vm2 = vcmask 195712   ;;  %vm4355_vm3 = vcmask 261312  }
  0x2e   : > { %1349 = vmatpush.bf16.msra.mxu2 %v5401_v9  ;;  %v491_v40 = vld [vmem:[%s6835_s30 + $0x28] sm:$0xff]  ;;  %v492_v42 = vld [vmem:[%s6835_s30 + $0x30] sm:$0xff]  ;;  %v6852_v44 = vpack.c.bf16 %v490_v36, %v486_v35  ;;  %v489_v45 = vld [vmem:[%s6835_s30 + $0x18] sm:$0xff]  ;;  %vm3355_vm4 = vcmask 130048   ;;  %vm3656_vm5 = vcmask 261120   ;;  %s6030_s19 = sshll.u32 %s9253_s21, 4 }
  0x2f   : > { %1398 = vmatpush.bf16.msra.mxu3 %v5497_v13  ;;  %v493_v46 = vld [vmem:[%s6835_s30 + $0x38] sm:$0xff]  ;;  %v5258_v48 = vld [vmem:[%s9219_s2 + $0x9c] sm:$0xf0]  ;;  %v6859_v49 = vpack.c.bf16 %v491_v40, %v487_v37  ;;  %v6861_v50 = vpack.c.bf16 %v492_v42, %v488_v41  ;;  %v6073_v51 = vld [vmem:[%s9219_s2 + $0x154] sm:$0xf]  ;;  %s8897_s17 = scalar_lea.vmem %s9229_s12, %s6030_s19  ;;  %s461_s21 = sand.u32 1, %s6500_s26  }
  0x30   : > { %1252 = vmatpush.bf16.msra.mxu0 %v5197_v18  ;;  %v5354_v52 = vld [vmem:[%s9219_s2 + $0x15c] sm:$0xf0]  ;;  %v6869_v53 = vpack.c.bf16 %v493_v46, %v489_v45  ;;  %v5261_v54 = vor.u32 %v6049_v38, %v5258_v48  ;;  %v6046_v56 = vld [vmem:[%s9219_s2 + $0x7c] sm:$0xf]  ;;  %v5246_v57 = vld [vmem:[%s9219_s2 + $0x84] sm:$0xf0] }
  0x31   : > { %1301 = vmatpush.bf16.msra.mxu1 %v5293_v22  ;;  %v5357_v55 = vor.u32 %v6073_v51, %v5354_v52  ;;  %v6070_v58 = vld [vmem:[%s9219_s2 + $0x13c] sm:$0xf]  ;;  %v5249_v59 = vor.u32 %v6046_v56, %v5246_v57  ;;  %v5342_v60 = vld [vmem:[%s9219_s2 + $0x144] sm:$0xf0]  ;;  %v494_v62 = vld [vmem:[%s6835_s30 + $0x40] sm:$0xff]  ;;  %vm5000_vm14 = vcmask 31768  }
  0x32   : > { %1350 = vmatpush.bf16.msra.mxu2 %v5389_v23  ;;  %v5345_v61 = vor.u32 %v6070_v58, %v5342_v60  ;;  %v498_v63 = vld [vmem:[%s6835_s30 + $0x60] sm:$0xff]  ;;  %v495_v0 = vld [vmem:[%s6835_s30 + $0x48] sm:$0xff]  ;;  %v496_v2 = vld [vmem:[%s6835_s30 + $0x50] sm:$0xff] }
  0x33   : > { %1399 = vmatpush.bf16.msra.mxu3 %v5485_v26  ;;  %v499_v1 = vld [vmem:[%s6835_s30 + $0x68] sm:$0xff]  ;;  %v500_v3 = vld [vmem:[%s6835_s30 + $0x70] sm:$0xff]  ;;  %v497_v4 = vld [vmem:[%s6835_s30 + $0x58] sm:$0xff]  ;;  %v6895_v6 = vpack.c.bf16 %v498_v63, %v494_v62 }
  0x34   : > { %1253 = vmatpush.bf16.msra.mxu0 %v5185_v30  ;;  %v501_v5 = vld [vmem:[%s6835_s30 + $0x78] sm:$0xff]  ;;  %v6897_v7 = vpack.c.bf16 %v499_v1, %v495_v0  ;;  %v6899_v8 = vpack.c.bf16 %v500_v3, %v496_v2  ;;  %v6043_v10 = vld [vmem:[%s9219_s2 + $0x64] sm:$0xf]  ;;  %v5234_v11 = vld [vmem:[%s9219_s2 + $0x6c] sm:$0xf0] }
  0x35   : > { %1302 = vmatpush.bf16.msra.mxu1 %v5281_v33  ;;  %v6901_v9 = vpack.c.bf16 %v501_v5, %v497_v4  ;;  %v6067_v12 = vld [vmem:[%s9219_s2 + $0x124] sm:$0xf]  ;;  %v5237_v13 = vor.u32 %v6043_v10, %v5234_v11  ;;  %v5330_v14 = vld [vmem:[%s9219_s2 + $0x12c] sm:$0xf0]  ;;  %v503_v18 = vld [vmem:[%s6835_s30 + $0x88] sm:$0xff] }
  0x36   : > { %1351 = vmatpush.bf16.msra.mxu2 %v5377_v34  ;;  %v5333_v15 = vor.u32 %v6067_v12, %v5330_v14  ;;  %v502_v16 = vld [vmem:[%s6835_s30 + $0x80] sm:$0xff]  ;;  %v507_v19 = vld [vmem:[%s6835_s30 + $0xa8] sm:$0xff]  ;;  %v504_v20 = vld [vmem:[%s6835_s30 + $0x90] sm:$0xff] }
  0x37   : > { %1400 = vmatpush.bf16.msra.mxu3 %v5473_v39  ;;  %1254 = vmatmul.bf16.vlgmr.msra.gmra.mxu0 %v6852_v44  ;;  %v506_v17 = vld [vmem:[%s6835_s30 + $0xa0] sm:$0xff]  ;;  %v508_v21 = vld [vmem:[%s6835_s30 + $0xb0] sm:$0xff]  ;;  %v505_v22 = vld [vmem:[%s6835_s30 + $0x98] sm:$0xff]  ;;  %v6929_v25 = vpack.c.bf16 %v507_v19, %v503_v18 }
  0x38   : > { %1442 = vmatpush.bf16.msrb.mxu0 %v5273_v43  ;;  %1303 = vmatmul.bf16.vlgmr.msra.gmra.mxu1 %v6859_v49  ;;  %v509_v23 = vld [vmem:[%s6835_s30 + $0xb8] sm:$0xff]  ;;  %v6927_v24 = vpack.c.bf16 %v506_v17, %v502_v16  ;;  %v6931_v26 = vpack.c.bf16 %v508_v21, %v504_v20  ;;  %v6040_v28 = vld [vmem:[%s9219_s2 + $0x4c] sm:$0xf]  ;;  %v510_v34 = vld [vmem:[%s6835_s30 + $0xc0] sm:$0xff] }
  0x39   : > { %1491 = vmatpush.bf16.msrb.mxu1 %v5369_v47  ;;  %1352 = vmatmul.bf16.vlgmr.msra.gmra.mxu2 %v6861_v50  ;;  %v6933_v27 = vpack.c.bf16 %v509_v23, %v505_v22  ;;  %v5222_v29 = vld [vmem:[%s9219_s2 + $0x54] sm:$0xf0]  ;;  %v6064_v30 = vld [vmem:[%s9219_s2 + $0x10c] sm:$0xf]  ;;  %v514_v35 = vld [vmem:[%s6835_s30 + $0xe0] sm:$0xff] }
  0x3a   : > { %1401 = vmatmul.bf16.vlgmr.msra.gmra.mxu3 %v6869_v53  ;;  %v5225_v31 = vor.u32 %v6040_v28, %v5222_v29  ;;  %v5318_v32 = vld [vmem:[%s9219_s2 + $0x114] sm:$0xf0]  ;;  %v511_v36 = vld [vmem:[%s6835_s30 + $0xc8] sm:$0xff]  ;;  %v512_v38 = vld [vmem:[%s6835_s30 + $0xd0] sm:$0xff]  ;;  %v6959_v42 = vpack.c.bf16 %v514_v35, %v510_v34 }
  0x3b   : > { %v5321_v33 = vor.u32 %v6064_v30, %v5318_v32  ;;  %v515_v37 = vld [vmem:[%s6835_s30 + $0xe8] sm:$0xff]  ;;  %v516_v39 = vld [vmem:[%s6835_s30 + $0xf0] sm:$0xff]  ;;  %v513_v40 = vld [vmem:[%s6835_s30 + $0xd8] sm:$0xff] }
  0x3c   : > { %1443 = vmatpush.bf16.msrb.mxu0 %v5261_v54  ;;  %v517_v41 = vld [vmem:[%s6835_s30 + $0xf8] sm:$0xff]  ;;  %v6961_v43 = vpack.c.bf16 %v515_v37, %v511_v36  ;;  %v6963_v45 = vpack.c.bf16 %v516_v39, %v512_v38  ;;  %v6037_v47 = vld [vmem:[%s9219_s2 + $0x34] sm:$0xf]  ;;  %v5210_v48 = vld [vmem:[%s9219_s2 + $0x3c] sm:$0xf0] }
  0x3d   : > { %1492 = vmatpush.bf16.msrb.mxu1 %v5357_v55  ;;  %v6965_v46 = vpack.c.bf16 %v517_v41, %v513_v40  ;;  %v6061_v51 = vld [vmem:[%s9219_s2 + $0xf4] sm:$0xf]  ;;  %v5213_v52 = vor.u32 %v6037_v47, %v5210_v48  ;;  %v5306_v54 = vld [vmem:[%s9219_s2 + $0xfc] sm:$0xf0]  ;;  %v519_v58 = vld [vmem:[%s6835_s30 + $0x108] sm:$0xff] }
  0x3e   : > { %v5309_v55 = vor.u32 %v6061_v51, %v5306_v54  ;;  %v518_v56 = vld [vmem:[%s6835_s30 + $0x100] sm:$0xff]  ;;  %v520_v60 = vld [vmem:[%s6835_s30 + $0x110] sm:$0xff]  ;;  %v521_v62 = vld [vmem:[%s6835_s30 + $0x118] sm:$0xff] }
  0x3f   : > { %v522_v57 = vld [vmem:[%s6835_s30 + $0x120] sm:$0xff]  ;;  %v525_v63 = vld [vmem:[%s6835_s30 + $0x138] sm:$0xff]  ;;  %v6100_v4 = vld [vmem:[%s9219_s2 + $0x22c] sm:$0xf] }
  0x40   : > { %1444 = vmatpush.bf16.msrb.mxu0 %v5249_v59  ;;  %v523_v59 = vld [vmem:[%s6835_s30 + $0x128] sm:$0xff]  ;;  %v6991_v0 = vpack.c.bf16 %v522_v57, %v518_v56  ;;  %v6997_v3 = vpack.c.bf16 %v525_v63, %v521_v62  ;;  %v5462_v5 = vld [vmem:[%s9219_s2 + $0x234] sm:$0xf0]  ;;  %v6034_v11 = vld [vmem:[%s9219_s2 + $0x1c] sm:$0xf] }
  0x41   : > { %1493 = vmatpush.bf16.msrb.mxu1 %v5345_v61  ;;  %v524_v61 = vld [vmem:[%s6835_s30 + $0x130] sm:$0xff]  ;;  %v6993_v1 = vpack.c.bf16 %v523_v59, %v519_v58  ;;  %v6124_v10 = vld [vmem:[%s9219_s2 + $0x2ec] sm:$0xf]  ;;  %v5198_v12 = vld [vmem:[%s9219_s2 + $0x24] sm:$0xf0] }
  0x42   : > { %v6995_v2 = vpack.c.bf16 %v524_v61, %v520_v60  ;;  %v5558_v14 = vld [vmem:[%s9219_s2 + $0x2f4] sm:$0xf0]  ;;  %v6058_v17 = vld [vmem:[%s9219_s2 + $0xdc] sm:$0xf]  ;;  %v5294_v18 = vld [vmem:[%s9219_s2 + $0xe4] sm:$0xf0] }
  0x43   : > { %v5561_v16 = vor.u32 %v6124_v10, %v5558_v14  ;;  %v6097_v19 = vld [vmem:[%s9219_s2 + $0x214] sm:$0xf]  ;;  %v5297_v20 = vor.u32 %v6058_v17, %v5294_v18  ;;  %v5450_v21 = vld [vmem:[%s9219_s2 + $0x21c] sm:$0xf0]  ;;  %v6094_v30 = vld [vmem:[%s9219_s2 + $0x1fc] sm:$0xf] }
  0x44   : > { %1445 = vmatpush.bf16.msrb.mxu0 %v5237_v13  ;;  %v5465_v13 = vor.u32 %v6100_v4, %v5462_v5  ;;  %v6121_v22 = vld [vmem:[%s9219_s2 + $0x2d4] sm:$0xf]  ;;  %v5546_v23 = vld [vmem:[%s9219_s2 + $0x2dc] sm:$0xf0]  ;;  %v5453_v28 = vor.u32 %v6097_v19, %v5450_v21  ;;  %v6118_v32 = vld [vmem:[%s9219_s2 + $0x2bc] sm:$0xf] }
  0x45   : > { %1494 = vmatpush.bf16.msrb.mxu1 %v5333_v15  ;;  %v5201_v15 = vor.u32 %v6034_v11, %v5198_v12  ;;  %1589 = vmatpush.bf16.msrb.mxu3 %v5561_v16  ;;  %v5549_v29 = vor.u32 %v6121_v22, %v5546_v23  ;;  %v526_v34 = vld [vmem:[%s6835_s30 + $0x140] sm:$0xff]  ;;  %v527_v37 = vld [vmem:[%s6835_s30 + $0x148] sm:$0xff]  ;;  %v5426_v40 = vld [vmem:[%s9219_s2 + $0x1ec] sm:$0xf0] }
  0x46   : > { %1540 = vmatpush.bf16.msrb.mxu2 %v5465_v13  ;;  %v530_v35 = vld [vmem:[%s6835_s30 + $0x160] sm:$0xff]  ;;  %v531_v41 = vld [vmem:[%s6835_s30 + $0x168] sm:$0xff]  ;;  %v528_v47 = vld [vmem:[%s6835_s30 + $0x150] sm:$0xff] }
  0x47   : > { %1259 = vmatmul.bf16.gmra.mxu0 %v6895_v6  ;;  %v6091_v39 = vld [vmem:[%s9219_s2 + $0x1e4] sm:$0xf]  ;;  %v532_v48 = vld [vmem:[%s6835_s30 + $0x170] sm:$0xff]  ;;  %v529_v51 = vld [vmem:[%s6835_s30 + $0x158] sm:$0xff]  ;;  %v7065_v54 = vpack.c.bf16 %v530_v35, %v526_v34  ;;  %v7073_v58 = vpack.c.bf16 %v531_v41, %v527_v37 }
  0x48   : > { %1308 = vmatmul.bf16.gmra.mxu1 %v6897_v7  ;;  %1446 = vmatpush.bf16.msrb.mxu0 %v5225_v31  ;;  %v5438_v31 = vld [vmem:[%s9219_s2 + $0x204] sm:$0xf0]  ;;  %v6115_v56 = vld [vmem:[%s9219_s2 + $0x2a4] sm:$0xf]  ;;  %v5522_v57 = vld [vmem:[%s9219_s2 + $0x2ac] sm:$0xf0]  ;;  %v7075_v59 = vpack.c.bf16 %v532_v48, %v528_v47 }
  0x49   : > { %1357 = vmatmul.bf16.gmra.mxu2 %v6899_v8  ;;  %1495 = vmatpush.bf16.msrb.mxu1 %v5321_v33  ;;  %v5534_v33 = vld [vmem:[%s9219_s2 + $0x2c4] sm:$0xf0]  ;;  %v5441_v36 = vor.u32 %v6094_v30, %v5438_v31  ;;  %v5525_v61 = vor.u32 %v6115_v56, %v5522_v57  ;;  %v6088_v62 = vld [vmem:[%s9219_s2 + $0x1cc] sm:$0xf]  ;;  %v5414_v63 = vld [vmem:[%s9219_s2 + $0x1d4] sm:$0xf0] }
  0x4a   : > { %1406 = vmatmul.bf16.gmra.mxu3 %v6901_v9  ;;  %1541 = vmatpush.bf16.msrb.mxu2 %v5453_v28  ;;  %v5537_v38 = vor.u32 %v6118_v32, %v5534_v33  ;;  %v6112_v4 = vld [vmem:[%s9219_s2 + $0x28c] sm:$0xf]  ;;  %v6031_v5 = vld [vmem:[%s9219_s2 + $0x4] sm:$0xf]  ;;  %v5186_v10 = vld [vmem:[%s9219_s2 + $0xc] sm:$0xf0]  ;;  %v5417_v11 = vor.u32 %v6088_v62, %v5414_v63 }
  0x4b   : > { %1590 = vmatpush.bf16.msrb.mxu3 %v5549_v29  ;;  %v5510_v12 = vld [vmem:[%s9219_s2 + $0x294] sm:$0xf0]  ;;  %v5189_v13 = vor.u32 %v6031_v5, %v5186_v10  ;;  %v5282_v16 = vld [vmem:[%s9219_s2 + $0xcc] sm:$0xf0]  ;;  %v6085_v17 = vld [vmem:[%s9219_s2 + $0x1b4] sm:$0xf] }
  0x4c   : > { %1447 = vmatpush.bf16.msrb.mxu0 %v5213_v52  ;;  %v533_v52 = vld [vmem:[%s6835_s30 + $0x178] sm:$0xff]  ;;  %v5513_v14 = vor.u32 %v6112_v4, %v5510_v12  ;;  %v5402_v19 = vld [vmem:[%s9219_s2 + $0x1bc] sm:$0xf0]  ;;  %v5390_v28 = vld [vmem:[%s9219_s2 + $0x1a4] sm:$0xf0] }
  0x4d   : > { %1496 = vmatpush.bf16.msrb.mxu1 %v5309_v55  ;;  %v5429_v55 = vor.u32 %v6091_v39, %v5426_v40  ;;  %v7077_v60 = vpack.c.bf16 %v533_v52, %v529_v51  ;;  %v5498_v21 = vld [vmem:[%s9219_s2 + $0x27c] sm:$0xf0]  ;;  %v5405_v22 = vor.u32 %v6085_v17, %v5402_v19  ;;  %v6082_v23 = vld [vmem:[%s9219_s2 + $0x19c] sm:$0xf]  ;;  %v5486_v32 = vld [vmem:[%s9219_s2 + $0x264] sm:$0xf0] }
  0x4e   : > { %1542 = vmatpush.bf16.msrb.mxu2 %v5441_v36  ;;  %v5393_v30 = vor.u32 %v6082_v23, %v5390_v28  ;;  %v6106_v31 = vld [vmem:[%s9219_s2 + $0x25c] sm:$0xf]  ;;  %v534_v33 = vld [vmem:[%s6835_s30 + $0x180] sm:$0xff]  ;;  %v535_v35 = vld [vmem:[%s6835_s30 + $0x188] sm:$0xff] }
  0x4f   : > { %1591 = vmatpush.bf16.msrb.mxu3 %v5537_v38  ;;  %v538_v34 = vld [vmem:[%s6835_s30 + $0x1a0] sm:$0xff]  ;;  %v539_v36 = vld [vmem:[%s6835_s30 + $0x1a8] sm:$0xff]  ;;  %v536_v37 = vld [vmem:[%s6835_s30 + $0x190] sm:$0xff]  ;;  %v5489_v41 = vor.u32 %v6106_v31, %v5486_v32 }
  0x50   : > { %1448 = vmatpush.bf16.msrb.mxu0 %v5201_v15  ;;  %v6055_v15 = vld [vmem:[%s9219_s2 + $0xc4] sm:$0xf]  ;;  %v540_v38 = vld [vmem:[%s6835_s30 + $0x1b0] sm:$0xff]  ;;  %v537_v39 = vld [vmem:[%s6835_s30 + $0x198] sm:$0xff]  ;;  %v7139_v47 = vpack.c.bf16 %v538_v34, %v534_v33 }
  0x51   : > { %1497 = vmatpush.bf16.msrb.mxu1 %v5297_v20  ;;  %v5285_v18 = vor.u32 %v6055_v15, %v5282_v16  ;;  %v6109_v20 = vld [vmem:[%s9219_s2 + $0x274] sm:$0xf]  ;;  %v541_v40 = vld [vmem:[%s6835_s30 + $0x1b8] sm:$0xff]  ;;  %v6079_v48 = vld [vmem:[%s9219_s2 + $0x184] sm:$0xf]  ;;  %v7152_v56 = vpack.c.bf16 %v540_v38, %v536_v37 }
  0x52   : > { %1543 = vmatpush.bf16.msrb.mxu2 %v5429_v55  ;;  %v5501_v29 = vor.u32 %v6109_v20, %v5498_v21  ;;  %v5378_v51 = vld [vmem:[%s9219_s2 + $0x18c] sm:$0xf0]  ;;  %v6103_v52 = vld [vmem:[%s9219_s2 + $0x244] sm:$0xf]  ;;  %v7150_v55 = vpack.c.bf16 %v539_v36, %v535_v35  ;;  %v7157_v62 = vpack.c.bf16 %v541_v40, %v537_v39  ;;  %v6054_v5 = vld [vmem:[%s9219_s2 + $0xb8] sm:$0xf0] }
  0x53   : > { %1592 = vmatpush.bf16.msrb.mxu3 %v5525_v61  ;;  %v5381_v57 = vor.u32 %v6079_v48, %v5378_v51  ;;  %v5474_v61 = vld [vmem:[%s9219_s2 + $0x24c] sm:$0xf0]  ;;  %v6078_v12 = vld [vmem:[%s9219_s2 + $0x178] sm:$0xf0]  ;;  %v546_v15 = vld [vmem:[%s6835_s30 + $0x1e0] sm:$0xff] }
  0x54   : > { %1449 = vmatpush.bf16.msrb.mxu0 %v5189_v13  ;;  %v5477_v63 = vor.u32 %v6103_v52, %v5474_v61  ;;  %v5276_v4 = vld [vmem:[%s9219_s2 + $0xb0] sm:$0xf]  ;;  %v543_v16 = vld [vmem:[%s6835_s30 + $0x1c8] sm:$0xff]  ;;  %v545_v20 = vld [vmem:[%s6835_s30 + $0x1d8] sm:$0xff] }
  0x55   : > { %1498 = vmatpush.bf16.msrb.mxu1 %v5285_v18  ;;  %v5372_v10 = vld [vmem:[%s9219_s2 + $0x170] sm:$0xf]  ;;  %v547_v17 = vld [vmem:[%s6835_s30 + $0x1e8] sm:$0xff]  ;;  %v549_v21 = vld [vmem:[%s6835_s30 + $0x1f8] sm:$0xff] }
  0x56   : > { %1544 = vmatpush.bf16.msrb.mxu2 %v5417_v11  ;;  %v5277_v11 = vor.u32 %v6054_v5, %v5276_v4  ;;  %v5373_v13 = vor.u32 %v6078_v12, %v5372_v10  ;;  %v544_v18 = vld [vmem:[%s6835_s30 + $0x1d0] sm:$0xff]  ;;  %v7185_v23 = vpack.c.bf16 %v547_v17, %v543_v16  ;;  %v6051_v31 = vld [vmem:[%s9219_s2 + $0xa0] sm:$0xf0]  ;;  %v5360_v32 = vld [vmem:[%s9219_s2 + $0x158] sm:$0xf] }
  0x57   : > { %1264 = vmatmul.bf16.gmra.mxu0 %v6927_v24  ;;  %1593 = vmatpush.bf16.msrb.mxu3 %v5513_v14  ;;  %v542_v14 = vld [vmem:[%s6835_s30 + $0x1c0] sm:$0xff]  ;;  %v548_v19 = vld [vmem:[%s6835_s30 + $0x1f0] sm:$0xff]  ;;  %v6048_v51 = vld [vmem:[%s9219_s2 + $0x88] sm:$0xf0] }
  0x58   : > { %1313 = vmatmul.bf16.gmra.mxu1 %v6929_v25  ;;  %1638 = vmatpush.bf16.msra.mxu0 %v5277_v11  ;;  %v7187_v28 = vpack.c.bf16 %v548_v19, %v544_v18  ;;  %v6075_v34 = vld [vmem:[%s9219_s2 + $0x160] sm:$0xf0]  ;;  %v7210_v36 = vld [vmem:[%s9220_s3] sm:$0x7]  ;;  %v6072_v61 = vld [vmem:[%s9219_s2 + $0x148] sm:$0xf0] }
  0x59   : > { %1362 = vmatmul.bf16.gmra.mxu2 %v6931_v26  ;;  %1687 = vmatpush.bf16.msra.mxu1 %v5373_v13  ;;  %v5361_v35 = vor.u32 %v6075_v34, %v5360_v32  ;;  %v7213_v37 = vperm.slane %v7210_v36, 0  ;;  %v5252_v48 = vld [vmem:[%s9219_s2 + $0x80] sm:$0xf]  ;;  %v5240_v34 = vld [vmem:[%s9219_s2 + $0x68] sm:$0xf] }
  0x5a   : > { %1411 = vmatmul.bf16.gmra.mxu3 %v6933_v27  ;;  %1545 = vmatpush.bf16.msrb.mxu2 %v5405_v22  ;;  %v7183_v22 = vpack.c.bf16 %v546_v15, %v542_v14  ;;  %v5348_v52 = vld [vmem:[%s9219_s2 + $0x140] sm:$0xf] }
  0x5b   : > { %1594 = vmatpush.bf16.msrb.mxu3 %v5501_v29  ;;  %v7189_v29 = vpack.c.bf16 %v549_v21, %v545_v20  ;;  %v5349_v4 = vor.u32 %v6072_v61, %v5348_v52 }
  0x5d   : > { %1688 = vmatpush.bf16.msra.mxu1 %v5361_v35  ;;  %v6045_v35 = vld [vmem:[%s9219_s2 + $0x70] sm:$0xf0] }
  0x5e   : > { %1546 = vmatpush.bf16.msrb.mxu2 %v5393_v30  ;;  %v5264_v30 = vld [vmem:[%s9219_s2 + $0x98] sm:$0xf] }
  0x5f   : > { %1595 = vmatpush.bf16.msrb.mxu3 %v5489_v41  ;;  %v5265_v33 = vor.u32 %v6051_v31, %v5264_v30 }
  0x61   : > { %1639 = vmatpush.bf16.msra.mxu0 %v5265_v33  ;;  %1689 = vmatpush.bf16.msra.mxu1 %v5349_v4 }
  0x62   : > { %1547 = vmatpush.bf16.msrb.mxu2 %v5381_v57  ;;  %v5253_v57 = vor.u32 %v6048_v51, %v5252_v48 }
  0x63   : > { %1596 = vmatpush.bf16.msrb.mxu3 %v5477_v63 }
  0x65   : > { %1640 = vmatpush.bf16.msra.mxu0 %v5253_v57 }
  0x67   : > { %1269 = vmatmul.bf16.gmra.mxu0 %v6959_v42 }
  0x68   : > { %1318 = vmatmul.bf16.gmra.mxu1 %v6961_v43 }
  0x69   : > { %1367 = vmatmul.bf16.gmra.mxu2 %v6963_v45 }
  0x6a   : > { %1416 = vmatmul.bf16.gmra.mxu3 %v6965_v46 }
  0x77   : > { %1274 = vmatmul.bf16.gmra.mxu0 %v6991_v0 }
  0x78   : > { %1323 = vmatmul.bf16.gmra.mxu1 %v6993_v1 }
  0x79   : > { %1372 = vmatmul.bf16.gmra.mxu2 %v6995_v2 }
  0x7a   : > { %1421 = vmatmul.bf16.gmra.mxu3 %v6997_v3 }
  0x87   : > { %1279 = vmatmul.bf16.gmra.mxu0 %v7065_v54 }
  0x88   : > { %1328 = vmatmul.bf16.gmra.mxu1 %v7073_v58 }
  0x89   : > { %1377 = vmatmul.bf16.gmra.mxu2 %v7075_v59 }
  0x8a   : > { %1426 = vmatmul.bf16.gmra.mxu3 %v7077_v60 }
  0x97   : > { %1284 = vmatmul.bf16.gmra.mxu0 %v7139_v47 }
  0x98   : > { %1333 = vmatmul.bf16.gmra.mxu1 %v7150_v55 }
  0x99   : > { %1382 = vmatmul.bf16.gmra.mxu2 %v7152_v56 }
  0x9a   : > { %1431 = vmatmul.bf16.gmra.mxu3 %v7157_v62 }
  0xa7   : > { %1289 = vmatmul.bf16.gmra.mxu0 %v7183_v22 }
  0xa8   : > { %1338 = vmatmul.bf16.gmra.mxu1 %v7185_v23 }
  0xa9   : > { %1387 = vmatmul.bf16.gmra.mxu2 %v7187_v28 }
  0xaa   : > { %1436 = vmatmul.bf16.gmra.mxu3 %v7189_v29 }
  0xb4   : > { %v1255_v38 = vpop.f32.mrf.mxu0 }
  0xb5   : > { %v1256_v39 = vadd.f32 %v1255_v38, %v7213_v37  ;;  %v1304_v40 = vpop.f32.mrf.mxu1  ;;  %v5336_v38 = vld [vmem:[%s9219_s2 + $0x128] sm:$0xf] }
  0xb7   : > { %v1305_v41 = vadd.f32 %v1304_v40, %v1256_v39  ;;  %1450 = vmatmul.bf16.vlgmr.msrb.gmra.mxu0 %v6852_v44  ;;  %v5241_v40 = vor.u32 %v6045_v35, %v5240_v34 }
  0xb8   : > { %1499 = vmatmul.bf16.vlgmr.msrb.gmra.mxu1 %v6859_v49 }
  0xb9   : > { %1548 = vmatmul.bf16.vlgmr.msrb.gmra.mxu2 %v6861_v50  ;;  %1641 = vmatpush.bf16.msra.mxu0 %v5241_v40 }
  0xba   : > { %1597 = vmatmul.bf16.vlgmr.msrb.gmra.mxu3 %v6869_v53 }
  0xbc   : > { %v1353_v63 = vpop.f32.mrf.mxu2  ;;  %v1257_v11 = vpop.f32.mrf.mxu0 }
  0xbd   : > { %v1354_v5 = vadd.f32 %v1353_v63, %v1305_v41  ;;  %v1402_v10 = vpop.f32.mrf.mxu3  ;;  %v1258_v12 = vadd.f32 %v1257_v11, %v7213_v37  ;;  %v1306_v13 = vpop.f32.mrf.mxu1  ;;  %v6069_v41 = vld [vmem:[%s9219_s2 + $0x130] sm:$0xf0] }
  0xbe   : > { %v5337_v51 = vor.u32 %v6069_v41, %v5336_v38 }
  0xbf   : > { %v1403_v14 = vadd.f32 %v1402_v10, %v1354_v5  ;;  %v1307_v15 = vadd.f32 %v1306_v13, %v1258_v12 }
  0xc0   : > { %1690 = vmatpush.bf16.msra.mxu1 %v5337_v51 }
  0xc1   : > { %v1834_v32 = vmax.f32 %v1403_v14, 0.0 }
  0xc4   : > { %v1355_v16 = vpop.f32.mrf.mxu2  ;;  %v1260_v19 = vpop.f32.mrf.mxu0 }
  0xc5   : > { %v1356_v17 = vadd.f32 %v1355_v16, %v1307_v15  ;;  %v1404_v18 = vpop.f32.mrf.mxu3  ;;  %v1261_v20 = vadd.f32 %v1260_v19, %v7213_v37  ;;  %v1309_v21 = vpop.f32.mrf.mxu1 }
  0xc7   : > { %v1405_v30 = vadd.f32 %v1404_v18, %v1356_v17  ;;  %v1310_v31 = vadd.f32 %v1309_v21, %v1261_v20  ;;  %1455 = vmatmul.bf16.gmra.mxu0 %v6895_v6  ;;  %v5228_v21 = vld [vmem:[%s9219_s2 + $0x50] sm:$0xf] }
  0xc8   : > { %1504 = vmatmul.bf16.gmra.mxu1 %v6897_v7 }
  0xc9   : > { %v1837_v33 = vmax.f32 %v1405_v30, 0.0  ;;  %1553 = vmatmul.bf16.gmra.mxu2 %v6899_v8  ;;  %v6042_v30 = vld [vmem:[%s9219_s2 + $0x58] sm:$0xf0] }
  0xca   : > { %1602 = vmatmul.bf16.gmra.mxu3 %v6901_v9 }
  0xcb   : > { %v7247_v39 = vpack.c.bf16 %v1837_v33, %v1834_v32  ;;  %v5229_v32 = vor.u32 %v6042_v30, %v5228_v21  ;;  %v6066_v33 = vld [vmem:[%s9219_s2 + $0x118] sm:$0xf0]  ;;  %v6063_v21 = vld [vmem:[%s9219_s2 + $0x100] sm:$0xf0] }
  0xcc   : > { %v1358_v48 = vpop.f32.mrf.mxu2  ;;  %v1262_v61 = vpop.f32.mrf.mxu0 }
  0xcd   : > { %v1359_v52 = vadd.f32 %v1358_v48, %v1310_v31  ;;  %v1407_v57 = vpop.f32.mrf.mxu3  ;;  %v1263_v63 = vadd.f32 %v1262_v61, %v7213_v37  ;;  %v1311_v4 = vpop.f32.mrf.mxu1  ;;  %v5324_v31 = vld [vmem:[%s9219_s2 + $0x110] sm:$0xf]  ;;  %1642 = vmatpush.bf16.msra.mxu0 %v5229_v32 }
  0xce   : > { %v5325_v38 = vor.u32 %v6066_v33, %v5324_v31 }
  0xcf   : > { %v1408_v5 = vadd.f32 %v1407_v57, %v1359_v52  ;;  %v1312_v10 = vadd.f32 %v1311_v4, %v1263_v63 }
  0xd0   : > { %1691 = vmatpush.bf16.msra.mxu1 %v5325_v38 }
  0xd1   : > { %v1840_v19 = vmax.f32 %v1408_v5, 0.0 }
  0xd4   : > { %v1360_v11 = vpop.f32.mrf.mxu2  ;;  %v1265_v14 = vpop.f32.mrf.mxu0 }
  0xd5   : > { %v1361_v12 = vadd.f32 %v1360_v11, %v1312_v10  ;;  %v1409_v13 = vpop.f32.mrf.mxu3  ;;  %v1266_v15 = vadd.f32 %v1265_v14, %v7213_v37  ;;  %v1314_v16 = vpop.f32.mrf.mxu1 }
  0xd7   : > { %v1410_v17 = vadd.f32 %v1409_v13, %v1361_v12  ;;  %v1315_v18 = vadd.f32 %v1314_v16, %v1266_v15  ;;  %1460 = vmatmul.bf16.gmra.mxu0 %v6927_v24 }
  0xd8   : > { %1509 = vmatmul.bf16.gmra.mxu1 %v6929_v25 }
  0xd9   : > { %v1843_v20 = vmax.f32 %v1410_v17, 0.0  ;;  %1558 = vmatmul.bf16.gmra.mxu2 %v6931_v26  ;;  %v5216_v17 = vld [vmem:[%s9219_s2 + $0x38] sm:$0xf] }
  0xda   : > { %1607 = vmatmul.bf16.gmra.mxu3 %v6933_v27 }
  0xdb   : > { %v7270_v34 = vpack.c.bf16 %v1843_v20, %v1840_v19  ;;  %v5312_v19 = vld [vmem:[%s9219_s2 + $0xf8] sm:$0xf] }
  0xdc   : > { %v1363_v35 = vpop.f32.mrf.mxu2  ;;  %v1267_v48 = vpop.f32.mrf.mxu0  ;;  %v5313_v32 = vor.u32 %v6063_v21, %v5312_v19  ;;  %v5204_v19 = vld [vmem:[%s9219_s2 + $0x20] sm:$0xf] }
  0xdd   : > { %v1364_v40 = vadd.f32 %v1363_v35, %v1315_v18  ;;  %v1412_v41 = vpop.f32.mrf.mxu3  ;;  %v1268_v51 = vadd.f32 %v1267_v48, %v7213_v37  ;;  %v1316_v52 = vpop.f32.mrf.mxu1  ;;  %v6039_v18 = vld [vmem:[%s9219_s2 + $0x40] sm:$0xf0] }
  0xde   : > { %v5217_v20 = vor.u32 %v6039_v18, %v5216_v17  ;;  %1692 = vmatpush.bf16.msra.mxu1 %v5313_v32  ;;  %v6126_v18 = vld [vmem:[%s9219_s2 + $0x2f8] sm:$0xf0] }
  0xdf   : > { %v1413_v57 = vadd.f32 %v1412_v41, %v1364_v40  ;;  %v1317_v61 = vadd.f32 %v1316_v52, %v1268_v51 }
  0xe0   : > { %1643 = vmatpush.bf16.msra.mxu0 %v5217_v20  ;;  %v6036_v20 = vld [vmem:[%s9219_s2 + $0x28] sm:$0xf0] }
  0xe1   : > { %v1846_v15 = vmax.f32 %v1413_v57, 0.0  ;;  %v5205_v32 = vor.u32 %v6036_v20, %v5204_v19 }
  0xe4   : > { %v1365_v63 = vpop.f32.mrf.mxu2  ;;  %v1270_v10 = vpop.f32.mrf.mxu0  ;;  %1644 = vmatpush.bf16.msra.mxu0 %v5205_v32  ;;  %v5528_v32 = vld [vmem:[%s9219_s2 + $0x2a8] sm:$0xf] }
  0xe5   : > { %v1366_v4 = vadd.f32 %v1365_v63, %v1317_v61  ;;  %v1414_v5 = vpop.f32.mrf.mxu3  ;;  %v1271_v11 = vadd.f32 %v1270_v10, %v7213_v37  ;;  %v1319_v12 = vpop.f32.mrf.mxu1 }
  0xe7   : > { %v1415_v13 = vadd.f32 %v1414_v5, %v1366_v4  ;;  %v1320_v14 = vadd.f32 %v1319_v12, %v1271_v11  ;;  %1465 = vmatmul.bf16.gmra.mxu0 %v6959_v42  ;;  %v5468_v12 = vld [vmem:[%s9219_s2 + $0x230] sm:$0xf] }
  0xe8   : > { %1514 = vmatmul.bf16.gmra.mxu1 %v6961_v43 }
  0xe9   : > { %v1849_v16 = vmax.f32 %v1415_v13, 0.0  ;;  %1563 = vmatmul.bf16.gmra.mxu2 %v6963_v45  ;;  %v6102_v13 = vld [vmem:[%s9219_s2 + $0x238] sm:$0xf0] }
  0xea   : > { %1612 = vmatmul.bf16.gmra.mxu3 %v6965_v46  ;;  %v5469_v17 = vor.u32 %v6102_v13, %v5468_v12 }
  0xeb   : > { %v7290_v30 = vpack.c.bf16 %v1849_v16, %v1846_v15 }
  0xec   : > { %v1368_v31 = vpop.f32.mrf.mxu2  ;;  %v1272_v38 = vpop.f32.mrf.mxu0  ;;  %1736 = vmatpush.bf16.msra.mxu2 %v5469_v17 }
  0xed   : > { %v1369_v33 = vadd.f32 %v1368_v31, %v1320_v14  ;;  %v1417_v35 = vpop.f32.mrf.mxu3  ;;  %v1273_v40 = vadd.f32 %v1272_v38, %v7213_v37  ;;  %v1321_v41 = vpop.f32.mrf.mxu1  ;;  %v5564_v14 = vld [vmem:[%s9219_s2 + $0x2f0] sm:$0xf]  ;;  %v5300_v31 = vld [vmem:[%s9219_s2 + $0xe0] sm:$0xf] }
  0xee   : > { %v5565_v21 = vor.u32 %v6126_v18, %v5564_v14  ;;  %v6120_v18 = vld [vmem:[%s9219_s2 + $0x2c8] sm:$0xf0] }
  0xef   : > { %v1418_v48 = vadd.f32 %v1417_v35, %v1369_v33  ;;  %v1322_v51 = vadd.f32 %v1321_v41, %v1273_v40  ;;  %v6060_v33 = vld [vmem:[%s9219_s2 + $0xe8] sm:$0xf0]  ;;  %v5456_v41 = vld [vmem:[%s9219_s2 + $0x218] sm:$0xf] }
  0xf0   : > { %1785 = vmatpush.bf16.msra.mxu3 %v5565_v21  ;;  %v5301_v40 = vor.u32 %v6060_v33, %v5300_v31  ;;  %v5432_v21 = vld [vmem:[%s9219_s2 + $0x1e8] sm:$0xf]  ;;  %v6093_v31 = vld [vmem:[%s9219_s2 + $0x1f0] sm:$0xf0] }
  0xf1   : > { %v1852_v15 = vmax.f32 %v1418_v48, 0.0  ;;  %v6099_v48 = vld [vmem:[%s9219_s2 + $0x220] sm:$0xf0] }
  0xf2   : > { %1693 = vmatpush.bf16.msra.mxu1 %v5301_v40 }
  0xf4   : > { %v1370_v52 = vpop.f32.mrf.mxu2  ;;  %v1275_v63 = vpop.f32.mrf.mxu0 }
  0xf5   : > { %v1371_v57 = vadd.f32 %v1370_v52, %v1322_v51  ;;  %v1419_v61 = vpop.f32.mrf.mxu3  ;;  %v1276_v4 = vadd.f32 %v1275_v63, %v7213_v37  ;;  %v1324_v5 = vpop.f32.mrf.mxu1  ;;  %v5552_v51 = vld [vmem:[%s9219_s2 + $0x2d8] sm:$0xf]  ;;  %v5457_v63 = vor.u32 %v6099_v48, %v5456_v41  ;;  %v5433_v41 = vor.u32 %v6093_v31, %v5432_v21  ;;  %v6117_v48 = vld [vmem:[%s9219_s2 + $0x2b0] sm:$0xf0] }
  0xf7   : > { %v1420_v10 = vadd.f32 %v1419_v61, %v1371_v57  ;;  %v1325_v11 = vadd.f32 %v1324_v5, %v1276_v4  ;;  %1470 = vmatmul.bf16.gmra.mxu0 %v6991_v0  ;;  %v6123_v4 = vld [vmem:[%s9219_s2 + $0x2e0] sm:$0xf0]  ;;  %1737 = vmatpush.bf16.msra.mxu2 %v5457_v63 }
  0xf8   : > { %1519 = vmatmul.bf16.gmra.mxu1 %v6993_v1  ;;  %v5553_v12 = vor.u32 %v6123_v4, %v5552_v51  ;;  %v5420_v4 = vld [vmem:[%s9219_s2 + $0x1d0] sm:$0xf] }
  0xf9   : > { %v1855_v16 = vmax.f32 %v1420_v10, 0.0  ;;  %1568 = vmatmul.bf16.gmra.mxu2 %v6995_v2 }
  0xfa   : > { %1617 = vmatmul.bf16.gmra.mxu3 %v6997_v3 }
  0xfb   : > { %v7322_v35 = vpack.c.bf16 %v1855_v16, %v1852_v15  ;;  %1786 = vmatpush.bf16.msra.mxu3 %v5553_v12  ;;  %v6096_v15 = vld [vmem:[%s9219_s2 + $0x208] sm:$0xf0]  ;;  %v5540_v16 = vld [vmem:[%s9219_s2 + $0x2c0] sm:$0xf] }
  0xfc   : > { %v1373_v38 = vpop.f32.mrf.mxu2  ;;  %v1277_v61 = vpop.f32.mrf.mxu0  ;;  %v5541_v19 = vor.u32 %v6120_v18, %v5540_v16  ;;  %v5192_v16 = vld [vmem:[%s9219_s2 + $0x8] sm:$0xf] }
  0xfd   : > { %v1374_v52 = vadd.f32 %v1373_v38, %v1325_v11  ;;  %v1422_v57 = vpop.f32.mrf.mxu3  ;;  %v1278_v5 = vadd.f32 %v1277_v61, %v7213_v37  ;;  %v1326_v10 = vpop.f32.mrf.mxu1  ;;  %v5444_v11 = vld [vmem:[%s9219_s2 + $0x200] sm:$0xf]  ;;  %v5288_v18 = vld [vmem:[%s9219_s2 + $0xc8] sm:$0xf] }
  0xfe   : > { %v5445_v17 = vor.u32 %v6096_v15, %v5444_v11  ;;  %v6114_v15 = vld [vmem:[%s9219_s2 + $0x298] sm:$0xf0] }
  0xff   : > { %v1423_v13 = vadd.f32 %v1422_v57, %v1374_v52  ;;  %v1327_v14 = vadd.f32 %v1326_v10, %v1278_v5  ;;  %1787 = vmatpush.bf16.msra.mxu3 %v5541_v19  ;;  %v5529_v57 = vor.u32 %v6117_v48, %v5528_v32  ;;  %v6090_v5 = vld [vmem:[%s9219_s2 + $0x1d8] sm:$0xf0]  ;;  %v5516_v10 = vld [vmem:[%s9219_s2 + $0x290] sm:$0xf] }
 0x100   : > { %1738 = vmatpush.bf16.msra.mxu2 %v5445_v17  ;;  %v5421_v11 = vor.u32 %v6090_v5, %v5420_v4  ;;  %v5517_v17 = vor.u32 %v6114_v15, %v5516_v10 }
 0x101   : > { %v1858_v12 = vmax.f32 %v1423_v13, 0.0  ;;  %v6033_v13 = vld [vmem:[%s9219_s2 + $0x10] sm:$0xf0] }
 0x102   : > { %v5193_v19 = vor.u32 %v6033_v13, %v5192_v16  ;;  %v6108_v16 = vld [vmem:[%s9219_s2 + $0x268] sm:$0xf0] }
 0x103   : > { %1788 = vmatpush.bf16.msra.mxu3 %v5529_v57  ;;  %v6111_v57 = vld [vmem:[%s9219_s2 + $0x280] sm:$0xf0] }
 0x104   : > { %v1375_v20 = vpop.f32.mrf.mxu2  ;;  %v1280_v40 = vpop.f32.mrf.mxu0  ;;  %1739 = vmatpush.bf16.msra.mxu2 %v5433_v41  ;;  %1645 = vmatpush.bf16.msra.mxu0 %v5193_v19  ;;  %v6081_v19 = vld [vmem:[%s9219_s2 + $0x190] sm:$0xf0] }
 0x105   : > { %v1376_v33 = vadd.f32 %v1375_v20, %v1327_v14  ;;  %v1424_v38 = vpop.f32.mrf.mxu3  ;;  %v1281_v51 = vadd.f32 %v1280_v40, %v7213_v37  ;;  %v1329_v52 = vpop.f32.mrf.mxu1  ;;  %v6057_v20 = vld [vmem:[%s9219_s2 + $0xd0] sm:$0xf0]  ;;  %v5504_v40 = vld [vmem:[%s9219_s2 + $0x278] sm:$0xf] }
 0x106   : > { %v5289_v32 = vor.u32 %v6057_v20, %v5288_v18  ;;  %v5505_v5 = vor.u32 %v6111_v57, %v5504_v40  ;;  %v5384_v18 = vld [vmem:[%s9219_s2 + $0x188] sm:$0xf]  ;;  %v6105_v40 = vld [vmem:[%s9219_s2 + $0x250] sm:$0xf0] }
 0x107   : > { %v1425_v61 = vadd.f32 %v1424_v38, %v1376_v33  ;;  %v1330_v63 = vadd.f32 %v1329_v52, %v1281_v51  ;;  %1475 = vmatmul.bf16.gmra.mxu0 %v7065_v54  ;;  %1789 = vmatpush.bf16.msra.mxu3 %v5517_v17  ;;  %v5408_v33 = vld [vmem:[%s9219_s2 + $0x1b8] sm:$0xf]  ;;  %v6087_v38 = vld [vmem:[%s9219_s2 + $0x1c0] sm:$0xf0]  ;;  %v5480_v20 = vld [vmem:[%s9219_s2 + $0x248] sm:$0xf] }
 0x108   : > { %1524 = vmatmul.bf16.gmra.mxu1 %v7073_v58  ;;  %1740 = vmatpush.bf16.msra.mxu2 %v5421_v11  ;;  %v5409_v52 = vor.u32 %v6087_v38, %v5408_v33  ;;  %v5492_v11 = vld [vmem:[%s9219_s2 + $0x260] sm:$0xf]  ;;  %v5385_v38 = vor.u32 %v6081_v19, %v5384_v18 }
 0x109   : > { %v1861_v14 = vmax.f32 %v1425_v61, 0.0  ;;  %1573 = vmatmul.bf16.gmra.mxu2 %v7075_v59  ;;  %1694 = vmatpush.bf16.msra.mxu1 %v5289_v32  ;;  %v5493_v13 = vor.u32 %v6108_v16, %v5492_v11 }
 0x10a   : > { %1622 = vmatmul.bf16.gmra.mxu3 %v7077_v60 }
 0x10b   : > { %v7390_v21 = vpack.c.bf16 %v1861_v14, %v1858_v12  ;;  %1790 = vmatpush.bf16.msra.mxu3 %v5505_v5  ;;  %v6084_v14 = vld [vmem:[%s9219_s2 + $0x1a8] sm:$0xf0]  ;;  %v5624_v5 = vld [vmem:[%s9221_s4 + $0x70] sm:$0xf] }
 0x10c   : > { %v1378_v31 = vpop.f32.mrf.mxu2  ;;  %v1282_v51 = vpop.f32.mrf.mxu0  ;;  %1741 = vmatpush.bf16.msra.mxu2 %v5409_v52 }
 0x10d   : > { %v1379_v41 = vadd.f32 %v1378_v31, %v1330_v63  ;;  %v1427_v48 = vpop.f32.mrf.mxu3  ;;  %v1283_v61 = vadd.f32 %v1282_v51, %v7213_v37  ;;  %v1331_v4 = vpop.f32.mrf.mxu1  ;;  %v5396_v63 = vld [vmem:[%s9219_s2 + $0x1a0] sm:$0xf]  ;;  %v5481_v51 = vor.u32 %v6105_v40, %v5480_v20 }
 0x10e   : > { %v5397_v15 = vor.u32 %v6084_v14, %v5396_v63  ;;  %v5688_v63 = vld [vmem:[%s9221_s4 + $0xf0] sm:$0xf]  ;;  %v6158_v14 = vld [vmem:[%s9221_s4 + $0xf4] sm:$0xf0] }
 0x10f   : > { %v1428_v10 = vadd.f32 %v1427_v48, %v1379_v41  ;;  %v1332_v12 = vadd.f32 %v1331_v4, %v1283_v61  ;;  %1791 = vmatpush.bf16.msra.mxu3 %v5493_v13  ;;  %v5689_v16 = vor.u32 %v6158_v14, %v5688_v63  ;;  %v5680_v63 = vld [vmem:[%s9221_s4 + $0xe0] sm:$0xf] }
 0x110   : > { %1742 = vmatpush.bf16.msra.mxu2 %v5397_v15 }
 0x111   : > { %v1864_v61 = vmax.f32 %v1428_v10, 0.0  ;;  %2249 = vmatpush.bf16.msrb.mxu1 %v5689_v16  ;;  %v6156_v16 = vld [vmem:[%s9221_s4 + $0xe4] sm:$0xf0] }
 0x113   : > { %1792 = vmatpush.bf16.msra.mxu3 %v5481_v51 }
 0x114   : > { %v1380_v17 = vpop.f32.mrf.mxu2  ;;  %v1285_v33 = vpop.f32.mrf.mxu0  ;;  %1743 = vmatpush.bf16.msra.mxu2 %v5385_v38 }
 0x115   : > { %v1381_v31 = vadd.f32 %v1380_v17, %v1332_v12  ;;  %v1429_v32 = vpop.f32.mrf.mxu3  ;;  %v1286_v41 = vadd.f32 %v1285_v33, %v7213_v37  ;;  %v1334_v48 = vpop.f32.mrf.mxu1  ;;  %v6142_v12 = vld [vmem:[%s9221_s4 + $0x74] sm:$0xf0] }
 0x116   : > { %v5625_v10 = vor.u32 %v6142_v12, %v5624_v5  ;;  %v5616_v5 = vld [vmem:[%s9221_s4 + $0x60] sm:$0xf]  ;;  %v6140_v12 = vld [vmem:[%s9221_s4 + $0x64] sm:$0xf0] }
 0x117   : > { %v1430_v52 = vadd.f32 %v1429_v32, %v1381_v31  ;;  %v1335_v57 = vadd.f32 %v1334_v48, %v1286_v41  ;;  %1480 = vmatmul.bf16.gmra.mxu0 %v7139_v47 }
 0x118   : > { %1529 = vmatmul.bf16.gmra.mxu1 %v7150_v55  ;;  %2200 = vmatpush.bf16.msrb.mxu0 %v5625_v10 }
 0x119   : > { %v1867_v4 = vmax.f32 %v1430_v52, 0.0  ;;  %1578 = vmatmul.bf16.gmra.mxu2 %v7152_v56 }
 0x11a   : > { %1627 = vmatmul.bf16.gmra.mxu3 %v7157_v62 }
 0x11b   : > { %v7446_v11 = vpack.c.bf16 %v1867_v4, %v1864_v61 }
 0x11c   : > { %v1383_v15 = vpop.f32.mrf.mxu2  ;;  %v1287_v18 = vpop.f32.mrf.mxu0 }
 0x11d   : > { %v1384_v13 = vadd.f32 %v1383_v15, %v1335_v57  ;;  %v1432_v17 = vpop.f32.mrf.mxu3  ;;  %v1288_v19 = vadd.f32 %v1287_v18, %v7213_v37  ;;  %v1336_v20 = vpop.f32.mrf.mxu1  ;;  %v5617_v15 = vor.u32 %v6140_v12, %v5616_v5  ;;  %v6138_v12 = vld [vmem:[%s9221_s4 + $0x54] sm:$0xf0] }
 0x11f   : > { %v1433_v31 = vadd.f32 %v1432_v17, %v1384_v13  ;;  %v1337_v32 = vadd.f32 %v1336_v20, %v1288_v19  ;;  %v5681_v19 = vor.u32 %v6156_v16, %v5680_v63  ;;  %2201 = vmatpush.bf16.msrb.mxu0 %v5617_v15 }
 0x121   : > { %v1870_v57 = vmax.f32 %v1433_v31, 0.0  ;;  %2250 = vmatpush.bf16.msrb.mxu1 %v5681_v19 }
 0x124   : > { %v1385_v33 = vpop.f32.mrf.mxu2  ;;  %v1290_v41 = vpop.f32.mrf.mxu0 }
 0x125   : > { %v1386_v38 = vadd.f32 %v1385_v33, %v1337_v32  ;;  %v1434_v40 = vpop.f32.mrf.mxu3  ;;  %v1291_v48 = vadd.f32 %v1290_v41, %v7213_v37  ;;  %v1339_v51 = vpop.f32.mrf.mxu1 }
 0x127   : > { %v1435_v52 = vadd.f32 %v1434_v40, %v1386_v38  ;;  %v1340_v61 = vadd.f32 %v1339_v51, %v1291_v48  ;;  %1485 = vmatmul.bf16.gmra.mxu0 %v7183_v22  ;;  %v7470_v38 = vperm.slane %v7210_v36, 1  ;;  %v5608_v36 = vld [vmem:[%s9221_s4 + $0x50] sm:$0xf] }
 0x128   : > { %1534 = vmatmul.bf16.gmra.mxu1 %v7185_v23  ;;  %v5609_v63 = vor.u32 %v6138_v12, %v5608_v36 }
 0x129   : > { %v1873_v4 = vmax.f32 %v1435_v52, 0.0  ;;  %1583 = vmatmul.bf16.gmra.mxu2 %v7187_v28 }
 0x12a   : > { %1632 = vmatmul.bf16.gmra.mxu3 %v7189_v29  ;;  %2202 = vmatpush.bf16.msrb.mxu0 %v5609_v63 }
 0x12b   : > { %v7463_v10 = vpack.c.bf16 %v1873_v4, %v1870_v57 }
 0x12c   : > { %v1388_v14 = vpop.f32.mrf.mxu2  ;;  %v1292_v18 = vpop.f32.mrf.mxu0 }
 0x12d   : > { %v1389_v13 = vadd.f32 %v1388_v14, %v1340_v61  ;;  %v1437_v17 = vpop.f32.mrf.mxu3  ;;  %v1293_v20 = vadd.f32 %v1292_v18, %v7213_v37  ;;  %v1341_v31 = vpop.f32.mrf.mxu1 }
 0x12f   : > { %v1438_v32 = vadd.f32 %v1437_v17, %v1389_v13  ;;  %v1342_v33 = vadd.f32 %v1341_v31, %v1293_v20 }
 0x131   : > { %v1876_v37 = vmax.f32 %v1438_v32, 0.0 }
 0x134   : > { %v1390_v40 = vpop.f32.mrf.mxu2  ;;  %v1451_v51 = vpop.f32.mrf.mxu0 }
 0x135   : > { %v1391_v41 = vadd.f32 %v1390_v40, %v1342_v33  ;;  %v1439_v48 = vpop.f32.mrf.mxu3  ;;  %v1452_v52 = vadd.f32 %v1451_v51, %v7470_v38  ;;  %v1500_v61 = vpop.f32.mrf.mxu1 }
 0x137   : > { %v1440_v57 = vadd.f32 %v1439_v48, %v1391_v41  ;;  %v1501_v4 = vadd.f32 %v1500_v61, %v1452_v52  ;;  %1646 = vmatmul.bf16.vlgmr.msra.gmra.mxu0 %v6852_v44  ;;  %v5672_v44 = vld [vmem:[%s9221_s4 + $0xd0] sm:$0xf] }
 0x138   : > { %1695 = vmatmul.bf16.vlgmr.msra.gmra.mxu1 %v6859_v49  ;;  %v6154_v49 = vld [vmem:[%s9221_s4 + $0xd4] sm:$0xf0] }
 0x139   : > { %v1879_v5 = vmax.f32 %v1440_v57, 0.0  ;;  %1744 = vmatmul.bf16.vlgmr.msra.gmra.mxu2 %v6861_v50  ;;  %v5673_v14 = vor.u32 %v6154_v49, %v5672_v44 }
 0x13a   : > { %1793 = vmatmul.bf16.vlgmr.msra.gmra.mxu3 %v6869_v53 }
 0x13b   : > { %v7489_v50 = vpack.c.bf16 %v1879_v5, %v1876_v37  ;;  %2251 = vmatpush.bf16.msrb.mxu1 %v5673_v14  ;;  %v6136_v37 = vld [vmem:[%s9221_s4 + $0x44] sm:$0xf0] }
 0x13c   : > { %v1549_v53 = vpop.f32.mrf.mxu2  ;;  %v1453_v13 = vpop.f32.mrf.mxu0 }
 0x13d   : > { %v1550_v15 = vadd.f32 %v1549_v53, %v1501_v4  ;;  %v1598_v16 = vpop.f32.mrf.mxu3  ;;  %v1454_v17 = vadd.f32 %v1453_v13, %v7470_v38  ;;  %v1502_v18 = vpop.f32.mrf.mxu1  ;;  %v5600_v4 = vld [vmem:[%s9221_s4 + $0x40] sm:$0xf] }
 0x13e   : > { %v5601_v36 = vor.u32 %v6136_v37, %v5600_v4 }
 0x13f   : > { %v1599_v19 = vadd.f32 %v1598_v16, %v1550_v15  ;;  %v1503_v20 = vadd.f32 %v1502_v18, %v1454_v17 }
 0x140   : > { %2203 = vmatpush.bf16.msrb.mxu0 %v5601_v36 }
 0x141   : > { %v1835_v61 = vmax.f32 %v1599_v19, 0.0 }
 0x144   : > { %v1551_v31 = vpop.f32.mrf.mxu2  ;;  %v1456_v40 = vpop.f32.mrf.mxu0 }
 0x145   : > { %v1552_v32 = vadd.f32 %v1551_v31, %v1503_v20  ;;  %v1600_v33 = vpop.f32.mrf.mxu3  ;;  %v1457_v41 = vadd.f32 %v1456_v40, %v7470_v38  ;;  %v1505_v48 = vpop.f32.mrf.mxu1 }
 0x147   : > { %v1601_v51 = vadd.f32 %v1600_v33, %v1552_v32  ;;  %v1506_v52 = vadd.f32 %v1505_v48, %v1457_v41  ;;  %1651 = vmatmul.bf16.gmra.mxu0 %v6895_v6  ;;  %v5664_v6 = vld [vmem:[%s9221_s4 + $0xc0] sm:$0xf]  ;;  %v5592_v41 = vld [vmem:[%s9221_s4 + $0x30] sm:$0xf]  ;;  %v6134_v48 = vld [vmem:[%s9221_s4 + $0x34] sm:$0xf0] }
 0x148   : > { %1700 = vmatmul.bf16.gmra.mxu1 %v6897_v7  ;;  %v6152_v7 = vld [vmem:[%s9221_s4 + $0xc4] sm:$0xf0] }
 0x149   : > { %v1838_v57 = vmax.f32 %v1601_v51, 0.0  ;;  %1749 = vmatmul.bf16.gmra.mxu2 %v6899_v8  ;;  %v5593_v51 = vor.u32 %v6134_v48, %v5592_v41 }
 0x14a   : > { %1798 = vmatmul.bf16.gmra.mxu3 %v6901_v9  ;;  %v5665_v9 = vor.u32 %v6152_v7, %v5664_v6 }
 0x14b   : > { %v7506_v5 = vpack.c.bf16 %v1838_v57, %v1835_v61  ;;  %2204 = vmatpush.bf16.msrb.mxu0 %v5593_v51 }
 0x14c   : > { %v1554_v8 = vpop.f32.mrf.mxu2  ;;  %v1458_v63 = vpop.f32.mrf.mxu0  ;;  %2252 = vmatpush.bf16.msrb.mxu1 %v5665_v9 }
 0x14d   : > { %v1555_v12 = vadd.f32 %v1554_v8, %v1506_v52  ;;  %v1603_v44 = vpop.f32.mrf.mxu3  ;;  %v1459_v49 = vadd.f32 %v1458_v63, %v7470_v38  ;;  %v1507_v53 = vpop.f32.mrf.mxu1 }
 0x14f   : > { %v1604_v14 = vadd.f32 %v1603_v44, %v1555_v12  ;;  %v1508_v15 = vadd.f32 %v1507_v53, %v1459_v49 }
 0x151   : > { %v1841_v33 = vmax.f32 %v1604_v14, 0.0 }
 0x154   : > { %v1556_v16 = vpop.f32.mrf.mxu2  ;;  %v1461_v18 = vpop.f32.mrf.mxu0 }
 0x155   : > { %v1557_v13 = vadd.f32 %v1556_v16, %v1508_v15  ;;  %v1605_v17 = vpop.f32.mrf.mxu3  ;;  %v1462_v19 = vadd.f32 %v1461_v18, %v7470_v38  ;;  %v1510_v20 = vpop.f32.mrf.mxu1 }
 0x157   : > { %v1606_v31 = vadd.f32 %v1605_v17, %v1557_v13  ;;  %v1511_v32 = vadd.f32 %v1510_v20, %v1462_v19  ;;  %1656 = vmatmul.bf16.gmra.mxu0 %v6927_v24  ;;  %v5656_v24 = vld [vmem:[%s9221_s4 + $0xb0] sm:$0xf]  ;;  %v5584_v13 = vld [vmem:[%s9221_s4 + $0x20] sm:$0xf]  ;;  %v6132_v17 = vld [vmem:[%s9221_s4 + $0x24] sm:$0xf0] }
 0x158   : > { %1705 = vmatmul.bf16.gmra.mxu1 %v6929_v25  ;;  %v6150_v25 = vld [vmem:[%s9221_s4 + $0xb4] sm:$0xf0]  ;;  %v5585_v18 = vor.u32 %v6132_v17, %v5584_v13 }
 0x159   : > { %v1844_v40 = vmax.f32 %v1606_v31, 0.0  ;;  %1754 = vmatmul.bf16.gmra.mxu2 %v6931_v26  ;;  %v5657_v52 = vor.u32 %v6150_v25, %v5656_v24 }
 0x15a   : > { %1803 = vmatmul.bf16.gmra.mxu3 %v6933_v27  ;;  %2205 = vmatpush.bf16.msrb.mxu0 %v5585_v18 }
 0x15b   : > { %v7529_v26 = vpack.c.bf16 %v1844_v40, %v1841_v33  ;;  %2253 = vmatpush.bf16.msrb.mxu1 %v5657_v52 }
 0x15c   : > { %v1559_v27 = vpop.f32.mrf.mxu2  ;;  %v1463_v4 = vpop.f32.mrf.mxu0 }
 0x15d   : > { %v1560_v61 = vadd.f32 %v1559_v27, %v1511_v32  ;;  %v1608_v57 = vpop.f32.mrf.mxu3  ;;  %v1464_v37 = vadd.f32 %v1463_v4, %v7470_v38  ;;  %v1512_v6 = vpop.f32.mrf.mxu1 }
 0x15f   : > { %v1609_v36 = vadd.f32 %v1608_v57, %v1560_v61  ;;  %v1513_v7 = vadd.f32 %v1512_v6, %v1464_v37  ;;  %v6141_v37 = vld [vmem:[%s9221_s4 + $0x74] sm:$0xf]  ;;  %v5626_v6 = vld [vmem:[%s9221_s4 + $0x78] sm:$0xf0] }
 0x161   : > { %v1847_v15 = vmax.f32 %v1609_v36, 0.0 }
 0x164   : > { %v1561_v8 = vpop.f32.mrf.mxu2  ;;  %v1466_v44 = vpop.f32.mrf.mxu0 }
 0x165   : > { %v1562_v9 = vadd.f32 %v1561_v8, %v1513_v7  ;;  %v1610_v12 = vpop.f32.mrf.mxu3  ;;  %v1467_v63 = vadd.f32 %v1466_v44, %v7470_v38  ;;  %v1515_v49 = vpop.f32.mrf.mxu1  ;;  %v5629_v8 = vor.u32 %v6141_v37, %v5626_v6 }
 0x167   : > { %v1611_v53 = vadd.f32 %v1610_v12, %v1562_v9  ;;  %v1516_v14 = vadd.f32 %v1515_v49, %v1467_v63  ;;  %1661 = vmatmul.bf16.gmra.mxu0 %v6959_v42  ;;  %v5648_v42 = vld [vmem:[%s9221_s4 + $0xa0] sm:$0xf]  ;;  %v6130_v9 = vld [vmem:[%s9221_s4 + $0x14] sm:$0xf0]  ;;  %v5640_v12 = vld [vmem:[%s9221_s4 + $0x90] sm:$0xf]  ;;  %2347 = vmatpush.bf16.msrb.mxu3 %v5629_v8 }
 0x168   : > { %1710 = vmatmul.bf16.gmra.mxu1 %v6961_v43  ;;  %v6148_v43 = vld [vmem:[%s9221_s4 + $0xa4] sm:$0xf0]  ;;  %v6139_v49 = vld [vmem:[%s9221_s4 + $0x64] sm:$0xf] }
 0x169   : > { %v1850_v16 = vmax.f32 %v1611_v53, 0.0  ;;  %1759 = vmatmul.bf16.gmra.mxu2 %v6963_v45  ;;  %v5649_v19 = vor.u32 %v6148_v43, %v5648_v42  ;;  %v5618_v53 = vld [vmem:[%s9221_s4 + $0x68] sm:$0xf0] }
 0x16a   : > { %1808 = vmatmul.bf16.gmra.mxu3 %v6965_v46  ;;  %v5621_v13 = vor.u32 %v6139_v49, %v5618_v53  ;;  %v5586_v53 = vld [vmem:[%s9221_s4 + $0x28] sm:$0xf0] }
 0x16b   : > { %v7549_v45 = vpack.c.bf16 %v1850_v16, %v1847_v15  ;;  %2254 = vmatpush.bf16.msrb.mxu1 %v5649_v19  ;;  %v5610_v19 = vld [vmem:[%s9221_s4 + $0x58] sm:$0xf0] }
 0x16c   : > { %v1564_v46 = vpop.f32.mrf.mxu2  ;;  %v1468_v32 = vpop.f32.mrf.mxu0  ;;  %2348 = vmatpush.bf16.msrb.mxu3 %v5621_v13 }
 0x16d   : > { %v1565_v20 = vadd.f32 %v1564_v46, %v1516_v14  ;;  %v1613_v31 = vpop.f32.mrf.mxu3  ;;  %v1469_v33 = vadd.f32 %v1468_v32, %v7470_v38  ;;  %v1517_v40 = vpop.f32.mrf.mxu1  ;;  %v6137_v46 = vld [vmem:[%s9221_s4 + $0x54] sm:$0xf]  ;;  %v6135_v32 = vld [vmem:[%s9221_s4 + $0x44] sm:$0xf] }
 0x16f   : > { %v1614_v41 = vadd.f32 %v1613_v31, %v1565_v20  ;;  %v1518_v48 = vadd.f32 %v1517_v40, %v1469_v33  ;;  %v5613_v20 = vor.u32 %v6137_v46, %v5610_v19  ;;  %v5602_v33 = vld [vmem:[%s9221_s4 + $0x48] sm:$0xf0]  ;;  %v5578_v19 = vld [vmem:[%s9221_s4 + $0x18] sm:$0xf0] }
 0x171   : > { %v1853_v36 = vmax.f32 %v1614_v41, 0.0  ;;  %2349 = vmatpush.bf16.msrb.mxu3 %v5613_v20 }
 0x174   : > { %v1566_v24 = vpop.f32.mrf.mxu2  ;;  %v1471_v27 = vpop.f32.mrf.mxu0 }
 0x175   : > { %v1567_v51 = vadd.f32 %v1566_v24, %v1518_v48  ;;  %v1615_v25 = vpop.f32.mrf.mxu3  ;;  %v1472_v52 = vadd.f32 %v1471_v27, %v7470_v38  ;;  %v1520_v61 = vpop.f32.mrf.mxu1  ;;  %v5605_v24 = vor.u32 %v6135_v32, %v5602_v33  ;;  %v5736_v32 = vld [vmem:[%s9221_s4 + $0x150] sm:$0xf]  ;;  %v6170_v33 = vld [vmem:[%s9221_s4 + $0x154] sm:$0xf0] }
 0x177   : > { %v1616_v57 = vadd.f32 %v1615_v25, %v1567_v51  ;;  %v1521_v4 = vadd.f32 %v1520_v61, %v1472_v52  ;;  %1666 = vmatmul.bf16.gmra.mxu0 %v6991_v0  ;;  %v5576_v0 = vld [vmem:[%s9221_s4 + $0x10] sm:$0xf]  ;;  %2350 = vmatpush.bf16.msrb.mxu3 %v5605_v24  ;;  %v6133_v61 = vld [vmem:[%s9221_s4 + $0x34] sm:$0xf] }
 0x178   : > { %1715 = vmatmul.bf16.gmra.mxu1 %v6993_v1  ;;  %v5577_v44 = vor.u32 %v6130_v9, %v5576_v0  ;;  %v6146_v1 = vld [vmem:[%s9221_s4 + $0x94] sm:$0xf0]  ;;  %v5752_v9 = vld [vmem:[%s9221_s4 + $0x170] sm:$0xf] }
 0x179   : > { %v1856_v7 = vmax.f32 %v1616_v57, 0.0  ;;  %1764 = vmatmul.bf16.gmra.mxu2 %v6995_v2  ;;  %v5641_v63 = vor.u32 %v6146_v1, %v5640_v12  ;;  %v5594_v57 = vld [vmem:[%s9221_s4 + $0x38] sm:$0xf0]  ;;  %v6174_v12 = vld [vmem:[%s9221_s4 + $0x174] sm:$0xf0] }
 0x17a   : > { %1813 = vmatmul.bf16.gmra.mxu3 %v6997_v3  ;;  %2206 = vmatpush.bf16.msrb.mxu0 %v5577_v44  ;;  %v5597_v6 = vor.u32 %v6133_v61, %v5594_v57  ;;  %v6131_v44 = vld [vmem:[%s9221_s4 + $0x24] sm:$0xf]  ;;  %v5753_v49 = vor.u32 %v6174_v12, %v5752_v9  ;;  %v5720_v9 = vld [vmem:[%s9221_s4 + $0x130] sm:$0xf]  ;;  %v6166_v12 = vld [vmem:[%s9221_s4 + $0x134] sm:$0xf0] }
 0x17b   : > { %v7575_v2 = vpack.c.bf16 %v1856_v7, %v1853_v36  ;;  %2255 = vmatpush.bf16.msrb.mxu1 %v5641_v63  ;;  %v6128_v36 = vld [vmem:[%s9221_s4 + $0x4] sm:$0xf0]  ;;  %v5632_v7 = vld [vmem:[%s9221_s4 + $0x80] sm:$0xf] }
 0x17c   : > { %v1569_v3 = vpop.f32.mrf.mxu2  ;;  %v1473_v16 = vpop.f32.mrf.mxu0  ;;  %2351 = vmatpush.bf16.msrb.mxu3 %v5597_v6  ;;  %2298 = vmatpush.bf16.msrb.mxu2 %v5753_v49  ;;  %v6168_v6 = vld [vmem:[%s9221_s4 + $0x144] sm:$0xf0] }
 0x17d   : > { %v1570_v14 = vadd.f32 %v1569_v3, %v1521_v4  ;;  %v1618_v15 = vpop.f32.mrf.mxu3  ;;  %v1474_v17 = vadd.f32 %v1473_v16, %v7470_v38  ;;  %v1522_v42 = vpop.f32.mrf.mxu1  ;;  %v5589_v16 = vor.u32 %v6131_v44, %v5586_v53 }
 0x17f   : > { %v1619_v18 = vadd.f32 %v1618_v15, %v1570_v14  ;;  %v1523_v43 = vadd.f32 %v1522_v42, %v1474_v17  ;;  %v5744_v42 = vld [vmem:[%s9221_s4 + $0x160] sm:$0xf] }
 0x180   : > { %2352 = vmatpush.bf16.msrb.mxu3 %v5589_v16  ;;  %v5712_v16 = vld [vmem:[%s9221_s4 + $0x120] sm:$0xf] }
 0x181   : > { %v1859_v4 = vmax.f32 %v1619_v18, 0.0  ;;  %v6172_v18 = vld [vmem:[%s9221_s4 + $0x164] sm:$0xf0] }
 0x182   : > { %v5745_v46 = vor.u32 %v6172_v18, %v5744_v42  ;;  %v5704_v18 = vld [vmem:[%s9221_s4 + $0x110] sm:$0xf] }
 0x184   : > { %v1571_v31 = vpop.f32.mrf.mxu2  ;;  %v1476_v48 = vpop.f32.mrf.mxu0  ;;  %2299 = vmatpush.bf16.msrb.mxu2 %v5745_v46 }
 0x185   : > { %v1572_v40 = vadd.f32 %v1571_v31, %v1523_v43  ;;  %v1620_v41 = vpop.f32.mrf.mxu3  ;;  %v1477_v51 = vadd.f32 %v1476_v48, %v7470_v38  ;;  %v1525_v25 = vpop.f32.mrf.mxu1  ;;  %v6129_v43 = vld [vmem:[%s9221_s4 + $0x14] sm:$0xf] }
 0x186   : > { %v5581_v20 = vor.u32 %v6129_v43, %v5578_v19  ;;  %v6162_v43 = vld [vmem:[%s9221_s4 + $0x114] sm:$0xf0] }
 0x187   : > { %v1621_v27 = vadd.f32 %v1620_v41, %v1572_v40  ;;  %v1526_v52 = vadd.f32 %v1525_v25, %v1477_v51  ;;  %1671 = vmatmul.bf16.gmra.mxu0 %v7065_v54  ;;  %v5568_v54 = vld [vmem:[%s9221_s4] sm:$0xf]  ;;  %v6127_v40 = vld [vmem:[%s9221_s4 + $0x4] sm:$0xf]  ;;  %v5737_v51 = vor.u32 %v6170_v33, %v5736_v32  ;;  %v5570_v25 = vld [vmem:[%s9221_s4 + $0x8] sm:$0xf0] }
 0x188   : > { %1720 = vmatmul.bf16.gmra.mxu1 %v7073_v58  ;;  %v5569_v8 = vor.u32 %v6128_v36, %v5568_v54  ;;  %v6144_v58 = vld [vmem:[%s9221_s4 + $0x84] sm:$0xf0]  ;;  %2353 = vmatpush.bf16.msrb.mxu3 %v5581_v20  ;;  %v5573_v61 = vor.u32 %v6127_v40, %v5570_v25 }
 0x189   : > { %v1862_v37 = vmax.f32 %v1621_v27, 0.0  ;;  %1769 = vmatmul.bf16.gmra.mxu2 %v7075_v59  ;;  %v5633_v0 = vor.u32 %v6144_v58, %v5632_v7  ;;  %v6173_v58 = vld [vmem:[%s9221_s4 + $0x174] sm:$0xf] }
 0x18a   : > { %1818 = vmatmul.bf16.gmra.mxu3 %v7077_v60  ;;  %2207 = vmatpush.bf16.msrb.mxu0 %v5569_v8  ;;  %v5690_v8 = vld [vmem:[%s9221_s4 + $0xf8] sm:$0xf0] }
 0x18b   : > { %v7619_v59 = vpack.c.bf16 %v1862_v37, %v1859_v4  ;;  %2256 = vmatpush.bf16.msrb.mxu1 %v5633_v0  ;;  %2300 = vmatpush.bf16.msrb.mxu2 %v5737_v51  ;;  %v5728_v37 = vld [vmem:[%s9221_s4 + $0x140] sm:$0xf] }
 0x18c   : > { %v1574_v60 = vpop.f32.mrf.mxu2  ;;  %v1478_v63 = vpop.f32.mrf.mxu0  ;;  %2354 = vmatpush.bf16.msrb.mxu3 %v5573_v61  ;;  %v5729_v7 = vor.u32 %v6168_v6, %v5728_v37  ;;  %v6171_v61 = vld [vmem:[%s9221_s4 + $0x164] sm:$0xf] }
 0x18d   : > { %v1575_v1 = vadd.f32 %v1574_v60, %v1526_v52  ;;  %v1623_v3 = vpop.f32.mrf.mxu3  ;;  %v1479_v14 = vadd.f32 %v1478_v63, %v7470_v38  ;;  %v1527_v15 = vpop.f32.mrf.mxu1  ;;  %v5721_v63 = vor.u32 %v6166_v12, %v5720_v9  ;;  %v6378_v12 = vld [vmem:[%s9220_s3] sm:$0x7] }
 0x18f   : > { %v1624_v13 = vadd.f32 %v1623_v3, %v1575_v1  ;;  %v1528_v17 = vadd.f32 %v1527_v15, %v1479_v14  ;;  %2301 = vmatpush.bf16.msrb.mxu2 %v5729_v7 }
 0x191   : > { %v1865_v54 = vmax.f32 %v1624_v13, 0.0  ;;  %v6164_v13 = vld [vmem:[%s9221_s4 + $0x124] sm:$0xf0] }
 0x193   : > { %2302 = vmatpush.bf16.msrb.mxu2 %v5721_v63  ;;  %v5674_v63 = vld [vmem:[%s9221_s4 + $0xd8] sm:$0xf0] }
 0x194   : > { %v1576_v31 = vpop.f32.mrf.mxu2  ;;  %v1481_v24 = vpop.f32.mrf.mxu0 }
 0x195   : > { %v1577_v41 = vadd.f32 %v1576_v31, %v1528_v17  ;;  %v1625_v48 = vpop.f32.mrf.mxu3  ;;  %v1482_v27 = vadd.f32 %v1481_v24, %v7470_v38  ;;  %v1530_v52 = vpop.f32.mrf.mxu1  ;;  %v5713_v17 = vor.u32 %v6164_v13, %v5712_v16  ;;  %v5705_v31 = vor.u32 %v6162_v43, %v5704_v18  ;;  %v6160_v24 = vld [vmem:[%s9221_s4 + $0x104] sm:$0xf0] }
 0x197   : > { %v1626_v57 = vadd.f32 %v1625_v48, %v1577_v41  ;;  %v1531_v4 = vadd.f32 %v1530_v52, %v1482_v27  ;;  %1676 = vmatmul.bf16.gmra.mxu0 %v7139_v47  ;;  %v6157_v47 = vld [vmem:[%s9221_s4 + $0xf4] sm:$0xf]  ;;  %2303 = vmatpush.bf16.msrb.mxu2 %v5713_v17  ;;  %v5696_v48 = vld [vmem:[%s9221_s4 + $0x100] sm:$0xf]  ;;  %v5682_v52 = vld [vmem:[%s9221_s4 + $0xe8] sm:$0xf0] }
 0x198   : > { %1725 = vmatmul.bf16.gmra.mxu1 %v7150_v55  ;;  %v5693_v60 = vor.u32 %v6157_v47, %v5690_v8  ;;  %v5754_v55 = vld [vmem:[%s9221_s4 + $0x178] sm:$0xf0]  ;;  %v5697_v27 = vor.u32 %v6160_v24, %v5696_v48 }
 0x199   : > { %v1868_v36 = vmax.f32 %v1626_v57, 0.0  ;;  %1774 = vmatmul.bf16.gmra.mxu2 %v7152_v56  ;;  %v5757_v0 = vor.u32 %v6173_v58, %v5754_v55 }
 0x19a   : > { %1823 = vmatmul.bf16.gmra.mxu3 %v7157_v62  ;;  %2396 = vmatpush.bf16.msra.mxu0 %v5693_v60 }
 0x19b   : > { %v7681_v56 = vpack.c.bf16 %v1868_v36, %v1865_v54  ;;  %2445 = vmatpush.bf16.msra.mxu1 %v5757_v0  ;;  %2304 = vmatpush.bf16.msrb.mxu2 %v5705_v31 }
 0x19c   : > { %v1579_v62 = vpop.f32.mrf.mxu2  ;;  %v1483_v3 = vpop.f32.mrf.mxu0 }
 0x19d   : > { %v1580_v44 = vadd.f32 %v1579_v62, %v1531_v4  ;;  %v1628_v1 = vpop.f32.mrf.mxu3  ;;  %v1484_v49 = vadd.f32 %v1483_v3, %v7470_v38  ;;  %v1532_v53 = vpop.f32.mrf.mxu1  ;;  %v6153_v3 = vld [vmem:[%s9221_s4 + $0xd4] sm:$0xf] }
 0x19f   : > { %v1629_v14 = vadd.f32 %v1628_v1, %v1580_v44  ;;  %v1533_v15 = vadd.f32 %v1532_v53, %v1484_v49  ;;  %2305 = vmatpush.bf16.msrb.mxu2 %v5697_v27  ;;  %v7731_v44 = vperm.slane %v6378_v12, 2  ;;  %v6169_v49 = vld [vmem:[%s9221_s4 + $0x154] sm:$0xf]  ;;  %v6151_v27 = vld [vmem:[%s9221_s4 + $0xc4] sm:$0xf] }
 0x1a1   : > { %v1871_v51 = vmax.f32 %v1629_v14, 0.0  ;;  %v5677_v14 = vor.u32 %v6153_v3, %v5674_v63  ;;  %v6149_v3 = vld [vmem:[%s9221_s4 + $0xb4] sm:$0xf]  ;;  %v5658_v63 = vld [vmem:[%s9221_s4 + $0xb8] sm:$0xf0] }
 0x1a4   : > { %v1581_v42 = vpop.f32.mrf.mxu2  ;;  %v1486_v20 = vpop.f32.mrf.mxu0 }
 0x1a5   : > { %v1582_v46 = vadd.f32 %v1581_v42, %v1533_v15  ;;  %v1630_v19 = vpop.f32.mrf.mxu3  ;;  %v1487_v32 = vadd.f32 %v1486_v20, %v7470_v38  ;;  %v1535_v33 = vpop.f32.mrf.mxu1  ;;  %v5738_v15 = vld [vmem:[%s9221_s4 + $0x158] sm:$0xf0] }
 0x1a6   : > { %v5741_v13 = vor.u32 %v6169_v49, %v5738_v15  ;;  %v6165_v49 = vld [vmem:[%s9221_s4 + $0x134] sm:$0xf]  ;;  %v5661_v15 = vor.u32 %v6149_v3, %v5658_v63  ;;  %v5642_v63 = vld [vmem:[%s9221_s4 + $0x98] sm:$0xf0] }
 0x1a7   : > { %v1631_v40 = vadd.f32 %v1630_v19, %v1582_v46  ;;  %v1536_v41 = vadd.f32 %v1535_v33, %v1487_v32  ;;  %1681 = vmatmul.bf16.gmra.mxu0 %v7183_v22  ;;  %v6155_v22 = vld [vmem:[%s9221_s4 + $0xe4] sm:$0xf]  ;;  %v6145_v3 = vld [vmem:[%s9221_s4 + $0x94] sm:$0xf] }
 0x1a8   : > { %1730 = vmatmul.bf16.gmra.mxu1 %v7185_v23 }
 0x1a9   : > { %v1874_v25 = vmax.f32 %v1631_v40, 0.0  ;;  %1779 = vmatmul.bf16.gmra.mxu2 %v7187_v28  ;;  %v5685_v28 = vor.u32 %v6155_v22, %v5682_v52  ;;  %v5666_v22 = vld [vmem:[%s9221_s4 + $0xc8] sm:$0xf0]  ;;  %v6167_v52 = vld [vmem:[%s9221_s4 + $0x144] sm:$0xf] }
 0x1aa   : > { %1828 = vmatmul.bf16.gmra.mxu3 %v7189_v29  ;;  %v5746_v29 = vld [vmem:[%s9221_s4 + $0x168] sm:$0xf0] }
 0x1ab   : > { %v7722_v57 = vpack.c.bf16 %v1874_v25, %v1871_v51  ;;  %v5749_v54 = vor.u32 %v6171_v61, %v5746_v29  ;;  %2397 = vmatpush.bf16.msra.mxu0 %v5685_v28  ;;  %v5669_v28 = vor.u32 %v6151_v27, %v5666_v22  ;;  %v6147_v27 = vld [vmem:[%s9221_s4 + $0xa4] sm:$0xf]  ;;  %v5650_v22 = vld [vmem:[%s9221_s4 + $0xa8] sm:$0xf0] }
 0x1ac   : > { %v1584_v23 = vpop.f32.mrf.mxu2  ;;  %v1488_v6 = vpop.f32.mrf.mxu0 }
 0x1ad   : > { %v1585_v4 = vadd.f32 %v1584_v23, %v1536_v41  ;;  %v1633_v37 = vpop.f32.mrf.mxu3  ;;  %v1489_v36 = vadd.f32 %v1488_v6, %v7470_v38  ;;  %v1537_v7 = vpop.f32.mrf.mxu1  ;;  %2446 = vmatpush.bf16.msra.mxu1 %v5749_v54 }
 0x1af   : > { %v1634_v47 = vadd.f32 %v1633_v37, %v1585_v4  ;;  %v1538_v8 = vadd.f32 %v1537_v7, %v1489_v36  ;;  %2398 = vmatpush.bf16.msra.mxu0 %v5677_v14 }
 0x1b1   : > { %v1877_v38 = vmax.f32 %v1634_v47, 0.0  ;;  %2447 = vmatpush.bf16.msra.mxu1 %v5741_v13 }
 0x1b3   : > { %2399 = vmatpush.bf16.msra.mxu0 %v5669_v28 }
 0x1b4   : > { %v1586_v58 = vpop.f32.mrf.mxu2  ;;  %v1647_v62 = vpop.f32.mrf.mxu0 }
 0x1b5   : > { %v1587_v60 = vadd.f32 %v1586_v58, %v1538_v8  ;;  %v1635_v55 = vpop.f32.mrf.mxu3  ;;  %v1696_v0 = vpop.f32.mrf.mxu1  ;;  %v1648_v53 = vadd.f32 %v1647_v62, %v7731_v44 }
 0x1b7   : > { %v1636_v9 = vadd.f32 %v1635_v55, %v1587_v60  ;;  %2208 = vmatmul.bf16.vlgmr.msrb.gmra.mxu0 %v7247_v39  ;;  %v1697_v43 = vadd.f32 %v1696_v0, %v1648_v53 }
 0x1b8   : > { %2257 = vmatmul.bf16.vlgmr.msrb.gmra.mxu1 %v7506_v5  ;;  %2400 = vmatpush.bf16.msra.mxu0 %v5661_v15 }
 0x1b9   : > { %v1880_v1 = vmax.f32 %v1636_v9, 0.0 }
 0x1ba   : > { %2355 = vmatmul.bf16.vlgmr.msrb.gmra.mxu3 %v7247_v39 }
 0x1bb   : > { %v7749_v39 = vpack.c.bf16 %v1880_v1, %v1877_v38 }
 0x1bc   : > { %v1745_v16 = vpop.f32.mrf.mxu2  ;;  %v1649_v42 = vpop.f32.mrf.mxu0 }
 0x1bd   : > { %v1794_v17 = vpop.f32.mrf.mxu3  ;;  %v1698_v18 = vpop.f32.mrf.mxu1  ;;  %v1650_v46 = vadd.f32 %v1649_v42, %v7731_v44  ;;  %v1746_v19 = vadd.f32 %v1745_v16, %v1697_v43 }
 0x1bf   : > { %v1699_v20 = vadd.f32 %v1698_v18, %v1650_v46  ;;  %v1795_v32 = vadd.f32 %v1794_v17, %v1746_v19 }
 0x1c1   : > { %v1836_v51 = vmax.f32 %v1795_v32, 0.0 }
 0x1c4   : > { %v1747_v31 = vpop.f32.mrf.mxu2  ;;  %v1652_v41 = vpop.f32.mrf.mxu0 }
 0x1c5   : > { %v1748_v33 = vadd.f32 %v1747_v31, %v1699_v20  ;;  %v1796_v40 = vpop.f32.mrf.mxu3  ;;  %v1701_v48 = vpop.f32.mrf.mxu1  ;;  %v1653_v23 = vadd.f32 %v1652_v41, %v7731_v44 }
 0x1c7   : > { %v1797_v24 = vadd.f32 %v1796_v40, %v1748_v33  ;;  %2213 = vmatmul.bf16.gmra.mxu0 %v7270_v34  ;;  %v1702_v36 = vadd.f32 %v1701_v48, %v1653_v23 }
 0x1c8   : > { %2262 = vmatmul.bf16.gmra.mxu1 %v7529_v26 }
 0x1c9   : > { %v1839_v25 = vmax.f32 %v1797_v24, 0.0 }
 0x1ca   : > { %2360 = vmatmul.bf16.gmra.mxu3 %v7270_v34  ;;  %v5730_v34 = vld [vmem:[%s9221_s4 + $0x148] sm:$0xf0] }
 0x1cb   : > { %v7764_v61 = vpack.c.bf16 %v1839_v25, %v1836_v51  ;;  %v5733_v4 = vor.u32 %v6167_v52, %v5730_v34  ;;  %v6163_v52 = vld [vmem:[%s9221_s4 + $0x124] sm:$0xf]  ;;  %v5653_v34 = vor.u32 %v6147_v27, %v5650_v22  ;;  %v5634_v22 = vld [vmem:[%s9221_s4 + $0x88] sm:$0xf0] }
 0x1cc   : > { %v1750_v29 = vpop.f32.mrf.mxu2  ;;  %v1654_v6 = vpop.f32.mrf.mxu0  ;;  %v6143_v27 = vld [vmem:[%s9221_s4 + $0x84] sm:$0xf] }
 0x1cd   : > { %v1799_v37 = vpop.f32.mrf.mxu3  ;;  %2306 = vmatmul.bf16.vlgmr.msrb.gmra.mxu2 %v7764_v61  ;;  %v1703_v54 = vpop.f32.mrf.mxu1  ;;  %2448 = vmatpush.bf16.msra.mxu1 %v5733_v4  ;;  %v1655_v7 = vadd.f32 %v1654_v6, %v7731_v44  ;;  %v1751_v47 = vadd.f32 %v1750_v29, %v1702_v36 }
 0x1ce   : > { %2401 = vmatpush.bf16.msra.mxu0 %v5653_v34 }
 0x1cf   : > { %v1704_v8 = vadd.f32 %v1703_v54, %v1655_v7  ;;  %v1800_v60 = vadd.f32 %v1799_v37, %v1751_v47 }
 0x1d1   : > { %v1842_v38 = vmax.f32 %v1800_v60, 0.0 }
 0x1d4   : > { %v1752_v58 = vpop.f32.mrf.mxu2  ;;  %v1657_v0 = vpop.f32.mrf.mxu0 }
 0x1d5   : > { %v1753_v55 = vadd.f32 %v1752_v58, %v1704_v8  ;;  %v1801_v62 = vpop.f32.mrf.mxu3  ;;  %v1706_v9 = vpop.f32.mrf.mxu1  ;;  %v1658_v53 = vadd.f32 %v1657_v0, %v7731_v44 }
 0x1d7   : > { %v1802_v12 = vadd.f32 %v1801_v62, %v1753_v55  ;;  %2218 = vmatmul.bf16.gmra.mxu0 %v7290_v30  ;;  %v1707_v43 = vadd.f32 %v1706_v9, %v1658_v53 }
 0x1d8   : > { %2267 = vmatmul.bf16.gmra.mxu1 %v7549_v45 }
 0x1d9   : > { %v1845_v1 = vmax.f32 %v1802_v12, 0.0 }
 0x1da   : > { %2365 = vmatmul.bf16.gmra.mxu3 %v7290_v30  ;;  %v5722_v30 = vld [vmem:[%s9221_s4 + $0x138] sm:$0xf0] }
 0x1db   : > { %v7785_v14 = vpack.c.bf16 %v1845_v1, %v1842_v38  ;;  %v5725_v13 = vor.u32 %v6165_v49, %v5722_v30  ;;  %v6161_v49 = vld [vmem:[%s9221_s4 + $0x114] sm:$0xf]  ;;  %v5645_v30 = vor.u32 %v6145_v3, %v5642_v63 }
 0x1dc   : > { %v1755_v16 = vpop.f32.mrf.mxu2  ;;  %v1659_v42 = vpop.f32.mrf.mxu0 }
 0x1dd   : > { %v1804_v17 = vpop.f32.mrf.mxu3  ;;  %2311 = vmatmul.bf16.gmra.mxu2 %v7785_v14  ;;  %v1708_v18 = vpop.f32.mrf.mxu1  ;;  %2449 = vmatpush.bf16.msra.mxu1 %v5725_v13  ;;  %v1660_v46 = vadd.f32 %v1659_v42, %v7731_v44  ;;  %v1756_v19 = vadd.f32 %v1755_v16, %v1707_v43 }
 0x1de   : > { %2402 = vmatpush.bf16.msra.mxu0 %v5645_v30 }
 0x1df   : > { %v1709_v20 = vadd.f32 %v1708_v18, %v1660_v46  ;;  %v1805_v32 = vadd.f32 %v1804_v17, %v1756_v19 }
 0x1e1   : > { %v1848_v51 = vmax.f32 %v1805_v32, 0.0 }
 0x1e4   : > { %v1757_v31 = vpop.f32.mrf.mxu2  ;;  %v1662_v41 = vpop.f32.mrf.mxu0 }
 0x1e5   : > { %v1758_v33 = vadd.f32 %v1757_v31, %v1709_v20  ;;  %v1806_v40 = vpop.f32.mrf.mxu3  ;;  %v1711_v48 = vpop.f32.mrf.mxu1  ;;  %v1663_v23 = vadd.f32 %v1662_v41, %v7731_v44 }
 0x1e7   : > { %v1807_v24 = vadd.f32 %v1806_v40, %v1758_v33  ;;  %2223 = vmatmul.bf16.gmra.mxu0 %v7322_v35  ;;  %v1712_v36 = vadd.f32 %v1711_v48, %v1663_v23 }
 0x1e8   : > { %2272 = vmatmul.bf16.gmra.mxu1 %v7575_v2 }
 0x1e9   : > { %v1851_v25 = vmax.f32 %v1807_v24, 0.0 }
 0x1ea   : > { %2370 = vmatmul.bf16.gmra.mxu3 %v7322_v35  ;;  %v5714_v35 = vld [vmem:[%s9221_s4 + $0x128] sm:$0xf0] }
 0x1eb   : > { %v7805_v28 = vpack.c.bf16 %v1851_v25, %v1848_v51  ;;  %v5717_v4 = vor.u32 %v6163_v52, %v5714_v35  ;;  %v6159_v52 = vld [vmem:[%s9221_s4 + $0x104] sm:$0xf]  ;;  %v5637_v35 = vor.u32 %v6143_v27, %v5634_v22  ;;  %v5880_v22 = vld [vmem:[%s9223_s6 + $0xf0] sm:$0xf] }
 0x1ec   : > { %v1760_v29 = vpop.f32.mrf.mxu2  ;;  %v1664_v6 = vpop.f32.mrf.mxu0 }
 0x1ed   : > { %v1809_v37 = vpop.f32.mrf.mxu3  ;;  %2316 = vmatmul.bf16.gmra.mxu2 %v7805_v28  ;;  %v1713_v54 = vpop.f32.mrf.mxu1  ;;  %2450 = vmatpush.bf16.msra.mxu1 %v5717_v4  ;;  %v1665_v7 = vadd.f32 %v1664_v6, %v7731_v44  ;;  %v1761_v47 = vadd.f32 %v1760_v29, %v1712_v36 }
 0x1ee   : > { %2403 = vmatpush.bf16.msra.mxu0 %v5637_v35 }
 0x1ef   : > { %v1714_v8 = vadd.f32 %v1713_v54, %v1665_v7  ;;  %v1810_v60 = vadd.f32 %v1809_v37, %v1761_v47 }
 0x1f1   : > { %v1854_v38 = vmax.f32 %v1810_v60, 0.0 }
 0x1f4   : > { %v1762_v58 = vpop.f32.mrf.mxu2  ;;  %v1667_v0 = vpop.f32.mrf.mxu0 }
 0x1f5   : > { %v1763_v55 = vadd.f32 %v1762_v58, %v1714_v8  ;;  %v1811_v62 = vpop.f32.mrf.mxu3  ;;  %v1716_v9 = vpop.f32.mrf.mxu1  ;;  %v1668_v53 = vadd.f32 %v1667_v0, %v7731_v44 }
 0x1f7   : > { %v1812_v12 = vadd.f32 %v1811_v62, %v1763_v55  ;;  %2228 = vmatmul.bf16.gmra.mxu0 %v7390_v21  ;;  %v1717_v43 = vadd.f32 %v1716_v9, %v1668_v53 }
 0x1f8   : > { %2277 = vmatmul.bf16.gmra.mxu1 %v7619_v59 }
 0x1f9   : > { %v1857_v1 = vmax.f32 %v1812_v12, 0.0 }
 0x1fa   : > { %2375 = vmatmul.bf16.gmra.mxu3 %v7390_v21  ;;  %v5706_v21 = vld [vmem:[%s9221_s4 + $0x118] sm:$0xf0] }
 0x1fb   : > { %v7825_v15 = vpack.c.bf16 %v1857_v1, %v1854_v38  ;;  %v5709_v13 = vor.u32 %v6161_v49, %v5706_v21 }
 0x1fc   : > { %v1765_v16 = vpop.f32.mrf.mxu2  ;;  %v1669_v42 = vpop.f32.mrf.mxu0 }
 0x1fd   : > { %v1814_v17 = vpop.f32.mrf.mxu3  ;;  %2321 = vmatmul.bf16.gmra.mxu2 %v7825_v15  ;;  %v1718_v18 = vpop.f32.mrf.mxu1  ;;  %2451 = vmatpush.bf16.msra.mxu1 %v5709_v13  ;;  %v1670_v46 = vadd.f32 %v1669_v42, %v7731_v44  ;;  %v1766_v19 = vadd.f32 %v1765_v16, %v1717_v43  ;;  %v5816_v16 = vld [vmem:[%s9223_s6 + $0x70] sm:$0xf]  ;;  %v6190_v13 = vld [vmem:[%s9223_s6 + $0x74] sm:$0xf0]  ;;  %v5808_v43 = vld [vmem:[%s9223_s6 + $0x60] sm:$0xf] }
 0x1fe   : > { %v5817_v42 = vor.u32 %v6190_v13, %v5816_v16 }
 0x1ff   : > { %v1719_v20 = vadd.f32 %v1718_v18, %v1670_v46  ;;  %v1815_v32 = vadd.f32 %v1814_v17, %v1766_v19  ;;  %v6188_v46 = vld [vmem:[%s9223_s6 + $0x64] sm:$0xf0] }
 0x200   : > { %2740 = vmatpush.bf16.msra.mxu2 %v5817_v42 }
 0x201   : > { %v1860_v51 = vmax.f32 %v1815_v32, 0.0 }
 0x204   : > { %v1767_v31 = vpop.f32.mrf.mxu2  ;;  %v1672_v41 = vpop.f32.mrf.mxu0 }
 0x205   : > { %v1768_v33 = vadd.f32 %v1767_v31, %v1719_v20  ;;  %v1816_v40 = vpop.f32.mrf.mxu3  ;;  %v1721_v48 = vpop.f32.mrf.mxu1  ;;  %v1673_v23 = vadd.f32 %v1672_v41, %v7731_v44  ;;  %v5809_v20 = vor.u32 %v6188_v46, %v5808_v43  ;;  %v5768_v43 = vld [vmem:[%s9223_s6 + $0x10] sm:$0xf]  ;;  %v6178_v46 = vld [vmem:[%s9223_s6 + $0x14] sm:$0xf0] }
 0x207   : > { %v1817_v24 = vadd.f32 %v1816_v40, %v1768_v33  ;;  %2233 = vmatmul.bf16.gmra.mxu0 %v7446_v11  ;;  %v1722_v36 = vadd.f32 %v1721_v48, %v1673_v23  ;;  %2741 = vmatpush.bf16.msra.mxu2 %v5809_v20  ;;  %v5769_v20 = vor.u32 %v6178_v46, %v5768_v43  ;;  %v5794_v46 = vld [vmem:[%s9223_s6 + $0x48] sm:$0xf0] }
 0x208   : > { %2282 = vmatmul.bf16.gmra.mxu1 %v7681_v56 }
 0x209   : > { %v1863_v25 = vmax.f32 %v1817_v24, 0.0  ;;  %v5800_v24 = vld [vmem:[%s9223_s6 + $0x50] sm:$0xf] }
 0x20a   : > { %2380 = vmatmul.bf16.gmra.mxu3 %v7446_v11  ;;  %v5698_v11 = vld [vmem:[%s9221_s4 + $0x108] sm:$0xf0] }
 0x20b   : > { %v7845_v34 = vpack.c.bf16 %v1863_v25, %v1860_v51  ;;  %v5701_v4 = vor.u32 %v6159_v52, %v5698_v11  ;;  %v6186_v51 = vld [vmem:[%s9223_s6 + $0x54] sm:$0xf0] }
 0x20c   : > { %v1770_v29 = vpop.f32.mrf.mxu2  ;;  %v1674_v6 = vpop.f32.mrf.mxu0  ;;  %v5801_v27 = vor.u32 %v6186_v51, %v5800_v24  ;;  %v6206_v52 = vld [vmem:[%s9223_s6 + $0xf4] sm:$0xf0] }
 0x20d   : > { %v1819_v37 = vpop.f32.mrf.mxu3  ;;  %2326 = vmatmul.bf16.gmra.mxu2 %v7845_v34  ;;  %v1723_v54 = vpop.f32.mrf.mxu1  ;;  %2452 = vmatpush.bf16.msra.mxu1 %v5701_v4  ;;  %v1675_v7 = vadd.f32 %v1674_v6, %v7731_v44  ;;  %v1771_v47 = vadd.f32 %v1770_v29, %v1722_v36  ;;  %v5881_v11 = vor.u32 %v6206_v52, %v5880_v22  ;;  %v5792_v29 = vld [vmem:[%s9223_s6 + $0x40] sm:$0xf]  ;;  %v6184_v4 = vld [vmem:[%s9223_s6 + $0x44] sm:$0xf0]  ;;  %v5810_v22 = vld [vmem:[%s9223_s6 + $0x68] sm:$0xf0] }
 0x20e   : > { %2742 = vmatpush.bf16.msra.mxu2 %v5801_v27 }
 0x20f   : > { %v1724_v8 = vadd.f32 %v1723_v54, %v1675_v7  ;;  %v1820_v60 = vadd.f32 %v1819_v37, %v1771_v47  ;;  %2789 = vmatpush.bf16.msra.mxu3 %v5881_v11  ;;  %v5793_v54 = vor.u32 %v6184_v4, %v5792_v29 }
 0x211   : > { %v1866_v38 = vmax.f32 %v1820_v60, 0.0  ;;  %v5784_v60 = vld [vmem:[%s9223_s6 + $0x30] sm:$0xf] }
 0x212   : > { %2743 = vmatpush.bf16.msra.mxu2 %v5793_v54  ;;  %v6202_v54 = vld [vmem:[%s9223_s6 + $0xd4] sm:$0xf0] }
 0x214   : > { %v1772_v58 = vpop.f32.mrf.mxu2  ;;  %v1677_v0 = vpop.f32.mrf.mxu0 }
 0x215   : > { %v1773_v55 = vadd.f32 %v1772_v58, %v1724_v8  ;;  %v1821_v62 = vpop.f32.mrf.mxu3  ;;  %v1726_v9 = vpop.f32.mrf.mxu1  ;;  %v1678_v3 = vadd.f32 %v1677_v0, %v7731_v44  ;;  %v6189_v8 = vld [vmem:[%s9223_s6 + $0x74] sm:$0xf]  ;;  %v5818_v58 = vld [vmem:[%s9223_s6 + $0x78] sm:$0xf0] }
 0x216   : > { %v5821_v0 = vor.u32 %v6189_v8, %v5818_v58  ;;  %v6185_v8 = vld [vmem:[%s9223_s6 + $0x54] sm:$0xf] }
 0x217   : > { %v1822_v12 = vadd.f32 %v1821_v62, %v1773_v55  ;;  %2238 = vmatmul.bf16.gmra.mxu0 %v7463_v10  ;;  %v1727_v17 = vadd.f32 %v1726_v9, %v1678_v3  ;;  %v6182_v9 = vld [vmem:[%s9223_s6 + $0x34] sm:$0xf0] }
 0x218   : > { %2287 = vmatmul.bf16.gmra.mxu1 %v7722_v57  ;;  %2838 = vmatpush.bf16.msrb.mxu0 %v5821_v0 }
 0x219   : > { %v1869_v1 = vmax.f32 %v1822_v12, 0.0  ;;  %v6205_v12 = vld [vmem:[%s9223_s6 + $0xf4] sm:$0xf] }
 0x21a   : > { %2385 = vmatmul.bf16.gmra.mxu3 %v7463_v10 }
 0x21b   : > { %v7856_v63 = vpack.c.bf16 %v1869_v1, %v1866_v38  ;;  %v5882_v38 = vld [vmem:[%s9223_s6 + $0xf8] sm:$0xf0]  ;;  %v5785_v1 = vor.u32 %v6182_v9, %v5784_v60 }
 0x21c   : > { %v1775_v49 = vpop.f32.mrf.mxu2  ;;  %v1679_v30 = vpop.f32.mrf.mxu0 }
 0x21d   : > { %v1824_v53 = vpop.f32.mrf.mxu3  ;;  %2331 = vmatmul.bf16.gmra.mxu2 %v7856_v63  ;;  %v1728_v21 = vpop.f32.mrf.mxu1  ;;  %v1680_v10 = vadd.f32 %v1679_v30, %v7731_v44  ;;  %v1776_v18 = vadd.f32 %v1775_v49, %v1727_v17  ;;  %v5885_v49 = vor.u32 %v6205_v12, %v5882_v38 }
 0x21e   : > { %2744 = vmatpush.bf16.msra.mxu2 %v5785_v1 }
 0x21f   : > { %v1729_v19 = vadd.f32 %v1728_v21, %v1680_v10  ;;  %v1825_v32 = vadd.f32 %v1824_v53, %v1776_v18  ;;  %v6180_v53 = vld [vmem:[%s9223_s6 + $0x24] sm:$0xf0]  ;;  %2887 = vmatpush.bf16.msrb.mxu1 %v5885_v49 }
 0x221   : > { %v1872_v23 = vmax.f32 %v1825_v32, 0.0  ;;  %v6204_v32 = vld [vmem:[%s9223_s6 + $0xe4] sm:$0xf0] }
 0x224   : > { %v1777_v31 = vpop.f32.mrf.mxu2  ;;  %v1682_v41 = vpop.f32.mrf.mxu0 }
 0x225   : > { %v1778_v33 = vadd.f32 %v1777_v31, %v1729_v19  ;;  %v1826_v40 = vpop.f32.mrf.mxu3  ;;  %v1731_v48 = vpop.f32.mrf.mxu1  ;;  %v1683_v37 = vadd.f32 %v1682_v41, %v7731_v44  ;;  %v5872_v31 = vld [vmem:[%s9223_s6 + $0xe0] sm:$0xf] }
 0x226   : > { %v5873_v41 = vor.u32 %v6204_v32, %v5872_v31  ;;  %v5858_v31 = vld [vmem:[%s9223_s6 + $0xc8] sm:$0xf0] }
 0x227   : > { %v1827_v25 = vadd.f32 %v1826_v40, %v1778_v33  ;;  %2243 = vmatmul.bf16.gmra.mxu0 %v7489_v50  ;;  %v1732_v55 = vadd.f32 %v1731_v48, %v1683_v37  ;;  %v5760_v48 = vld [vmem:[%s9223_s6] sm:$0xf]  ;;  %v5864_v37 = vld [vmem:[%s9223_s6 + $0xd0] sm:$0xf] }
 0x228   : > { %2292 = vmatmul.bf16.gmra.mxu1 %v7749_v39  ;;  %2790 = vmatpush.bf16.msra.mxu3 %v5873_v41 }
 0x229   : > { %v1875_v35 = vmax.f32 %v1827_v25, 0.0 }
 0x22a   : > { %2390 = vmatmul.bf16.gmra.mxu3 %v7489_v50 }
 0x22b   : > { %v7894_v6 = vpack.c.bf16 %v1875_v35, %v1872_v23  ;;  %v6203_v23 = vld [vmem:[%s9223_s6 + $0xe4] sm:$0xf]  ;;  %v5874_v35 = vld [vmem:[%s9223_s6 + $0xe8] sm:$0xf0] }
 0x22c   : > { %v1780_v36 = vpop.f32.mrf.mxu2  ;;  %v1684_v47 = vpop.f32.mrf.mxu0  ;;  %v5877_v11 = vor.u32 %v6203_v23, %v5874_v35 }
 0x22d   : > { %v1829_v7 = vpop.f32.mrf.mxu3  ;;  %2336 = vmatmul.bf16.gmra.mxu2 %v7894_v6  ;;  %v1733_v50 = vpop.f32.mrf.mxu1  ;;  %v1685_v62 = vadd.f32 %v1684_v47, %v7731_v44  ;;  %v1781_v3 = vadd.f32 %v1780_v36, %v1732_v55  ;;  %v5776_v44 = vld [vmem:[%s9223_s6 + $0x20] sm:$0xf]  ;;  %v5865_v36 = vor.u32 %v6202_v54, %v5864_v37  ;;  %v6201_v55 = vld [vmem:[%s9223_s6 + $0xd4] sm:$0xf]  ;;  %v5786_v54 = vld [vmem:[%s9223_s6 + $0x38] sm:$0xf0] }
 0x22e   : > { %v5777_v21 = vor.u32 %v6180_v53, %v5776_v44  ;;  %2888 = vmatpush.bf16.msrb.mxu1 %v5877_v11 }
 0x22f   : > { %v1734_v30 = vadd.f32 %v1733_v50, %v1685_v62  ;;  %v1830_v13 = vadd.f32 %v1829_v7, %v1781_v3  ;;  %v7968_v7 = vld [vmem:[%s9222_s5] sm:$0x3]  ;;  %2791 = vmatpush.bf16.msra.mxu3 %v5865_v36  ;;  %v5866_v62 = vld [vmem:[%s9223_s6 + $0xd8] sm:$0xf0] }
 0x230   : > { %2745 = vmatpush.bf16.msra.mxu2 %v5777_v21  ;;  %v7971_v47 = vperm.slane %v7968_v7, 0  ;;  %v5869_v9 = vor.u32 %v6201_v55, %v5866_v62  ;;  %v6200_v21 = vld [vmem:[%s9223_s6 + $0xc4] sm:$0xf0] }
 0x231   : > { %v1878_v33 = vmax.f32 %v1830_v13, 0.0 }
 0x232   : > { %2889 = vmatpush.bf16.msrb.mxu1 %v5869_v9 }
 0x234   : > { %v1782_v16 = vpop.f32.mrf.mxu2  ;;  %v2209_v10 = vpop.f32.mrf.mxu0  ;;  %2746 = vmatpush.bf16.msra.mxu2 %v5769_v20  ;;  %v6199_v20 = vld [vmem:[%s9223_s6 + $0xc4] sm:$0xf] }
 0x235   : > { %v1783_v17 = vadd.f32 %v1782_v16, %v1734_v30  ;;  %v1831_v42 = vpop.f32.mrf.mxu3  ;;  %v2258_v18 = vpop.f32.mrf.mxu1  ;;  %v2210_v0 = vadd.f32 %v2209_v10, %v7971_v47  ;;  %v5856_v30 = vld [vmem:[%s9223_s6 + $0xc0] sm:$0xf] }
 0x236   : > { %v5857_v13 = vor.u32 %v6200_v21, %v5856_v30 }
 0x237   : > { %v1832_v19 = vadd.f32 %v1831_v42, %v1783_v17  ;;  %2404 = vmatmul.bf16.vlgmr.msra.gmra.mxu0 %v7506_v5  ;;  %v6176_v5 = vld [vmem:[%s9223_s6 + $0x4] sm:$0xf0]  ;;  %v2259_v38 = vadd.f32 %v2258_v18, %v2210_v0 }
 0x238   : > { %2453 = vmatmul.bf16.vlgmr.msra.gmra.mxu1 %v7764_v61  ;;  %v5761_v51 = vor.u32 %v6176_v5, %v5760_v48  ;;  %v6187_v61 = vld [vmem:[%s9223_s6 + $0x64] sm:$0xf]  ;;  %2792 = vmatpush.bf16.msra.mxu3 %v5857_v13  ;;  %v5778_v13 = vld [vmem:[%s9223_s6 + $0x28] sm:$0xf0] }
 0x239   : > { %v1881_v40 = vmax.f32 %v1832_v19, 0.0  ;;  %v5813_v52 = vor.u32 %v6187_v61, %v5810_v22  ;;  %v5848_v61 = vld [vmem:[%s9223_s6 + $0xb0] sm:$0xf]  ;;  %v6198_v22 = vld [vmem:[%s9223_s6 + $0xb4] sm:$0xf0] }
 0x23a   : > { %2747 = vmatpush.bf16.msra.mxu2 %v5761_v51  ;;  %v5849_v23 = vor.u32 %v6198_v22, %v5848_v61 }
 0x23b   : > { %v7942_v24 = vpack.c.bf16 %v1881_v40, %v1878_v33  ;;  %2839 = vmatpush.bf16.msrb.mxu0 %v5813_v52  ;;  %v5861_v33 = vor.u32 %v6199_v20, %v5858_v31 }
 0x23c   : > { %v2211_v25 = vpop.f32.mrf.mxu0  ;;  %2793 = vmatpush.bf16.msra.mxu3 %v5849_v23 }
 0x23d   : > { %2341 = vmatmul.bf16.gmra.mxu2 %v7942_v24  ;;  %v2260_v27 = vpop.f32.mrf.mxu1  ;;  %v2212_v12 = vadd.f32 %v2211_v25, %v7971_v47  ;;  %2890 = vmatpush.bf16.msrb.mxu1 %v5861_v33 }
 0x23f   : > { %v2261_v49 = vadd.f32 %v2260_v27, %v2212_v12 }
 0x244   : > { %v2214_v29 = vpop.f32.mrf.mxu0 }
 0x245   : > { %v2263_v4 = vpop.f32.mrf.mxu1  ;;  %v2215_v32 = vadd.f32 %v2214_v29, %v7971_v47 }
 0x247   : > { %2409 = vmatmul.bf16.gmra.mxu0 %v7529_v26  ;;  %v2264_v41 = vadd.f32 %v2263_v4, %v2215_v32 }
 0x248   : > { %2458 = vmatmul.bf16.gmra.mxu1 %v7785_v14  ;;  %v5802_v14 = vld [vmem:[%s9223_s6 + $0x58] sm:$0xf0] }
 0x249   : > { %v5805_v58 = vor.u32 %v6185_v8, %v5802_v14 }
 0x24b   : > { %2840 = vmatpush.bf16.msrb.mxu0 %v5805_v58 }
 0x24c   : > { %v2216_v26 = vpop.f32.mrf.mxu0 }
 0x24d   : > { %v2265_v50 = vpop.f32.mrf.mxu1  ;;  %v2217_v40 = vadd.f32 %v2216_v26, %v7971_v47  ;;  %v6197_v26 = vld [vmem:[%s9223_s6 + $0xb4] sm:$0xf] }
 0x24f   : > { %v2266_v51 = vadd.f32 %v2265_v50, %v2217_v40  ;;  %v5850_v50 = vld [vmem:[%s9223_s6 + $0xb8] sm:$0xf0]  ;;  %v5832_v40 = vld [vmem:[%s9223_s6 + $0x90] sm:$0xf] }
 0x250   : > { %v2307_v60 = vpop.f32.mrf.mxu2  ;;  %v5853_v14 = vor.u32 %v6197_v26, %v5850_v50 }
 0x251   : > { %v2308_v44 = vadd.f32 %v2307_v60, %v2259_v38  ;;  %v5840_v38 = vld [vmem:[%s9223_s6 + $0xa0] sm:$0xf] }
 0x252   : > { %2891 = vmatpush.bf16.msrb.mxu1 %v5853_v14 }
 0x253   : > { %v2494_v17 = vmax.f32 %v2308_v44, 0.0 }
 0x254   : > { %v2219_v1 = vpop.f32.mrf.mxu0 }
 0x255   : > { %v2268_v3 = vpop.f32.mrf.mxu1  ;;  %v2220_v8 = vadd.f32 %v2219_v1, %v7971_v47  ;;  %v6196_v1 = vld [vmem:[%s9223_s6 + $0xa4] sm:$0xf0] }
 0x256   : > { %v5841_v44 = vor.u32 %v6196_v1, %v5840_v38 }
 0x257   : > { %2414 = vmatmul.bf16.gmra.mxu0 %v7549_v45  ;;  %v6183_v45 = vld [vmem:[%s9223_s6 + $0x44] sm:$0xf]  ;;  %v2269_v60 = vadd.f32 %v2268_v3, %v2220_v8 }
 0x258   : > { %v2309_v53 = vpop.f32.mrf.mxu2  ;;  %2463 = vmatmul.bf16.gmra.mxu1 %v7805_v28  ;;  %v5797_v19 = vor.u32 %v6183_v45, %v5794_v46  ;;  %2794 = vmatpush.bf16.msra.mxu3 %v5841_v44 }
 0x259   : > { %v2310_v16 = vadd.f32 %v2309_v53, %v2261_v49 }
 0x25a   : > { %2841 = vmatpush.bf16.msrb.mxu0 %v5797_v19 }
 0x25b   : > { %v2496_v10 = vmax.f32 %v2310_v16, 0.0 }
 0x25c   : > { %v2221_v18 = vpop.f32.mrf.mxu0 }
 0x25d   : > { %v7995_v42 = vpack.c.bf16 %v2496_v10, %v2494_v17  ;;  %v2270_v43 = vpop.f32.mrf.mxu1  ;;  %v2222_v58 = vadd.f32 %v2221_v18, %v7971_v47  ;;  %v6195_v10 = vld [vmem:[%s9223_s6 + $0xa4] sm:$0xf]  ;;  %v5842_v18 = vld [vmem:[%s9223_s6 + $0xa8] sm:$0xf0] }
 0x25e   : > { %v5845_v45 = vor.u32 %v6195_v10, %v5842_v18 }
 0x25f   : > { %2748 = vmatmul.bf16.vlgmr.msra.gmra.mxu2 %v7995_v42  ;;  %v2271_v0 = vadd.f32 %v2270_v43, %v2222_v58 }
 0x260   : > { %v2312_v28 = vpop.f32.mrf.mxu2  ;;  %2892 = vmatpush.bf16.msrb.mxu1 %v5845_v45 }
 0x261   : > { %v2313_v25 = vadd.f32 %v2312_v28, %v2264_v41  ;;  %v6194_v41 = vld [vmem:[%s9223_s6 + $0x94] sm:$0xf0] }
 0x263   : > { %v2498_v35 = vmax.f32 %v2313_v25, 0.0 }
 0x264   : > { %v2224_v48 = vpop.f32.mrf.mxu0 }
 0x265   : > { %v2273_v5 = vpop.f32.mrf.mxu1  ;;  %v2225_v43 = vadd.f32 %v2224_v48, %v7971_v47 }
 0x267   : > { %2419 = vmatmul.bf16.gmra.mxu0 %v7575_v2  ;;  %v6181_v2 = vld [vmem:[%s9223_s6 + $0x34] sm:$0xf]  ;;  %v2274_v19 = vadd.f32 %v2273_v5, %v2225_v43 }
 0x268   : > { %v2314_v27 = vpop.f32.mrf.mxu2  ;;  %2468 = vmatmul.bf16.gmra.mxu1 %v7825_v15  ;;  %v5789_v36 = vor.u32 %v6181_v2, %v5786_v54  ;;  %v2356_v2 = vpop.f32.mrf.mxu3 }
 0x269   : > { %v2315_v52 = vadd.f32 %v2314_v27, %v2266_v51  ;;  %v5833_v51 = vor.u32 %v6194_v41, %v5832_v40 }
 0x26a   : > { %2842 = vmatpush.bf16.msrb.mxu0 %v5789_v36  ;;  %v6175_v36 = vld [vmem:[%s9223_s6 + $0x4] sm:$0xf] }
 0x26b   : > { %v2500_v11 = vmax.f32 %v2315_v52, 0.0  ;;  %2795 = vmatpush.bf16.msra.mxu3 %v5833_v51  ;;  %v5770_v52 = vld [vmem:[%s9223_s6 + $0x18] sm:$0xf0] }
 0x26c   : > { %v2226_v29 = vpop.f32.mrf.mxu0 }
 0x26d   : > { %v8020_v4 = vpack.c.bf16 %v2500_v11, %v2498_v35  ;;  %v2275_v37 = vpop.f32.mrf.mxu1  ;;  %v2227_v46 = vadd.f32 %v2226_v29, %v7971_v47  ;;  %v6193_v35 = vld [vmem:[%s9223_s6 + $0x94] sm:$0xf]  ;;  %v5834_v11 = vld [vmem:[%s9223_s6 + $0x98] sm:$0xf0] }
 0x26f   : > { %2753 = vmatmul.bf16.gmra.mxu2 %v8020_v4  ;;  %v2276_v31 = vadd.f32 %v2275_v37, %v2227_v46  ;;  %v5837_v37 = vor.u32 %v6193_v35, %v5834_v11  ;;  %v6214_v35 = vld [vmem:[%s9225_s8 + $0x38] sm:$0xff] }
 0x270   : > { %v2317_v15 = vpop.f32.mrf.mxu2  ;;  %3116 = vmatpush.bf16.msrb.mxu2 %v6214_v35 }
 0x271   : > { %v2318_v9 = vadd.f32 %v2317_v15, %v2269_v60  ;;  %2893 = vmatpush.bf16.msrb.mxu1 %v5837_v37  ;;  %v5762_v15 = vld [vmem:[%s9223_s6 + $0x8] sm:$0xf0] }
 0x272   : > { %v5765_v8 = vor.u32 %v6175_v36, %v5762_v15 }
 0x273   : > { %v2502_v3 = vmax.f32 %v2318_v9, 0.0  ;;  %v5824_v9 = vld [vmem:[%s9223_s6 + $0x80] sm:$0xf] }
 0x274   : > { %v2229_v55 = vpop.f32.mrf.mxu0 }
 0x275   : > { %v2278_v62 = vpop.f32.mrf.mxu1  ;;  %v2230_v29 = vadd.f32 %v2229_v55, %v7971_v47 }
 0x277   : > { %2424 = vmatmul.bf16.gmra.mxu0 %v7619_v59  ;;  %v6179_v59 = vld [vmem:[%s9223_s6 + $0x24] sm:$0xf]  ;;  %v2279_v26 = vadd.f32 %v2278_v62, %v2230_v29  ;;  %v6192_v62 = vld [vmem:[%s9223_s6 + $0x84] sm:$0xf0] }
 0x278   : > { %v2319_v12 = vpop.f32.mrf.mxu2  ;;  %2473 = vmatmul.bf16.gmra.mxu1 %v7845_v34  ;;  %v5781_v17 = vor.u32 %v6179_v59, %v5778_v13  ;;  %v5825_v1 = vor.u32 %v6192_v62, %v5824_v9 }
 0x279   : > { %v2320_v49 = vadd.f32 %v2319_v12, %v2271_v0 }
 0x27a   : > { %2843 = vmatpush.bf16.msrb.mxu0 %v5781_v17  ;;  %2796 = vmatpush.bf16.msra.mxu3 %v5825_v1 }
 0x27b   : > { %v2504_v53 = vmax.f32 %v2320_v49, 0.0  ;;  %v2358_v49 = vpop.f32.mrf.mxu3 }
 0x27c   : > { %v2231_v30 = vpop.f32.mrf.mxu0 }
 0x27d   : > { %v8045_v21 = vpack.c.bf16 %v2504_v53, %v2502_v3  ;;  %v2280_v16 = vpop.f32.mrf.mxu1  ;;  %v2232_v54 = vadd.f32 %v2231_v30, %v7971_v47  ;;  %v6191_v30 = vld [vmem:[%s9223_s6 + $0x84] sm:$0xf] }
 0x27f   : > { %2758 = vmatmul.bf16.gmra.mxu2 %v8045_v21  ;;  %v2281_v58 = vadd.f32 %v2280_v16, %v2232_v54  ;;  %v5826_v16 = vld [vmem:[%s9223_s6 + $0x88] sm:$0xf0] }
 0x280   : > { %v2322_v34 = vpop.f32.mrf.mxu2  ;;  %v5829_v13 = vor.u32 %v6191_v30, %v5826_v16 }
 0x281   : > { %v2323_v32 = vadd.f32 %v2322_v34, %v2274_v19 }
 0x282   : > { %2894 = vmatpush.bf16.msrb.mxu1 %v5829_v13 }
 0x283   : > { %v2506_v5 = vmax.f32 %v2323_v32, 0.0  ;;  %v2361_v18 = vpop.f32.mrf.mxu3 }
 0x284   : > { %v2234_v28 = vpop.f32.mrf.mxu0 }
 0x285   : > { %v2283_v20 = vpop.f32.mrf.mxu1  ;;  %v2235_v53 = vadd.f32 %v2234_v28, %v7971_v47 }
 0x287   : > { %2429 = vmatmul.bf16.gmra.mxu0 %v7681_v56  ;;  %v6177_v56 = vld [vmem:[%s9223_s6 + $0x14] sm:$0xf]  ;;  %v2284_v17 = vadd.f32 %v2283_v20, %v2235_v53 }
 0x288   : > { %v2324_v33 = vpop.f32.mrf.mxu2  ;;  %2478 = vmatmul.bf16.gmra.mxu1 %v7856_v63  ;;  %v5773_v23 = vor.u32 %v6177_v56, %v5770_v52 }
 0x289   : > { %v2325_v48 = vadd.f32 %v2324_v33, %v2276_v31 }
 0x28a   : > { %2844 = vmatpush.bf16.msrb.mxu0 %v5773_v23 }
 0x28b   : > { %v2508_v25 = vmax.f32 %v2325_v48, 0.0  ;;  %v2363_v41 = vpop.f32.mrf.mxu3 }
 0x28c   : > { %v2236_v27 = vpop.f32.mrf.mxu0 }
 0x28d   : > { %v8070_v61 = vpack.c.bf16 %v2508_v25, %v2506_v5  ;;  %v2285_v22 = vpop.f32.mrf.mxu1  ;;  %v2237_v59 = vadd.f32 %v2236_v27, %v7971_v47  ;;  %v8120_v5 = vperm.slane %v7968_v7, 1  ;;  %v6222_v7 = vld [vmem:[%s9225_s8 + $0x78] sm:$0xff] }
 0x28e   : > { %2845 = vmatpush.bf16.msrb.mxu0 %v5765_v8  ;;  %3165 = vmatpush.bf16.msrb.mxu3 %v6222_v7 }
 0x28f   : > { %2763 = vmatmul.bf16.gmra.mxu2 %v8070_v61  ;;  %v2286_v43 = vadd.f32 %v2285_v22, %v2237_v59  ;;  %v2357_v56 = vadd.f32 %v2356_v2, %v8120_v5  ;;  %v2359_v54 = vadd.f32 %v2358_v49, %v8120_v5  ;;  %v6221_v59 = vld [vmem:[%s9225_s8 + $0x70] sm:$0xff]  ;;  %v2364_v13 = vadd.f32 %v2363_v41, %v8120_v5 }
 0x290   : > { %v2327_v63 = vpop.f32.mrf.mxu2 }
 0x291   : > { %v2328_v60 = vadd.f32 %v2327_v63, %v2279_v26 }
 0x292   : > { %3166 = vmatpush.bf16.msrb.mxu3 %v6221_v59 }
 0x293   : > { %v2510_v12 = vmax.f32 %v2328_v60, 0.0  ;;  %v2366_v11 = vpop.f32.mrf.mxu3 }
 0x294   : > { %v2239_v50 = vpop.f32.mrf.mxu0 }
 0x295   : > { %v2288_v14 = vpop.f32.mrf.mxu1  ;;  %v2240_v48 = vadd.f32 %v2239_v50, %v7971_v47 }
 0x297   : > { %2434 = vmatmul.bf16.gmra.mxu0 %v7722_v57 }
 0x298   : > { %v2329_v55 = vpop.f32.mrf.mxu2  ;;  %2483 = vmatmul.bf16.gmra.mxu1 %v7894_v6 }
 0x299   : > { %v2330_v0 = vadd.f32 %v2329_v55, %v2281_v58 }
 0x29b   : > { %v2512_v38 = vmax.f32 %v2330_v0, 0.0  ;;  %v2368_v9 = vpop.f32.mrf.mxu3 }
 0x29c   : > { %v2241_v44 = vpop.f32.mrf.mxu0 }
 0x29d   : > { %v8101_v3 = vpack.c.bf16 %v2512_v38, %v2510_v12  ;;  %v2290_v57 = vpop.f32.mrf.mxu1  ;;  %v2242_v51 = vadd.f32 %v2241_v44, %v7971_v47  ;;  %v2362_v44 = vadd.f32 %v2361_v18, %v8120_v5 }
 0x29f   : > { %2768 = vmatmul.bf16.gmra.mxu2 %v8101_v3  ;;  %v2291_v27 = vadd.f32 %v2290_v57, %v2242_v51  ;;  %v6220_v51 = vld [vmem:[%s9225_s8 + $0x68] sm:$0xff] }
 0x2a0   : > { %v2332_v6 = vpop.f32.mrf.mxu2  ;;  %3167 = vmatpush.bf16.msrb.mxu3 %v6220_v51 }
 0x2a1   : > { %v2333_v45 = vadd.f32 %v2332_v6, %v2284_v17 }
 0x2a3   : > { %v2514_v28 = vmax.f32 %v2333_v45, 0.0 }
 0x2a4   : > { %v2244_v34 = vpop.f32.mrf.mxu0 }
 0x2a5   : > { %v2293_v10 = vpop.f32.mrf.mxu1 }
 0x2a7   : > { %2439 = vmatmul.bf16.gmra.mxu0 %v7749_v39  ;;  %v2289_v39 = vadd.f32 %v2288_v14, %v2240_v48  ;;  %v2245_v14 = vadd.f32 %v2244_v34, %v7971_v47  ;;  %v6212_v48 = vld [vmem:[%s9225_s8 + $0x28] sm:$0xff] }
 0x2a8   : > { %v2334_v46 = vpop.f32.mrf.mxu2  ;;  %2488 = vmatmul.bf16.gmra.mxu1 %v7942_v24 }
 0x2a9   : > { %v2335_v19 = vadd.f32 %v2334_v46, %v2286_v43  ;;  %v2294_v62 = vadd.f32 %v2293_v10, %v2245_v14  ;;  %v2371_v43 = vpop.f32.mrf.mxu3 }
 0x2ab   : > { %v2516_v31 = vmax.f32 %v2335_v19, 0.0 }
 0x2ac   : > { %v2246_v32 = vpop.f32.mrf.mxu0 }
 0x2ad   : > { %v8114_v33 = vpack.c.bf16 %v2516_v31, %v2514_v28  ;;  %v2295_v40 = vpop.f32.mrf.mxu1  ;;  %v2247_v55 = vadd.f32 %v2246_v32, %v7971_v47  ;;  %v6213_v47 = vld [vmem:[%s9225_s8 + $0x30] sm:$0xff] }
 0x2ae   : > { %3117 = vmatpush.bf16.msrb.mxu2 %v6213_v47 }
 0x2af   : > { %2773 = vmatmul.bf16.gmra.mxu2 %v8114_v33  ;;  %v2296_v1 = vadd.f32 %v2295_v40, %v2247_v55  ;;  %v2367_v40 = vadd.f32 %v2366_v11, %v8120_v5  ;;  %v2372_v11 = vadd.f32 %v2371_v43, %v8120_v5 }
 0x2b0   : > { %v2337_v20 = vpop.f32.mrf.mxu2 }
 0x2b1   : > { %v2338_v22 = vadd.f32 %v2337_v20, %v2289_v39  ;;  %v2373_v20 = vpop.f32.mrf.mxu3  ;;  %v2369_v39 = vadd.f32 %v2368_v9, %v8120_v5 }
 0x2b2   : > { %3118 = vmatpush.bf16.msrb.mxu2 %v6212_v48 }
 0x2b3   : > { %v2518_v29 = vmax.f32 %v2338_v22, 0.0 }
 0x2b4   : > { %v2405_v25 = vpop.f32.mrf.mxu0 }
 0x2b5   : > { %v2454_v24 = vpop.f32.mrf.mxu1  ;;  %v2406_v63 = vadd.f32 %v2405_v25, %v2357_v56 }
 0x2b7   : > { %2846 = vmatmul.bf16.vlgmr.msrb.gmra.mxu0 %v7995_v42  ;;  %v2455_v42 = vadd.f32 %v2454_v24, %v2406_v63 }
 0x2b8   : > { %v2339_v52 = vpop.f32.mrf.mxu2 }
 0x2b9   : > { %v2340_v23 = vadd.f32 %v2339_v52, %v2291_v27  ;;  %v2495_v58 = vmax.f32 %v2455_v42, 0.0 }
 0x2bb   : > { %v2520_v37 = vmax.f32 %v2340_v23, 0.0  ;;  %v2376_v23 = vpop.f32.mrf.mxu3 }
 0x2bc   : > { %v2407_v2 = vpop.f32.mrf.mxu0 }
 0x2bd   : > { %v8131_v36 = vpack.c.bf16 %v2520_v37, %v2518_v29  ;;  %v2408_v15 = vadd.f32 %v2407_v2, %v2359_v54  ;;  %v2456_v26 = vpop.f32.mrf.mxu1  ;;  %v6211_v37 = vld [vmem:[%s9225_s8 + $0x20] sm:$0xff]  ;;  %v2374_v2 = vadd.f32 %v2373_v20, %v8120_v5 }
 0x2be   : > { %v6219_v54 = vld [vmem:[%s9225_s8 + $0x60] sm:$0xff]  ;;  %3119 = vmatpush.bf16.msrb.mxu2 %v6211_v37 }
 0x2bf   : > { %2778 = vmatmul.bf16.gmra.mxu2 %v8131_v36  ;;  %v2457_v50 = vadd.f32 %v2456_v26, %v2408_v15  ;;  %3168 = vmatpush.bf16.msrb.mxu3 %v6219_v54 }
 0x2c0   : > { %v2342_v8 = vpop.f32.mrf.mxu2 }
 0x2c1   : > { %v2497_v60 = vmax.f32 %v2457_v50, 0.0  ;;  %v2343_v49 = vadd.f32 %v2342_v8, %v2294_v62  ;;  %v2377_v62 = vadd.f32 %v2376_v23, %v8120_v5 }
 0x2c3   : > { %v2527_v0 = vpack.c.bf16 %v2497_v60, %v2495_v58  ;;  %v2522_v30 = vmax.f32 %v2343_v49, 0.0  ;;  %v2378_v42 = vpop.f32.mrf.mxu3 }
 0x2c4   : > { %v2410_v12 = vpop.f32.mrf.mxu0  ;;  %v2379_v49 = vadd.f32 %v2378_v42, %v8120_v5 }
 0x2c5   : > { %v2459_v38 = vpop.f32.mrf.mxu1  ;;  %2797 = vmatmul.bf16.vlgmr.msra.gmra.mxu3 %v2527_v0  ;;  %2895 = vmatmul.bf16.vlgmr.msrb.gmra.mxu1 %v2527_v0  ;;  %v2411_v53 = vadd.f32 %v2410_v12, %v2362_v44 }
 0x2c7   : > { %2851 = vmatmul.bf16.gmra.mxu0 %v8020_v4  ;;  %v2460_v4 = vadd.f32 %v2459_v38, %v2411_v53  ;;  %v6210_v38 = vld [vmem:[%s9225_s8 + $0x18] sm:$0xff] }
 0x2c8   : > { %v2344_v57 = vpop.f32.mrf.mxu2  ;;  %3120 = vmatpush.bf16.msrb.mxu2 %v6210_v38 }
 0x2c9   : > { %v2345_v6 = vadd.f32 %v2344_v57, %v2296_v1  ;;  %v2499_v46 = vmax.f32 %v2460_v4, 0.0  ;;  %v6218_v1 = vld [vmem:[%s9225_s8 + $0x58] sm:$0xff] }
 0x2ca   : > { %3169 = vmatpush.bf16.msrb.mxu3 %v6218_v1 }
 0x2cb   : > { %v2524_v16 = vmax.f32 %v2345_v6, 0.0  ;;  %v2381_v9 = vpop.f32.mrf.mxu3 }
 0x2cc   : > { %v2412_v17 = vpop.f32.mrf.mxu0  ;;  %v2382_v4 = vadd.f32 %v2381_v9, %v8120_v5 }
 0x2cd   : > { %v8145_v34 = vpack.c.bf16 %v2524_v16, %v2522_v30  ;;  %v2413_v10 = vadd.f32 %v2412_v17, %v2364_v13  ;;  %v2461_v18 = vpop.f32.mrf.mxu1 }
 0x2cf   : > { %2783 = vmatmul.bf16.gmra.mxu2 %v8145_v34  ;;  %v2462_v45 = vadd.f32 %v2461_v18, %v2413_v10  ;;  %v6209_v18 = vld [vmem:[%s9225_s8 + $0x10] sm:$0xff] }
 0x2d0   : > { %3121 = vmatpush.bf16.msrb.mxu2 %v6209_v18 }
 0x2d1   : > { %v2501_v19 = vmax.f32 %v2462_v45, 0.0  ;;  %v6217_v45 = vld [vmem:[%s9225_s8 + $0x50] sm:$0xff] }
 0x2d2   : > { %3170 = vmatpush.bf16.msrb.mxu3 %v6217_v45  ;;  %v6230_v45 = vld [vmem:[%s9227_s10 + $0x38] sm:$0xff] }
 0x2d3   : > { %v2529_v28 = vpack.c.bf16 %v2501_v19, %v2499_v46  ;;  %v2383_v30 = vpop.f32.mrf.mxu3  ;;  %3306 = vmatpush.bf16.msra.mxu0 %v6230_v45 }
 0x2d4   : > { %v2415_v31 = vpop.f32.mrf.mxu0  ;;  %v2384_v46 = vadd.f32 %v2383_v30, %v8120_v5 }
 0x2d5   : > { %v2464_v32 = vpop.f32.mrf.mxu1  ;;  %2802 = vmatmul.bf16.gmra.mxu3 %v2529_v28  ;;  %2900 = vmatmul.bf16.gmra.mxu1 %v2529_v28  ;;  %v2416_v41 = vadd.f32 %v2415_v31, %v2367_v40 }
 0x2d7   : > { %2856 = vmatmul.bf16.gmra.mxu0 %v8045_v21  ;;  %v2465_v24 = vadd.f32 %v2464_v32, %v2416_v41 }
 0x2d9   : > { %v2503_v21 = vmax.f32 %v2465_v24, 0.0 }
 0x2db   : > { %v2386_v43 = vpop.f32.mrf.mxu3 }
 0x2dc   : > { %v2417_v25 = vpop.f32.mrf.mxu0  ;;  %v2387_v24 = vadd.f32 %v2386_v43, %v8120_v5 }
 0x2dd   : > { %v2418_v27 = vadd.f32 %v2417_v25, %v2369_v39  ;;  %v2466_v22 = vpop.f32.mrf.mxu1  ;;  %v6208_v25 = vld [vmem:[%s9225_s8 + $0x8] sm:$0xff] }
 0x2de   : > { %3122 = vmatpush.bf16.msrb.mxu2 %v6208_v25 }
 0x2df   : > { %v2467_v56 = vadd.f32 %v2466_v22, %v2418_v27  ;;  %v6216_v22 = vld [vmem:[%s9225_s8 + $0x48] sm:$0xff] }
 0x2e0   : > { %3171 = vmatpush.bf16.msrb.mxu3 %v6216_v22 }
 0x2e1   : > { %v2505_v52 = vmax.f32 %v2467_v56, 0.0 }
 0x2e2   : > { %v2749_v42 = vpop.f32.mrf.mxu2 }
 0x2e3   : > { %v2531_v63 = vpack.c.bf16 %v2505_v52, %v2503_v21  ;;  %v2388_v48 = vpop.f32.mrf.mxu3 }
 0x2e4   : > { %v2420_v35 = vpop.f32.mrf.mxu0  ;;  %v2389_v56 = vadd.f32 %v2388_v48, %v8120_v5 }
 0x2e5   : > { %v2469_v7 = vpop.f32.mrf.mxu1  ;;  %2807 = vmatmul.bf16.gmra.mxu3 %v2531_v63  ;;  %2905 = vmatmul.bf16.gmra.mxu1 %v2531_v63  ;;  %v2421_v29 = vadd.f32 %v2420_v35, %v2372_v11 }
 0x2e7   : > { %2861 = vmatmul.bf16.gmra.mxu0 %v8070_v61  ;;  %v2470_v26 = vadd.f32 %v2469_v7, %v2421_v29 }
 0x2e9   : > { %v2507_v61 = vmax.f32 %v2470_v26, 0.0 }
 0x2ea   : > { %v2751_v9 = vpop.f32.mrf.mxu2 }
 0x2eb   : > { %v2391_v35 = vpop.f32.mrf.mxu3 }
 0x2ec   : > { %v2422_v15 = vpop.f32.mrf.mxu0 }
 0x2ed   : > { %v2423_v50 = vadd.f32 %v2422_v15, %v2374_v2  ;;  %v2471_v8 = vpop.f32.mrf.mxu1  ;;  %v6207_v2 = vld [vmem:[%s9225_s8] sm:$0xff]  ;;  %v2392_v15 = vadd.f32 %v2391_v35, %v8120_v5 }
 0x2ee   : > { %3123 = vmatpush.bf16.msrb.mxu2 %v6207_v2 }
 0x2ef   : > { %v2472_v14 = vadd.f32 %v2471_v8, %v2423_v50 }
 0x2f1   : > { %v2509_v58 = vmax.f32 %v2472_v14, 0.0  ;;  %v6215_v14 = vld [vmem:[%s9225_s8 + $0x40] sm:$0xff] }
 0x2f2   : > { %3172 = vmatpush.bf16.msrb.mxu3 %v6215_v14  ;;  %v2754_v1 = vpop.f32.mrf.mxu2 }
 0x2f3   : > { %v2533_v60 = vpack.c.bf16 %v2509_v58, %v2507_v61  ;;  %v2393_v26 = vpop.f32.mrf.mxu3 }
 0x2f4   : > { %v2425_v55 = vpop.f32.mrf.mxu0  ;;  %v2394_v8 = vadd.f32 %v2393_v26, %v8120_v5  ;;  %v2574_v5 = vld [vmem:[%s9224_s7] sm:$0x3] }
 0x2f5   : > { %v2474_v0 = vpop.f32.mrf.mxu1  ;;  %2812 = vmatmul.bf16.gmra.mxu3 %v2533_v60  ;;  %2910 = vmatmul.bf16.gmra.mxu1 %v2533_v60  ;;  %v2426_v12 = vadd.f32 %v2425_v55, %v2377_v62 }
 0x2f6   : > { %6233 = vmatpush.bf16.msra.mxu3 %v6230_v45 }
 0x2f7   : > { %2866 = vmatmul.bf16.gmra.mxu0 %v8101_v3  ;;  %v2475_v57 = vadd.f32 %v2474_v0, %v2426_v12 }
 0x2f9   : > { %v2511_v3 = vmax.f32 %v2475_v57, 0.0  ;;  %v8205_v57 = vperm.slane %v2574_v5, 1 }
 0x2fc   : > { %v2427_v44 = vpop.f32.mrf.mxu0 }
 0x2fd   : > { %v2428_v6 = vadd.f32 %v2427_v44, %v2379_v49  ;;  %v2476_v53 = vpop.f32.mrf.mxu1 }
 0x2ff   : > { %v2477_v47 = vadd.f32 %v2476_v53, %v2428_v6  ;;  %v2756_v6 = vpop.f32.mrf.mxu2 }
 0x301   : > { %v2513_v16 = vmax.f32 %v2477_v47, 0.0 }
 0x303   : > { %v2535_v59 = vpack.c.bf16 %v2513_v16, %v2511_v3  ;;  %v8208_v3 = vperm.slane %v2574_v5, 0 }
 0x304   : > { %v2430_v13 = vpop.f32.mrf.mxu0 }
 0x305   : > { %v2479_v17 = vpop.f32.mrf.mxu1  ;;  %2817 = vmatmul.bf16.gmra.mxu3 %v2535_v59  ;;  %2915 = vmatmul.bf16.gmra.mxu1 %v2535_v59  ;;  %v2431_v10 = vadd.f32 %v2430_v13, %v2382_v4 }
 0x307   : > { %2871 = vmatmul.bf16.gmra.mxu0 %v8114_v33  ;;  %v2480_v28 = vadd.f32 %v2479_v17, %v2431_v10  ;;  %v2750_v10 = vadd.f32 %v2749_v42, %v8208_v3 }
 0x309   : > { %v2515_v33 = vmax.f32 %v2480_v28, 0.0 }
 0x30c   : > { %v2432_v19 = vpop.f32.mrf.mxu0 }
 0x30d   : > { %v2433_v31 = vadd.f32 %v2432_v19, %v2384_v46  ;;  %v2481_v32 = vpop.f32.mrf.mxu1  ;;  %v2759_v46 = vpop.f32.mrf.mxu2  ;;  %v2752_v19 = vadd.f32 %v2751_v9, %v8208_v3 }
 0x30f   : > { %v2482_v40 = vadd.f32 %v2481_v32, %v2433_v31 }
 0x311   : > { %v2517_v20 = vmax.f32 %v2482_v40, 0.0 }
 0x313   : > { %v2537_v41 = vpack.c.bf16 %v2517_v20, %v2515_v33 }
 0x314   : > { %v2435_v51 = vpop.f32.mrf.mxu0 }
 0x315   : > { %v2484_v39 = vpop.f32.mrf.mxu1  ;;  %2822 = vmatmul.bf16.gmra.mxu3 %v2537_v41  ;;  %2920 = vmatmul.bf16.gmra.mxu1 %v2537_v41  ;;  %v2436_v27 = vadd.f32 %v2435_v51, %v2387_v24  ;;  %v2761_v25 = vpop.f32.mrf.mxu2 }
 0x317   : > { %2876 = vmatmul.bf16.gmra.mxu0 %v8131_v36  ;;  %v2485_v52 = vadd.f32 %v2484_v39, %v2436_v27 }
 0x319   : > { %v2519_v11 = vmax.f32 %v2485_v52, 0.0 }
 0x31c   : > { %v2437_v21 = vpop.f32.mrf.mxu0 }
 0x31d   : > { %v2438_v23 = vadd.f32 %v2437_v21, %v2389_v56  ;;  %v2486_v63 = vpop.f32.mrf.mxu1  ;;  %v2764_v2 = vpop.f32.mrf.mxu2 }
 0x31f   : > { %v2487_v7 = vadd.f32 %v2486_v63, %v2438_v23  ;;  %v2755_v23 = vadd.f32 %v2754_v1, %v8208_v3  ;;  %v2762_v1 = vadd.f32 %v2761_v25, %v8208_v3 }
 0x321   : > { %v2521_v29 = vmax.f32 %v2487_v7, 0.0  ;;  %v2757_v7 = vadd.f32 %v2756_v6, %v8208_v3 }
 0x323   : > { %v2539_v37 = vpack.c.bf16 %v2521_v29, %v2519_v11 }
 0x324   : > { %v2440_v54 = vpop.f32.mrf.mxu0 }
 0x325   : > { %v2489_v36 = vpop.f32.mrf.mxu1  ;;  %2827 = vmatmul.bf16.gmra.mxu3 %v2539_v37  ;;  %2925 = vmatmul.bf16.gmra.mxu1 %v2539_v37  ;;  %v2441_v50 = vadd.f32 %v2440_v54, %v2392_v15  ;;  %v6229_v37 = vld [vmem:[%s9227_s10 + $0x30] sm:$0xff]  ;;  %v2766_v9 = vpop.f32.mrf.mxu2 }
 0x326   : > { %3307 = vmatpush.bf16.msra.mxu0 %v6229_v37  ;;  %6234 = vmatpush.bf16.msra.mxu3 %v6229_v37 }
 0x327   : > { %2881 = vmatmul.bf16.gmra.mxu0 %v8145_v34  ;;  %v2490_v58 = vadd.f32 %v2489_v36, %v2441_v50 }
 0x329   : > { %v2523_v62 = vmax.f32 %v2490_v58, 0.0 }
 0x32c   : > { %v2442_v61 = vpop.f32.mrf.mxu0 }
 0x32d   : > { %v2443_v60 = vadd.f32 %v2442_v61, %v2394_v8  ;;  %v2491_v55 = vpop.f32.mrf.mxu1 }
 0x32f   : > { %v2492_v0 = vadd.f32 %v2491_v55, %v2443_v60 }
 0x331   : > { %v2525_v12 = vmax.f32 %v2492_v0, 0.0 }
 0x333   : > { %v2541_v38 = vpack.c.bf16 %v2525_v12, %v2523_v62  ;;  %v2760_v12 = vadd.f32 %v2759_v46, %v8208_v3 }
 0x334   : > { %v2847_v34 = vpop.f32.mrf.mxu0 }
 0x335   : > { %2832 = vmatmul.bf16.gmra.mxu3 %v2541_v38  ;;  %2930 = vmatmul.bf16.gmra.mxu1 %v2541_v38  ;;  %v2848_v47 = vadd.f32 %v2847_v34, %v8205_v57 }
 0x33c   : > { %v2849_v49 = vpop.f32.mrf.mxu0 }
 0x33d   : > { %v2850_v16 = vadd.f32 %v2849_v49, %v8205_v57 }
 0x342   : > { %v2896_v44 = vpop.f32.mrf.mxu1 }
 0x343   : > { %v2897_v59 = vadd.f32 %v2896_v44, %v2848_v47  ;;  %v6228_v44 = vld [vmem:[%s9227_s10 + $0x28] sm:$0xff] }
 0x344   : > { %v2852_v53 = vpop.f32.mrf.mxu0  ;;  %3308 = vmatpush.bf16.msra.mxu0 %v6228_v44  ;;  %6235 = vmatpush.bf16.msra.mxu3 %v6228_v44 }
 0x345   : > { %v2937_v18 = vmax.f32 %v2897_v59, 0.0  ;;  %v2853_v39 = vadd.f32 %v2852_v53, %v8205_v57 }
 0x348   : > { %v2798_v30 = vpop.f32.mrf.mxu3 }
 0x349   : > { %v2799_v28 = vadd.f32 %v2798_v30, %v2750_v10 }
 0x34a   : > { %v2898_v13 = vpop.f32.mrf.mxu1 }
 0x34b   : > { %v2899_v17 = vadd.f32 %v2898_v13, %v2850_v16  ;;  %v2936_v20 = vmax.f32 %v2799_v28, 0.0  ;;  %v2765_v28 = vadd.f32 %v2764_v2, %v8208_v3 }
 0x34c   : > { %v2854_v4 = vpop.f32.mrf.mxu0 }
 0x34d   : > { %v2939_v43 = vmax.f32 %v2899_v17, 0.0  ;;  %v2855_v27 = vadd.f32 %v2854_v4, %v8205_v57  ;;  %v2769_v17 = vpop.f32.mrf.mxu2 }
 0x34f   : > { %v2969_v31 = vpack.c.bf16 %v2939_v43, %v2937_v18 }
 0x350   : > { %v2800_v32 = vpop.f32.mrf.mxu3 }
 0x351   : > { %v2801_v40 = vadd.f32 %v2800_v32, %v2752_v19  ;;  %3173 = vmatmul.bf16.vlgmr.msrb.gmra.mxu3 %v2969_v31 }
 0x352   : > { %v2901_v33 = vpop.f32.mrf.mxu1 }
 0x353   : > { %v2938_v41 = vmax.f32 %v2801_v40, 0.0  ;;  %v2902_v22 = vadd.f32 %v2901_v33, %v2853_v39  ;;  %v2767_v40 = vadd.f32 %v2766_v9, %v8208_v3 }
 0x354   : > { %v2857_v48 = vpop.f32.mrf.mxu0 }
 0x355   : > { %v2968_v51 = vpack.c.bf16 %v2938_v41, %v2936_v20  ;;  %v2941_v63 = vmax.f32 %v2902_v22, 0.0  ;;  %v2858_v14 = vadd.f32 %v2857_v48, %v8205_v57  ;;  %v6227_v41 = vld [vmem:[%s9227_s10 + $0x20] sm:$0xff]  ;;  %v2771_v48 = vpop.f32.mrf.mxu2 }
 0x356   : > { %3309 = vmatpush.bf16.msra.mxu0 %v6227_v41  ;;  %6236 = vmatpush.bf16.msra.mxu3 %v6227_v41  ;;  %v2772_v2 = vadd.f32 %v2771_v48, %v8208_v3 }
 0x357   : > { %3124 = vmatmul.bf16.vlgmr.msrb.gmra.mxu2 %v2968_v51 }
 0x358   : > { %v2803_v24 = vpop.f32.mrf.mxu3 }
 0x359   : > { %v2804_v11 = vadd.f32 %v2803_v24, %v2755_v23 }
 0x35a   : > { %v2903_v56 = vpop.f32.mrf.mxu1 }
 0x35b   : > { %v2904_v21 = vadd.f32 %v2903_v56, %v2855_v27  ;;  %v2940_v15 = vmax.f32 %v2804_v11, 0.0 }
 0x35c   : > { %v2859_v52 = vpop.f32.mrf.mxu0 }
 0x35d   : > { %v2943_v35 = vmax.f32 %v2904_v21, 0.0  ;;  %v2860_v58 = vadd.f32 %v2859_v52, %v8205_v57 }
 0x35f   : > { %v2971_v29 = vpack.c.bf16 %v2943_v35, %v2941_v63  ;;  %v2774_v35 = vpop.f32.mrf.mxu2 }
 0x360   : > { %v2805_v54 = vpop.f32.mrf.mxu3 }
 0x361   : > { %v2806_v36 = vadd.f32 %v2805_v54, %v2757_v7  ;;  %3178 = vmatmul.bf16.gmra.mxu3 %v2971_v29  ;;  %v2770_v29 = vadd.f32 %v2769_v17, %v8208_v3 }
 0x362   : > { %v2906_v42 = vpop.f32.mrf.mxu1 }
 0x363   : > { %v2942_v26 = vmax.f32 %v2806_v36, 0.0  ;;  %v2907_v60 = vadd.f32 %v2906_v42, %v2858_v14 }
 0x364   : > { %v2862_v50 = vpop.f32.mrf.mxu0 }
 0x365   : > { %v2970_v8 = vpack.c.bf16 %v2942_v26, %v2940_v15  ;;  %v2945_v38 = vmax.f32 %v2907_v60, 0.0  ;;  %v2863_v4 = vadd.f32 %v2862_v50, %v8205_v57  ;;  %v6226_v26 = vld [vmem:[%s9227_s10 + $0x18] sm:$0xff] }
 0x366   : > { %3310 = vmatpush.bf16.msra.mxu0 %v6226_v26  ;;  %6237 = vmatpush.bf16.msra.mxu3 %v6226_v26 }
 0x367   : > { %3129 = vmatmul.bf16.gmra.mxu2 %v2970_v8  ;;  %v2776_v60 = vpop.f32.mrf.mxu2 }
 0x368   : > { %v2808_v61 = vpop.f32.mrf.mxu3 }
 0x369   : > { %v2809_v49 = vadd.f32 %v2808_v61, %v2760_v12 }
 0x36a   : > { %v2908_v55 = vpop.f32.mrf.mxu1 }
 0x36b   : > { %v2909_v0 = vadd.f32 %v2908_v55, %v2860_v58  ;;  %v2944_v30 = vmax.f32 %v2809_v49, 0.0  ;;  %v2775_v49 = vadd.f32 %v2774_v35, %v8208_v3 }
 0x36c   : > { %v2864_v62 = vpop.f32.mrf.mxu0 }
 0x36d   : > { %v2947_v34 = vmax.f32 %v2909_v0, 0.0  ;;  %v2865_v18 = vadd.f32 %v2864_v62, %v8205_v57 }
 0x36f   : > { %v2973_v5 = vpack.c.bf16 %v2947_v34, %v2945_v38 }
 0x370   : > { %v2810_v6 = vpop.f32.mrf.mxu3 }
 0x371   : > { %v2811_v53 = vadd.f32 %v2810_v6, %v2762_v1  ;;  %3183 = vmatmul.bf16.gmra.mxu3 %v2973_v5  ;;  %v2779_v6 = vpop.f32.mrf.mxu2 }
 0x372   : > { %v2911_v47 = vpop.f32.mrf.mxu1  ;;  %v2780_v35 = vadd.f32 %v2779_v6, %v8208_v3 }
 0x373   : > { %v2946_v16 = vmax.f32 %v2811_v53, 0.0  ;;  %v2912_v43 = vadd.f32 %v2911_v47, %v2863_v4  ;;  %v2777_v53 = vadd.f32 %v2776_v60, %v8208_v3 }
 0x374   : > { %v2867_v59 = vpop.f32.mrf.mxu0 }
 0x375   : > { %v2972_v13 = vpack.c.bf16 %v2946_v16, %v2944_v30  ;;  %v2949_v31 = vmax.f32 %v2912_v43, 0.0  ;;  %v2868_v21 = vadd.f32 %v2867_v59, %v8205_v57  ;;  %v6225_v16 = vld [vmem:[%s9227_s10 + $0x10] sm:$0xff] }
 0x376   : > { %3311 = vmatpush.bf16.msra.mxu0 %v6225_v16  ;;  %6238 = vmatpush.bf16.msra.mxu3 %v6225_v16 }
 0x377   : > { %3134 = vmatmul.bf16.gmra.mxu2 %v2972_v13  ;;  %v8261_v13 = vld [vmem:[%s8254_s22 + $0x8] sm:$0xff] }
 0x378   : > { %v2813_v10 = vpop.f32.mrf.mxu3  ;;  %v4175_v4 = vmul.f32 %v8261_v13, %v8261_v13 }
 0x379   : > { %v2814_v33 = vadd.f32 %v2813_v10, %v2765_v28 }
 0x37a   : > { %v2913_v45 = vpop.f32.mrf.mxu1 }
 0x37b   : > { %v2914_v46 = vadd.f32 %v2913_v45, %v2865_v18  ;;  %v2948_v24 = vmax.f32 %v2814_v33, 0.0  ;;  %v2781_v33 = vpop.f32.mrf.mxu2 }
 0x37c   : > { %v2869_v19 = vpop.f32.mrf.mxu0 }
 0x37d   : > { %v2951_v32 = vmax.f32 %v2914_v46, 0.0  ;;  %v2870_v23 = vadd.f32 %v2869_v19, %v8205_v57  ;;  %v4193_v46 = vsel %vm4149_vm0, %v4175_v4, 0.0 }
 0x37e   : > { %4194 = vadd.xlane.f32.xlu1 %v4193_v46 }
 0x37f   : > { %v2975_v20 = vpack.c.bf16 %v2951_v32, %v2949_v31  ;;  %v8268_v31 = vld [vmem:[%s8254_s22 + $0x18] sm:$0xff]  ;;  %v6224_v32 = vld [vmem:[%s9227_s10 + $0x8] sm:$0xff] }
 0x380   : > { %v2815_v51 = vpop.f32.mrf.mxu3  ;;  %v4177_v41 = vmul.f32 %v8268_v31, %v8268_v31  ;;  %3675 = vmatpush.msra.mxu1 %v8268_v31  ;;  %3312 = vmatpush.bf16.msra.mxu0 %v6224_v32 }
 0x381   : > { %v2816_v39 = vadd.f32 %v2815_v51, %v2767_v40  ;;  %3188 = vmatmul.bf16.gmra.mxu3 %v2975_v20  ;;  %v8274_v40 = vld [vmem:[%s8254_s22 + $0x30] sm:$0xff]  ;;  %v8281_v51 = vld [vmem:[%s8254_s22] sm:$0xff] }
 0x382   : > { %v2916_v25 = vpop.f32.mrf.mxu1  ;;  %v4180_v48 = vmul.f32 %v8274_v40, %v8274_v40  ;;  %6239 = vmatpush.bf16.msra.mxu3 %v6224_v32 }
 0x383   : > { %v2950_v27 = vmax.f32 %v2816_v39, 0.0  ;;  %v2917_v63 = vadd.f32 %v2916_v25, %v2868_v21  ;;  %v8290_v21 = vld [vmem:[%s8254_s22 + $0x28] sm:$0xff]  ;;  %v2784_v26 = vpop.f32.mrf.mxu2 }
 0x384   : > { %v2872_v22 = vpop.f32.mrf.mxu0 }
 0x385   : > { %v2974_v56 = vpack.c.bf16 %v2950_v27, %v2948_v24  ;;  %v2953_v37 = vmax.f32 %v2917_v63, 0.0  ;;  %v2873_v0 = vadd.f32 %v2872_v22, %v8205_v57  ;;  %v4174_v24 = vmul.f32 %v8281_v51, %v8281_v51 }
 0x386   : > { %v4199_v22 = vsel %vm4149_vm0, %v4177_v41, 0.0 }
 0x387   : > { %3139 = vmatmul.bf16.gmra.mxu2 %v2974_v56  ;;  %v4208_v56 = vsel %vm4149_vm0, %v4180_v48, 0.0  ;;  %4200 = vadd.xlane.f32.xlu1 %v4199_v22 }
 0x388   : > { %v2818_v52 = vpop.f32.mrf.mxu3  ;;  %4209 = vadd.xlane.f32.xlu0 %v4208_v56  ;;  %v8351_v56 = vld [vmem:[%s8254_s22 + $0x70] sm:$0xff] }
 0x389   : > { %v2819_v42 = vadd.f32 %v2818_v52, %v2770_v29  ;;  %v4179_v29 = vmul.f32 %v8290_v21, %v8290_v21 }
 0x38a   : > { %v2918_v7 = vpop.f32.mrf.mxu1 }
 0x38b   : > { %v2919_v11 = vadd.f32 %v2918_v7, %v2870_v23  ;;  %v2952_v61 = vmax.f32 %v2819_v42, 0.0  ;;  %v4190_v23 = vsel %vm4149_vm0, %v4174_v24, 0.0 }
 0x38c   : > { %v2874_v36 = vpop.f32.mrf.mxu0  ;;  %4191 = vadd.xlane.f32.xlu2 %v4190_v23  ;;  %v8357_v23 = vld [vmem:[%s8254_s22 + $0x38] sm:$0xff] }
 0x38d   : > { %v2955_v54 = vmax.f32 %v2919_v11, 0.0  ;;  %v2875_v12 = vadd.f32 %v2874_v36, %v8205_v57  ;;  %3704 = vmatpush.msra.mxu2 %v8357_v23 }
 0x38f   : > { %v2977_v15 = vpack.c.bf16 %v2955_v54, %v2953_v37  ;;  %v2782_v37 = vadd.f32 %v2781_v33, %v8208_v3  ;;  %3705 = vmatpush.msra.mxu2 %v8274_v40 }
 0x390   : > { %v2820_v50 = vpop.f32.mrf.mxu3 }
 0x391   : > { %v2821_v8 = vadd.f32 %v2820_v50, %v2772_v2  ;;  %3193 = vmatmul.bf16.gmra.mxu3 %v2977_v15  ;;  %v4205_v15 = vsel %vm4149_vm0, %v4179_v29, 0.0  ;;  %3706 = vmatpush.msra.mxu2 %v8290_v21  ;;  %v8370_v29 = vld [vmem:[%s8254_s22 + $0x50] sm:$0xff] }
 0x392   : > { %v2921_v14 = vpop.f32.mrf.mxu1  ;;  %4206 = vadd.xlane.f32.xlu1 %v4205_v15  ;;  %v6381_v15 = vld [vmem:[%s6835_s30 + $0x20] sm:$0xff] }
 0x393   : > { %v2954_v58 = vmax.f32 %v2821_v8, 0.0  ;;  %v2922_v38 = vadd.f32 %v2921_v14, %v2873_v0 }
 0x394   : > { %v2877_v9 = vpop.f32.mrf.mxu0 }
 0x395   : > { %v2976_v55 = vpack.c.bf16 %v2954_v58, %v2952_v61  ;;  %v2957_v5 = vmax.f32 %v2922_v38, 0.0  ;;  %v2878_v28 = vadd.f32 %v2877_v9, %v8205_v57  ;;  %v8299_v61 = vld [vmem:[%s8254_s22 + $0x48] sm:$0xff]  ;;  %v8302_v58 = vld [vmem:[%s8254_s22 + $0x40] sm:$0xff] }
 0x396   : > { %v4182_v0 = vmul.f32 %v8302_v58, %v8302_v58 }
 0x397   : > { %3144 = vmatmul.bf16.gmra.mxu2 %v2976_v55  ;;  %v4183_v55 = vmul.f32 %v8299_v61, %v8299_v61 }
 0x398   : > { %v2823_v62 = vpop.f32.mrf.mxu3 }
 0x399   : > { %v2824_v47 = vadd.f32 %v2823_v62, %v2775_v49  ;;  %v4214_v49 = vsel %vm4149_vm0, %v4182_v0, 0.0 }
 0x39a   : > { %v2923_v34 = vpop.f32.mrf.mxu1  ;;  %4215 = vadd.xlane.f32.xlu1 %v4214_v49 }
 0x39b   : > { %v2924_v1 = vadd.f32 %v2923_v34, %v2875_v12  ;;  %v2956_v43 = vmax.f32 %v2824_v47, 0.0  ;;  %v4217_v12 = vsel %vm4149_vm0, %v4183_v55, 0.0  ;;  %v2786_v47 = vpop.f32.mrf.mxu2 }
 0x39c   : > { %v2879_v10 = vpop.f32.mrf.mxu0  ;;  %4218 = vadd.xlane.f32.xlu0 %v4217_v12 }
 0x39d   : > { %v2959_v44 = vmax.f32 %v2924_v1, 0.0  ;;  %v2880_v39 = vadd.f32 %v2879_v10, %v8205_v57 }
 0x39f   : > { %v2979_v30 = vpack.c.bf16 %v2959_v44, %v2957_v5  ;;  %v8313_v5 = vld [vmem:[%s8254_s22 + $0x10] sm:$0xff] }
 0x3a0   : > { %v2825_v59 = vpop.f32.mrf.mxu3  ;;  %v4176_v6 = vmul.f32 %v8313_v5, %v8313_v5  ;;  %3676 = vmatpush.msra.mxu1 %v8313_v5 }
 0x3a1   : > { %v2826_v17 = vadd.f32 %v2825_v59, %v2777_v53  ;;  %3198 = vmatmul.bf16.gmra.mxu3 %v2979_v30 }
 0x3a2   : > { %v2926_v18 = vpop.f32.mrf.mxu1  ;;  %v4196_v30 = vsel %vm4149_vm0, %v4176_v6, 0.0  ;;  %3677 = vmatpush.msra.mxu1 %v8261_v13 }
 0x3a3   : > { %v2958_v45 = vmax.f32 %v2826_v17, 0.0  ;;  %v2927_v25 = vadd.f32 %v2926_v18, %v2878_v28  ;;  %4197 = vadd.xlane.f32.xlu2 %v4196_v30  ;;  %v2787_v17 = vadd.f32 %v2786_v47, %v8208_v3  ;;  %v6223_v18 = vld [vmem:[%s9227_s10] sm:$0xff] }
 0x3a4   : > { %v2882_v63 = vpop.f32.mrf.mxu0  ;;  %3678 = vmatpush.msra.mxu1 %v8281_v51  ;;  %3313 = vmatpush.bf16.msra.mxu0 %v6223_v18 }
 0x3a5   : > { %v2978_v19 = vpack.c.bf16 %v2958_v45, %v2956_v43  ;;  %v2961_v7 = vmax.f32 %v2927_v25, 0.0  ;;  %v2883_v62 = vadd.f32 %v2882_v63, %v8205_v57  ;;  %v8327_v43 = vld [vmem:[%s8254_s22 + $0x60] sm:$0xff]  ;;  %v8330_v45 = vld [vmem:[%s8254_s22 + $0x58] sm:$0xff]  ;;  %6240 = vmatpush.bf16.msra.mxu3 %v6223_v18 }
 0x3a6   : > { %v4185_v28 = vmul.f32 %v8330_v45, %v8330_v45 }
 0x3a7   : > { %3149 = vmatmul.bf16.gmra.mxu2 %v2978_v19  ;;  %v4186_v19 = vmul.f32 %v8327_v43, %v8327_v43 }
 0x3a8   : > { %v2828_v20 = vpop.f32.mrf.mxu3 }
 0x3a9   : > { %v2829_v54 = vadd.f32 %v2828_v20, %v2780_v35  ;;  %v4226_v33 = vsel %vm4149_vm0, %v4186_v19, 0.0  ;;  %v4223_v20 = vsel %vm4149_vm0, %v4185_v28, 0.0  ;;  %3733 = vmatpush.msrb.mxu3 %v8330_v45  ;;  %v4181_v35 = vmul.f32 %v8357_v23, %v8357_v23 }
 0x3aa   : > { %v2928_v27 = vpop.f32.mrf.mxu1  ;;  %4227 = vadd.xlane.f32.xlu0 %v4226_v33  ;;  %4224 = vadd.xlane.f32.xlu1 %v4223_v20 }
 0x3ab   : > { %v2929_v52 = vadd.f32 %v2928_v27, %v2880_v39  ;;  %v2960_v8 = vmax.f32 %v2829_v54, 0.0  ;;  %v8346_v27 = vld [vmem:[%s8254_s22 + $0x78] sm:$0xff]  ;;  %v4184_v54 = vmul.f32 %v8370_v29, %v8370_v29  ;;  %3734 = vmatpush.msrb.mxu3 %v8370_v29 }
 0x3ac   : > { %v2884_v9 = vpop.f32.mrf.mxu0  ;;  %v4189_v22 = vmul.f32 %v8346_v27, %v8346_v27  ;;  %3762 = vmatpush.msrb.mxu1 %v8346_v27 }
 0x3ad   : > { %v2963_v11 = vmax.f32 %v2929_v52, 0.0  ;;  %v2885_v34 = vadd.f32 %v2884_v9, %v8205_v57  ;;  %v2785_v57 = vadd.f32 %v2784_v26, %v8208_v3  ;;  %v8337_v3 = vld [vmem:[%s8254_s22 + $0x20] sm:$0xff]  ;;  %v4188_v52 = vmul.f32 %v8351_v56, %v8351_v56  ;;  %3735 = vmatpush.msrb.mxu3 %v8299_v61 }
 0x3ae   : > { %v4178_v41 = vmul.f32 %v8337_v3, %v8337_v3  ;;  %v4235_v63 = vsel %vm4149_vm0, %v4189_v22, 0.0  ;;  %3763 = vmatpush.msrb.mxu1 %v8351_v56  ;;  %3707 = vmatpush.msra.mxu2 %v8337_v3  ;;  %v6382_v26 = vld [vmem:[%s6835_s30] sm:$0xff]  ;;  %v6510_v9 = vmov 0  }
 0x3af   : > { %v2981_v36 = vpack.c.bf16 %v2963_v11, %v2961_v7  ;;  %v4232_v7 = vsel %vm4149_vm0, %v4188_v52, 0.0  ;;  %v4211_v11 = vsel %vm4149_vm0, %v4181_v35, 0.0  ;;  %3736 = vmatpush.msrb.mxu3 %v8302_v58  ;;  %6286 = vset.pattern.permute.xlu0 %v6510_v9 }
 0x3b0   : > { %v2830_v2 = vpop.f32.mrf.mxu3  ;;  %v4202_v25 = vsel %vm4149_vm0, %v4178_v41, 0.0  ;;  %6287 = vset.pattern.permute.xlu1 %v6510_v9  ;;  %6288 = vset.pattern.permute.xlu2 %v6510_v9 }
 0x3b1   : > { %v2831_v42 = vadd.f32 %v2830_v2, %v2782_v37  ;;  %3203 = vmatmul.bf16.gmra.mxu3 %v2981_v36  ;;  %4203 = vadd.xlane.f32.xlu2 %v4202_v25  ;;  %v6379_v37 = vld [vmem:[%s6835_s30 + $0x60] sm:$0xff] }
 0x3b2   : > { %v2931_v50 = vpop.f32.mrf.mxu1  ;;  %4236 = vadd.xlane.f32.xlu0 %v4235_v63  ;;  %4233 = vadd.xlane.f32.xlu1 %v4232_v7  ;;  %v6380_v36 = vld [vmem:[%s6835_s30 + $0x40] sm:$0xff] }
 0x3b3   : > { %v2962_v14 = vmax.f32 %v2831_v42, 0.0  ;;  %v2932_v1 = vadd.f32 %v2931_v50, %v2883_v62  ;;  %3785 = vmatpush.msrb.mxu2 %v6379_v37  ;;  %v4220_v42 = vsel %vm4149_vm0, %v4184_v54, 0.0  ;;  %v8383_v50 = vld [vmem:[%s8254_s22 + $0x68] sm:$0xff] }
 0x3b4   : > { %3764 = vmatpush.msrb.mxu1 %v8383_v50 }
 0x3b5   : > { %v2980_v60 = vpack.c.bf16 %v2962_v14, %v2960_v8  ;;  %v2965_v16 = vmax.f32 %v2932_v1, 0.0  ;;  %3786 = vmatpush.msrb.mxu2 %v6380_v36  ;;  %v4187_v14 = vmul.f32 %v8383_v50, %v8383_v50 }
 0x3b6   : > { %3765 = vmatpush.msrb.mxu1 %v8327_v43 }
 0x3b7   : > { %3154 = vmatmul.bf16.gmra.mxu2 %v2980_v60  ;;  %v8391_v60 = vld [vmem:[%s9226_s9] ss:$0 sm:$0xff]  ;;  %v4229_v0 = vsel %vm4149_vm0, %v4187_v14, 0.0 }
 0x3b8   : > { %v2833_v38 = vpop.f32.mrf.mxu3  ;;  %3787 = vmatpush.msrb.mxu2 %v6381_v15 }
 0x3b9   : > { %v2834_v4 = vadd.f32 %v2833_v38, %v2785_v57  ;;  %4212 = vadd.xlane.f32.xlu2 %v4211_v11  ;;  %v6511_v11 = vmov 1  }
 0x3ba   : > { %v2933_v44 = vpop.f32.mrf.mxu1  ;;  %3788 = vmatpush.msrb.mxu2 %v6382_v26 }
 0x3bb   : > { %v2934_v53 = vadd.f32 %v2933_v44, %v2885_v34  ;;  %v2964_v48 = vmax.f32 %v2834_v4, 0.0 }
 0x3bd   : > { %v2967_v59 = vmax.f32 %v2934_v53, 0.0 }
 0x3bf   : > { %v2983_v10 = vpack.c.bf16 %v2967_v59, %v2965_v16 }
 0x3c0   : > { %v2835_v46 = vpop.f32.mrf.mxu3 }
 0x3c1   : > { %v2836_v32 = vadd.f32 %v2835_v46, %v2787_v17  ;;  %3208 = vmatmul.bf16.gmra.mxu3 %v2983_v10  ;;  %4221 = vadd.xlane.f32.xlu2 %v4220_v42 }
 0x3c3   : > { %v2966_v39 = vmax.f32 %v2836_v32, 0.0 }
 0x3c5   : > { %v2982_v24 = vpack.c.bf16 %v2966_v39, %v2964_v48 }
 0x3c6   : > { %4295 = vperm.xlu0 %6286, %v8281_v51  }
 0x3c7   : > { %3159 = vmatmul.bf16.gmra.mxu2 %v2982_v24 }
 0x3c9   : > { %4230 = vadd.xlane.f32.xlu2 %v4229_v0 }
 0x3cb   : > { %4298 = vperm.xlu1 %6287, %v8261_v13  }
 0x3ce   : > { %4304 = vperm.xlu0 %6286, %v8268_v31  }
 0x3d3   : > { %4307 = vperm.xlu1 %6287, %v8337_v3  }
 0x3d4   : > { %v3174_v2 = vpop.f32.mrf.mxu3 }
 0x3d6   : > { %4313 = vperm.xlu0 %6286, %v8274_v40  }
 0x3da   : > { %v3125_v8 = vpop.f32.mrf.mxu2 }
 0x3db   : > { %v3126_v62 = vadd.f32 %v8391_v60, %v3125_v8  ;;  %4316 = vperm.xlu1 %6287, %v8357_v23  }
 0x3dc   : > { %v3176_v55 = vpop.f32.mrf.mxu3 }
 0x3dd   : > { %v3175_v38 = vadd.f32 %v3174_v2, %v3126_v62 }
 0x3de   : > { %4322 = vperm.xlu0 %6286, %v8299_v61  }
 0x3df   : > { %v3214_v44 = vmax.f32 %v3175_v38, 0.0 }
 0x3e1   : > { %4301 = vperm.xlu2 %6288, %v8313_v5  }
 0x3e2   : > { %v3127_v12 = vpop.f32.mrf.mxu2 }
 0x3e3   : > { %v3128_v34 = vadd.f32 %v8391_v60, %v3127_v12  ;;  %4325 = vperm.xlu1 %6287, %v8370_v29  }
 0x3e4   : > { %v3179_v1 = vpop.f32.mrf.mxu3 }
 0x3e5   : > { %v3177_v49 = vadd.f32 %v3176_v55, %v3128_v34 }
 0x3e6   : > { %4331 = vperm.xlu0 %6286, %v8327_v43  }
 0x3e7   : > { %v3215_v6 = vmax.f32 %v3177_v49, 0.0 }
 0x3e9   : > { %v3230_v53 = vpack.c.bf16 %v3215_v6, %v3214_v44  ;;  %4310 = vperm.xlu2 %6288, %v8290_v21   ;;  %v4342_v6 = vlaneseq }
 0x3ea   : > { %v3130_v47 = vpop.f32.mrf.mxu2 }
 0x3eb   : > { %3314 = vmatmul.bf16.vlgmr.msra.gmra.mxu0 %v3230_v53  ;;  %v3131_v57 = vadd.f32 %v8391_v60, %v3130_v47  ;;  %4334 = vperm.xlu1 %6287, %v8383_v50  }
 0x3ec   : > { %v3181_v30 = vpop.f32.mrf.mxu3 }
 0x3ed   : > { %v3180_v59 = vadd.f32 %v3179_v1, %v3131_v57  ;;  %v8435_v57 = vand.u32 127, %v4342_v6 }
 0x3ee   : > { %4340 = vperm.xlu0 %6286, %v8346_v27  }
 0x3ef   : > { %v3216_v18 = vmax.f32 %v3180_v59, 0.0  ;;  %v8440_v59 = vadd.s32 4294967288, %v8435_v57 }
 0x3f1   : > { %4319 = vperm.xlu2 %6288, %v8302_v58   ;;  %v4195_v53 = vpop.xlane.xlu1 %4194 }
 0x3f2   : > { %v3132_v16 = vpop.f32.mrf.mxu2 }
 0x3f3   : > { %v3133_v17 = vadd.f32 %v8391_v60, %v3132_v16  ;;  %6289 = vset.pattern.permute.xlu1 %v6511_v11 }
 0x3f4   : > { %v3184_v4 = vpop.f32.mrf.mxu3  ;;  %4453 = vperm.xlu1 %6289, %v8281_v51  }
 0x3f5   : > { %v3182_v10 = vadd.f32 %v3181_v30, %v3133_v17 }
 0x3f6   : > { %6291 = vset.pattern.permute.xlu0 %v6511_v11 }
 0x3f7   : > { %v3217_v46 = vmax.f32 %v3182_v10, 0.0  ;;  %4459 = vperm.xlu0 %6291, %v8313_v5   ;;  %v4741_v10 = vperm.slane %v4195_v53, %v8440_v59 }
 0x3f9   : > { %v3231_v19 = vpack.c.bf16 %v3217_v46, %v3216_v18  ;;  %4328 = vperm.xlu2 %6288, %v8330_v45  }
 0x3fa   : > { %v3135_v28 = vpop.f32.mrf.mxu2 }
 0x3fb   : > { %3319 = vmatmul.bf16.gmra.mxu0 %v3231_v19  ;;  %v3136_v33 = vadd.f32 %v8391_v60, %v3135_v28  ;;  %v8449_v19 = vpop.xlane.xlu1 %4200 }
 0x3fc   : > { %v3186_v32 = vpop.f32.mrf.mxu3  ;;  %4462 = vperm.xlu1 %6289, %v8268_v31  }
 0x3fd   : > { %v3185_v41 = vadd.f32 %v3184_v4, %v3136_v33 }
 0x3ff   : > { %v3218_v24 = vmax.f32 %v3185_v41, 0.0  ;;  %4468 = vperm.xlu0 %6291, %v8290_v21   ;;  %v4192_v47 = vpop.xlane.xlu2 %4191 }
 0x400   : > { %v4740_v17 = vperm.slane %v4192_v47, %v8435_v57 }
 0x401   : > { %4337 = vperm.xlu2 %6288, %v8351_v56  }
 0x402   : > { %v3137_v20 = vpop.f32.mrf.mxu2  ;;  %v8447_v46 = vsel %vm4347_vm1, %v4741_v10, %v4740_v17 }
 0x403   : > { %v3138_v48 = vadd.f32 %v8391_v60, %v3137_v20 }
 0x404   : > { %v3189_v39 = vpop.f32.mrf.mxu3  ;;  %4471 = vperm.xlu1 %6289, %v8274_v40  }
 0x405   : > { %v3187_v25 = vadd.f32 %v3186_v32, %v3138_v48 }
 0x407   : > { %v3219_v22 = vmax.f32 %v3187_v25, 0.0  ;;  %4477 = vperm.xlu0 %6291, %v8302_v58  }
 0x409   : > { %v3232_v52 = vpack.c.bf16 %v3219_v22, %v3218_v24  ;;  %6290 = vset.pattern.permute.xlu2 %v6511_v11  ;;  %v4207_v24 = vpop.xlane.xlu1 %4206 }
 0x40a   : > { %v3140_v63 = vpop.f32.mrf.mxu2  ;;  %4456 = vperm.xlu2 %6290, %v8261_v13  }
 0x40b   : > { %3324 = vmatmul.bf16.gmra.mxu0 %v3232_v52  ;;  %v3141_v7 = vadd.f32 %v8391_v60, %v3140_v63  ;;  %v4748_v63 = vperm.slane %v4207_v24, %v8440_v59 }
 0x40c   : > { %v3191_v35 = vpop.f32.mrf.mxu3  ;;  %4480 = vperm.xlu1 %6289, %v8299_v61  }
 0x40d   : > { %v3190_v54 = vadd.f32 %v3189_v39, %v3141_v7 }
 0x40f   : > { %v3220_v15 = vmax.f32 %v3190_v54, 0.0  ;;  %4486 = vperm.xlu0 %6291, %v8330_v45   ;;  %v8451_v45 = vpop.xlane.xlu0 %4209  ;;  %v6512_v54 = vmov 2  }
 0x412   : > { %v3142_v37 = vpop.f32.mrf.mxu2  ;;  %4465 = vperm.xlu2 %6290, %v8337_v3  }
 0x413   : > { %v3143_v36 = vadd.f32 %v8391_v60, %v3142_v37 }
 0x414   : > { %v3194_v2 = vpop.f32.mrf.mxu3  ;;  %4489 = vperm.xlu1 %6289, %v8327_v43  }
 0x415   : > { %v3192_v42 = vadd.f32 %v3191_v35, %v3143_v36 }
 0x416   : > { %v8453_v28 = vpop.xlane.xlu2 %4197 }
 0x417   : > { %v3221_v26 = vmax.f32 %v3192_v42, 0.0  ;;  %4495 = vperm.xlu0 %6291, %v8351_v56   ;;  %v4219_v7 = vpop.xlane.xlu0 %4218  ;;  %v4216_v42 = vpop.xlane.xlu1 %4215 }
 0x418   : > { %v4755_v36 = vperm.slane %v4219_v7, %v8440_v59  ;;  %v6384_v7 = vld [vmem:[%s6835_s30 + $0x48] sm:$0xff] }
 0x419   : > { %v3233_v8 = vpack.c.bf16 %v3221_v26, %v3220_v15  ;;  %v4754_v26 = vperm.slane %v4216_v42, %v8435_v57 }
 0x41a   : > { %v3145_v14 = vpop.f32.mrf.mxu2  ;;  %4474 = vperm.xlu2 %6290, %v8357_v23  }
 0x41b   : > { %3329 = vmatmul.bf16.gmra.mxu0 %v3233_v8  ;;  %v3146_v0 = vadd.f32 %v8391_v60, %v3145_v14 }
 0x41c   : > { %v3196_v55 = vpop.f32.mrf.mxu3  ;;  %4498 = vperm.xlu1 %6289, %v8346_v27  }
 0x41d   : > { %v3195_v12 = vadd.f32 %v3194_v2, %v3146_v0 }
 0x41f   : > { %v3222_v49 = vmax.f32 %v3195_v12, 0.0  ;;  %6293 = vset.pattern.permute.xlu0 %v6512_v54  ;;  %v4228_v8 = vpop.xlane.xlu0 %4227 }
 0x420   : > { %4608 = vperm.xlu0 %6293, %v8261_v13  }
 0x422   : > { %v3147_v62 = vpop.f32.mrf.mxu2  ;;  %4483 = vperm.xlu2 %6290, %v8370_v29  }
 0x423   : > { %v3148_v38 = vadd.f32 %v8391_v60, %v3147_v62 }
 0x424   : > { %v3199_v34 = vpop.f32.mrf.mxu3  ;;  %v4204_v22 = vpop.xlane.xlu2 %4203  ;;  %6294 = vset.pattern.permute.xlu1 %v6512_v54 }
 0x425   : > { %v3197_v1 = vadd.f32 %v3196_v55, %v3148_v38  ;;  %v4747_v35 = vperm.slane %v4204_v22, %v8435_v57  ;;  %v4756_v55 = vsel %vm4347_vm1, %v4755_v36, %v4754_v26  ;;  %4611 = vperm.xlu1 %6294, %v8313_v5   ;;  %v8480_v5 = vadd.s32 4294967280, %v8435_v57 }
 0x427   : > { %v3223_v44 = vmax.f32 %v3197_v1, 0.0  ;;  %v4749_v37 = vsel %vm4347_vm1, %v4748_v63, %v4747_v35 }
 0x428   : > { %4620 = vperm.xlu0 %6293, %v8290_v21   ;;  %v8484_v21 = vadd.s32 4294967272, %v8435_v57 }
 0x429   : > { %v3234_v30 = vpack.c.bf16 %v3223_v44, %v3222_v49  ;;  %v8476_v44 = vpop.xlane.xlu0 %4236 }
 0x42a   : > { %v3150_v16 = vpop.f32.mrf.mxu2  ;;  %4492 = vperm.xlu2 %6290, %v8383_v50  }
 0x42b   : > { %3334 = vmatmul.bf16.gmra.mxu0 %v3234_v30  ;;  %v3151_v18 = vadd.f32 %v8391_v60, %v3150_v16 }
 0x42c   : > { %v3201_v4 = vpop.f32.mrf.mxu3  ;;  %v4213_v27 = vpop.xlane.xlu2 %4212 }
 0x42d   : > { %v3200_v33 = vadd.f32 %v3199_v34, %v3151_v18  ;;  %v4225_v34 = vpop.xlane.xlu1 %4224  ;;  %4614 = vperm.xlu1 %6294, %v8268_v31   ;;  %v4750_v31 = vperm.slane %v8451_v45, %v8480_v5 }
 0x42e   : > { %v4759_v35 = vperm.slane %v4225_v34, %v8484_v21 }
 0x42f   : > { %v3224_v39 = vmax.f32 %v3200_v33, 0.0  ;;  %v4751_v45 = vsel %vm4351_vm2, %v4750_v31, %v4749_v37 }
 0x430   : > { %4629 = vperm.xlu0 %6293, %v8302_v58   ;;  %v4752_v58 = vperm.slane %v4213_v27, %v8484_v21 }
 0x432   : > { %v3152_v32 = vpop.f32.mrf.mxu2  ;;  %6292 = vset.pattern.permute.xlu2 %v6512_v54 }
 0x433   : > { %v3153_v20 = vadd.f32 %v8391_v60, %v3152_v32  ;;  %4605 = vperm.xlu2 %6292, %v8281_v51   ;;  %v4761_v51 = vperm.slane %v4228_v8, %v8435_v57  ;;  %v6386_v8 = vld [vmem:[%s6835_s30 + $0x8] sm:$0xff] }
 0x434   : > { %v3204_v48 = vpop.f32.mrf.mxu3  ;;  %v4222_v1 = vpop.xlane.xlu2 %4221 }
 0x435   : > { %v3202_v41 = vadd.f32 %v3201_v4, %v3153_v20  ;;  %v4234_v30 = vpop.xlane.xlu1 %4233  ;;  %4632 = vperm.xlu1 %6294, %v8299_v61  }
 0x436   : > { %v4764_v27 = vperm.slane %v4234_v30, %v8480_v5 }
 0x437   : > { %v3225_v25 = vmax.f32 %v3202_v41, 0.0 }
 0x438   : > { %v4296_v4 = vpop.permute.xlu0 %4295  ;;  %4635 = vperm.xlu0 %6293, %v8370_v29  }
 0x439   : > { %v3235_v52 = vpack.c.bf16 %v3225_v25, %v3224_v39  ;;  %v4344_v41 = vperm.slane %v4296_v4, %v8435_v57 }
 0x43a   : > { %v3155_v56 = vpop.f32.mrf.mxu2 }
 0x43b   : > { %3339 = vmatmul.bf16.gmra.mxu0 %v3235_v52  ;;  %v3156_v2 = vadd.f32 %v8391_v60, %v3155_v56  ;;  %4617 = vperm.xlu2 %6292, %v8337_v3   ;;  %v4757_v52 = vperm.slane %v4222_v1, %v8480_v5  ;;  %v4743_v1 = vperm.slane %v8453_v28, %v8480_v5 }
 0x43c   : > { %v3206_v15 = vpop.f32.mrf.mxu3  ;;  %v4231_v16 = vpop.xlane.xlu2 %4230 }
 0x43d   : > { %v3205_v13 = vadd.f32 %v3204_v48, %v3156_v2  ;;  %v4762_v17 = vperm.slane %v4231_v16, %v8440_v59  ;;  %v8500_v48 = vsel %vm4355_vm3, %v4752_v58, %v4751_v45  ;;  %4641 = vperm.xlu1 %6294, %v8327_v43   ;;  %v4758_v56 = vsel %vm4351_vm2, %v4757_v52, %v4756_v55  ;;  %v6385_v43 = vld [vmem:[%s6835_s30 + $0x28] sm:$0xff] }
 0x43e   : > { %v8519_v36 = vsel %vm4355_vm3, %v4759_v35, %v4758_v56 }
 0x43f   : > { %v3226_v12 = vmax.f32 %v3205_v13, 0.0  ;;  %v4763_v33 = vsel %vm4347_vm1, %v4762_v17, %v4761_v51  ;;  %v8546_v51 = vld [vmem:[%s9228_s11] ss:$0 sm:$0xff] }
 0x440   : > { %v8506_v22 = vpop.permute.xlu0 %4304  ;;  %v4765_v55 = vsel %vm4351_vm2, %v4764_v27, %v4763_v33 }
 0x442   : > { %v3157_v14 = vpop.f32.mrf.mxu2 }
 0x443   : > { %v3158_v0 = vadd.f32 %v8391_v60, %v3157_v14  ;;  %4623 = vperm.xlu2 %6292, %v8274_v40   ;;  %v6383_v40 = vld [vmem:[%s6835_s30 + $0x68] sm:$0xff]  ;;  %v4766_v14 = vperm.slane %v8476_v44, %v8484_v21  ;;  %v4745_v44 = vperm.slane %v8449_v19, %v8484_v21 }
 0x444   : > { %v3209_v6 = vpop.f32.mrf.mxu3  ;;  %v8504_v24 = vpop.permute.xlu2 %4301 }
 0x445   : > { %v3207_v62 = vadd.f32 %v3206_v15, %v3158_v0  ;;  %v8532_v0 = vsel %vm4355_vm3, %v4766_v14, %v4765_v55 }
 0x447   : > { %v3227_v38 = vmax.f32 %v3207_v62, 0.0 }
 0x448   : > { %v4314_v26 = vpop.permute.xlu0 %4313 }
 0x449   : > { %v3236_v49 = vpack.c.bf16 %v3227_v38, %v3226_v12  ;;  %v4360_v45 = vperm.slane %v4314_v26, %v8480_v5 }
 0x44a   : > { %v3160_v53 = vpop.f32.mrf.mxu2 }
 0x44b   : > { %3344 = vmatmul.bf16.gmra.mxu0 %v3236_v49  ;;  %v3161_v47 = vadd.f32 %v8391_v60, %v3160_v53  ;;  %4626 = vperm.xlu2 %6292, %v8357_v23  }
 0x44c   : > { %v3211_v20 = vpop.f32.mrf.mxu3  ;;  %v4311_v42 = vpop.permute.xlu2 %4310 }
 0x44d   : > { %v3210_v18 = vadd.f32 %v3209_v6, %v3161_v47  ;;  %v4358_v15 = vperm.slane %v4311_v42, %v8440_v59  ;;  %v4744_v47 = vsel %vm4351_vm2, %v4743_v1, %v8447_v46 }
 0x44f   : > { %v3228_v61 = vmax.f32 %v3210_v18, 0.0 }
 0x450   : > { %v4323_v38 = vpop.permute.xlu0 %4322 }
 0x452   : > { %v3162_v10 = vpop.f32.mrf.mxu2 }
 0x453   : > { %v3163_v32 = vadd.f32 %v8391_v60, %v3162_v10  ;;  %v4299_v60 = vpop.permute.xlu1 %4298  ;;  %4644 = vperm.xlu2 %6292, %v8383_v50   ;;  %v8541_v50 = vsel %vm4355_vm3, %v4745_v44, %v4744_v47  ;;  %v4365_v10 = vperm.slane %v4323_v38, %v8440_v59 }
 0x454   : > { %v4346_v25 = vperm.slane %v4299_v60, %v8440_v59  ;;  %v4320_v12 = vpop.permute.xlu2 %4319 }
 0x455   : > { %v3212_v3 = vadd.f32 %v3211_v20, %v3163_v32  ;;  %v4364_v46 = vperm.slane %v4320_v12, %v8435_v57  ;;  %v4350_v32 = vperm.slane %v8504_v24, %v8480_v5 }
 0x456   : > { %v8510_v63 = vsel %vm4347_vm1, %v4346_v25, %v4344_v41 }
 0x457   : > { %v3229_v39 = vmax.f32 %v3212_v3, 0.0  ;;  %v4354_v3 = vperm.slane %v8506_v22, %v8484_v21  ;;  %v4366_v41 = vsel %vm4347_vm1, %v4365_v10, %v4364_v46  ;;  %v4352_v22 = vsel %vm4351_vm2, %v4350_v32, %v8510_v63 }
 0x458   : > { %v4332_v53 = vpop.permute.xlu0 %4331 }
 0x459   : > { %v3237_v29 = vpack.c.bf16 %v3229_v39, %v3228_v61  ;;  %v4371_v28 = vperm.slane %v4332_v53, %v8435_v57  ;;  %v8574_v56 = vsel %vm4355_vm3, %v4354_v3, %v4352_v22 }
 0x45b   : > { %3349 = vmatmul.bf16.vlgmr.msra.gmra.mxu3 %v3237_v29  ;;  %v4308_v37 = vpop.permute.xlu1 %4307 }
 0x45c   : > { %3808 = vmatpush.msra.mxu3 %v6383_v40  ;;  %v4357_v2 = vperm.slane %v4308_v37, %v8435_v57  ;;  %v4329_v6 = vpop.permute.xlu2 %4328 }
 0x45d   : > { %v4369_v24 = vperm.slane %v4329_v6, %v8484_v21 }
 0x45e   : > { %3809 = vmatpush.msra.mxu3 %v6384_v7  ;;  %v4359_v23 = vsel %vm4347_vm1, %v4358_v15, %v4357_v2 }
 0x45f   : > { %v4361_v37 = vsel %vm4351_vm2, %v4360_v45, %v4359_v23 }
 0x460   : > { %3810 = vmatpush.msra.mxu3 %v6385_v43  ;;  %v4341_v4 = vpop.permute.xlu0 %4340 }
 0x461   : > { %v4376_v61 = vperm.slane %v4341_v4, %v8484_v21 }
 0x462   : > { %3811 = vmatpush.msra.mxu3 %v6386_v8 }
 0x463   : > { %v4317_v13 = vpop.permute.xlu1 %4316 }
 0x464   : > { %v4338_v17 = vpop.permute.xlu2 %4337  ;;  %v4362_v60 = vperm.slane %v4317_v13, %v8484_v21 }
 0x465   : > { %v4374_v20 = vperm.slane %v4338_v17, %v8480_v5 }
 0x466   : > { %v8582_v43 = vsel %vm4355_vm3, %v4362_v60, %v4361_v37 }
 0x468   : > { %v3315_v62 = vpop.f32.mrf.mxu0 }
 0x469   : > { %v3316_v18 = vadd.f32 %v8546_v51, %v3315_v62  ;;  %v8589_v38 = vpop.permute.xlu0 %4459 }
 0x46b   : > { %v4326_v34 = vpop.permute.xlu1 %4325  ;;  %v3356_v29 = vsel %vm3355_vm4, %v3316_v18, -inf }
 0x46c   : > { %v4367_v25 = vperm.slane %v4326_v34, %v8480_v5  ;;  %v4457_v62 = vpop.permute.xlu2 %4456 }
 0x46e   : > { %v4368_v15 = vsel %vm4351_vm2, %v4367_v25, %v4366_v41 }
 0x46f   : > { %v8586_v26 = vsel %vm4355_vm3, %v4369_v24, %v4368_v15 }
 0x470   : > { %v3317_v49 = vpop.f32.mrf.mxu0 }
 0x471   : > { %v3318_v19 = vadd.f32 %v8546_v51, %v3317_v49 }
 0x473   : > { %v4335_v30 = vpop.permute.xlu1 %4334  ;;  %v3357_v39 = vsel %vm3355_vm4, %v3318_v19, -inf }
 0x474   : > { %v4372_v31 = vperm.slane %v4335_v30, %v8440_v59  ;;  %v3358_v40 = vmax.f32 %v3356_v29, %v3357_v39  ;;  %v4466_v53 = vpop.permute.xlu2 %4465  ;;  %v4469_v30 = vpop.permute.xlu0 %4468  ;;  %v4501_v29 = vperm.slane %v4457_v62, %v8440_v59 }
 0x476   : > { %v4373_v58 = vsel %vm4347_vm1, %v4372_v31, %v4371_v28 }
 0x477   : > { %v4375_v35 = vsel %vm4351_vm2, %v4374_v20, %v4373_v58 }
 0x478   : > { %v3320_v16 = vpop.f32.mrf.mxu0  ;;  %v8578_v2 = vsel %vm4355_vm3, %v4376_v61, %v4375_v35  ;;  %v4507_v35 = vperm.slane %v4466_v53, %v8435_v57 }
 0x479   : > { %v3321_v33 = vadd.f32 %v8546_v51, %v3320_v16 }
 0x47b   : > { %v3359_v52 = vsel %vm3355_vm4, %v3321_v33, -inf  ;;  %v4454_v8 = vpop.permute.xlu1 %4453 }
 0x47c   : > { %v3360_v63 = vmax.f32 %v3358_v40, %v3359_v52  ;;  %v8598_v3 = vpop.permute.xlu2 %4474  ;;  %v4478_v45 = vpop.permute.xlu0 %4477  ;;  %v4500_v24 = vperm.slane %v4454_v8, %v8435_v57  ;;  %v4508_v40 = vperm.slane %v4469_v30, %v8440_v59 }
 0x47e   : > { %v4502_v15 = vsel %vm4347_vm1, %v4501_v29, %v4500_v24  ;;  %v4509_v8 = vsel %vm4347_vm1, %v4508_v40, %v4507_v35 }
 0x480   : > { %v3322_v7 = vpop.f32.mrf.mxu0 }
 0x481   : > { %v3323_v42 = vadd.f32 %v8546_v51, %v3322_v7 }
 0x483   : > { %v3361_v27 = vsel %vm3355_vm4, %v3323_v42, -inf  ;;  %v8591_v34 = vpop.permute.xlu1 %4462 }
 0x484   : > { %v3362_v14 = vmax.f32 %v3360_v63, %v3361_v27  ;;  %v4514_v63 = vperm.slane %v4478_v45, %v8435_v57  ;;  %v4503_v45 = vperm.slane %v8589_v38, %v8480_v5  ;;  %v4505_v35 = vperm.slane %v8591_v34, %v8484_v21 }
 0x486   : > { %v3363_v55 = vrot.slane %v3362_v14, 4 }
 0x488   : > { %v3364_v23 = vmax.f32 %v3362_v14, %v3363_v55  ;;  %v3325_v13 = vpop.f32.mrf.mxu0 }
 0x48a   : > { %v3365_v12 = vrot.slane %v3364_v23, 2 }
 0x48b   : > { %v8593_v31 = vpop.permute.xlu1 %4471 }
 0x48c   : > { %v3366_v1 = vmax.f32 %v3364_v23, %v3365_v12  ;;  %v4484_v23 = vpop.permute.xlu2 %4483  ;;  %v4510_v40 = vperm.slane %v8593_v31, %v8480_v5 }
 0x48e   : > { %v3367_v49 = vrot.slane %v3366_v1, 1 }
 0x490   : > { %v3368_v6 = vmax.f32 %v3366_v1, %v3367_v49  ;;  %v3327_v44 = vpop.f32.mrf.mxu0 }
 0x491   : > { %v8596_v20 = vadd.f32 %v8546_v51, %v3327_v44  ;;  %v4487_v44 = vpop.permute.xlu0 %4486 }
 0x492   : > { %v3409_v47 = vsub.f32 %v3318_v19, %v3368_v6  ;;  %v3408_v16 = vsub.f32 %v3316_v18, %v3368_v6  ;;  %v3410_v28 = vsub.f32 %v3321_v33, %v3368_v6  ;;  %v3411_v4 = vsub.f32 %v3323_v42, %v3368_v6 }
 0x493   : > { %v8601_v19 = vadd.f32 %v8546_v51, %v3325_v13  ;;  %v4481_v33 = vpop.permute.xlu1 %4480  ;;  %v3370_v61 = vsel %vm3355_vm4, %v8596_v20, -inf }
 0x494   : > { %v3426_v17 = vmul.f32 1.442695, %v3409_v47  ;;  %v3424_v46 = vmul.f32 1.442695, %v3408_v16  ;;  %v3428_v10 = vmul.f32 1.442695, %v3410_v28  ;;  %v4515_v14 = vperm.slane %v4481_v33, %v8440_v59 }
 0x495   : > { %v3430_v32 = vmul.f32 1.442695, %v3411_v4  ;;  %v3369_v60 = vsel %vm3355_vm4, %v8601_v19, -inf  ;;  %v4517_v33 = vperm.slane %v4484_v23, %v8480_v5 }
 0x496   : > { %6322 = vpow2.f32 %v3426_v17  ;;  %v3371_v52 = vmax.f32 %v3369_v60, %v3370_v61  ;;  %v4516_v49 = vsel %vm4347_vm1, %v4515_v14, %v4514_v63  ;;  %v4493_v61 = vpop.permute.xlu2 %4492 }
 0x497   : > { %6324 = vpow2.f32 %v3424_v46  ;;  %v4522_v29 = vperm.slane %v4493_v61, %v8440_v59  ;;  %v4518_v23 = vsel %vm4351_vm2, %v4517_v33, %v4516_v49 }
 0x498   : > { %v3330_v58 = vpop.f32.mrf.mxu0  ;;  %6326 = vpow2.f32 %v3428_v10 }
 0x499   : > { %v8604_v18 = vadd.f32 %v8546_v51, %v3330_v58  ;;  %6328 = vpow2.f32 %v3430_v32 }
 0x49b   : > { %v3372_v25 = vsel %vm3355_vm4, %v8604_v18, -inf  ;;  %v4490_v16 = vpop.permute.xlu1 %4489 }
 0x49c   : > { %v8606_v41 = vpop.eup %6322  ;;  %v3373_v27 = vmax.f32 %v3371_v52, %v3372_v25  ;;  %v4519_v25 = vperm.slane %v4487_v44, %v8484_v21  ;;  %v4521_v24 = vperm.slane %v4490_v16, %v8435_v57 }
 0x49d   : > { %v8610_v39 = vpop.eup %6324  ;;  %v3457_v7 = vsel %vm3355_vm4, %v8606_v41, 0.0 }
 0x49e   : > { %v8622_v37 = vpop.eup %6326  ;;  %v3456_v55 = vsel %vm3355_vm4, %v8610_v39, 0.0  ;;  %v4523_v38 = vsel %vm4347_vm1, %v4522_v29, %v4521_v24  ;;  %v8659_v34 = vsel %vm4355_vm3, %v4519_v25, %v4518_v23 }
 0x49f   : > { %v8633_v13 = vpop.eup %6328  ;;  %v3458_v12 = vadd.f32 %v3457_v7, %v3456_v55  ;;  %v3459_v6 = vsel %vm3355_vm4, %v8622_v37, 0.0  ;;  %v4512_v55 = vperm.slane %v8598_v3, %v8484_v21 }
 0x4a0   : > { %v3332_v22 = vpop.f32.mrf.mxu0  ;;  %v3461_v47 = vsel %vm3355_vm4, %v8633_v13, 0.0 }
 0x4a1   : > { %v8625_v42 = vadd.f32 %v8546_v51, %v3332_v22  ;;  %v3460_v53 = vadd.f32 %v3459_v6, %v3458_v12  ;;  %v4496_v22 = vpop.permute.xlu0 %4495 }
 0x4a2   : > { %v4524_v12 = vperm.slane %v4496_v22, %v8480_v5 }
 0x4a3   : > { %v3374_v62 = vsel %vm3355_vm4, %v8625_v42, -inf  ;;  %v3462_v28 = vadd.f32 %v3461_v47, %v3460_v53  ;;  %v4499_v63 = vpop.permute.xlu1 %4498 }
 0x4a4   : > { %v3375_v1 = vmax.f32 %v3373_v27, %v3374_v62  ;;  %v4526_v44 = vperm.slane %v4499_v63, %v8484_v21 }
 0x4a5   : > { %v3463_v46 = vrot.slane %v3462_v28, 4 }
 0x4a6   : > { %v3376_v30 = vrot.slane %v3375_v1, 4 }
 0x4a7   : > { %v3464_v58 = vadd.f32 %v3463_v46, %v3462_v28 }
 0x4a8   : > { %v3377_v17 = vmax.f32 %v3375_v1, %v3376_v30  ;;  %v3335_v4 = vpop.f32.mrf.mxu0  ;;  %v4504_v1 = vsel %vm4351_vm2, %v4503_v45, %v4502_v15  ;;  %v4511_v30 = vsel %vm4351_vm2, %v4510_v40, %v4509_v8 }
 0x4a9   : > { %v3465_v60 = vrot.slane %v3464_v58, 2  ;;  %v8667_v49 = vsel %vm4355_vm3, %v4505_v35, %v4504_v1  ;;  %v4609_v29 = vpop.permute.xlu0 %4608 }
 0x4aa   : > { %v3378_v10 = vrot.slane %v3377_v17, 2 }
 0x4ab   : > { %v3466_v7 = vadd.f32 %v3465_v60, %v3464_v58 }
 0x4ac   : > { %v3379_v32 = vmax.f32 %v3377_v17, %v3378_v10  ;;  %v3336_v10 = vadd.f32 %v8546_v51, %v3335_v4 }
 0x4ad   : > { %v3467_v62 = vrot.slane %v3466_v7, 1 }
 0x4ae   : > { %v3380_v52 = vrot.slane %v3379_v32, 1  ;;  %v3382_v4 = vsel %vm3355_vm4, %v3336_v10, -inf }
 0x4af   : > { %v3468_v47 = vadd.f32 %v3467_v62, %v3466_v7 }
 0x4b0   : > { %v3381_v27 = vmax.f32 %v3379_v32, %v3380_v52  ;;  %v3337_v14 = vpop.f32.mrf.mxu0  ;;  %v4606_v52 = vpop.permute.xlu2 %4605 }
 0x4b1   : > { %6330 = vrcp.f32 %v3468_v47  ;;  %v8678_v46 = vadd.f32 %v8546_v51, %v3337_v14  ;;  %v4652_v7 = vperm.slane %v4606_v52, %v8435_v57 }
 0x4b2   : > { %v3413_v31 = vsub.f32 %v8596_v20, %v3381_v27  ;;  %v3414_v6 = vsub.f32 %v8604_v18, %v3381_v27  ;;  %v3412_v53 = vsub.f32 %v8601_v19, %v3381_v27  ;;  %v3415_v3 = vsub.f32 %v8625_v42, %v3381_v27 }
 0x4b3   : > { %v8671_v20 = vsel %vm4355_vm3, %v4512_v55, %v4511_v30  ;;  %v4525_v18 = vsel %vm4351_vm2, %v4524_v12, %v4523_v38  ;;  %v3383_v33 = vsel %vm3355_vm4, %v8678_v46, -inf  ;;  %v4621_v30 = vpop.permute.xlu0 %4620 }
 0x4b4   : > { %v3434_v15 = vmul.f32 1.442695, %v3413_v31  ;;  %v3436_v16 = vmul.f32 1.442695, %v3414_v6  ;;  %v3432_v28 = vmul.f32 1.442695, %v3412_v53  ;;  %v8675_v19 = vsel %vm4355_vm3, %v4526_v44, %v4525_v18  ;;  %v4612_v44 = vpop.permute.xlu1 %4611 }
 0x4b5   : > { %v3438_v42 = vmul.f32 1.442695, %v3415_v3  ;;  %v3384_v22 = vmax.f32 %v3382_v4, %v3383_v33 }
 0x4b6   : > { %6332 = vpow2.f32 %v3434_v15 }
 0x4b7   : > { %6334 = vpow2.f32 %v3436_v16  ;;  %v8680_v8 = vpop.eup %6330 }
 0x4b8   : > { %v3340_v17 = vpop.f32.mrf.mxu0  ;;  %6336 = vpow2.f32 %v3432_v28  ;;  %v3512_v45 = vmul.f32 %v8680_v8, %v8610_v39  ;;  %v4653_v39 = vperm.slane %v4609_v29, %v8440_v59  ;;  %v3513_v6 = vmul.f32 %v8680_v8, %v8606_v41  ;;  %v4618_v15 = vpop.permute.xlu2 %4617 }
 0x4b9   : > { %6338 = vpow2.f32 %v3438_v42  ;;  %v3341_v58 = vadd.f32 %v8546_v51, %v3340_v17  ;;  %v4660_v28 = vperm.slane %v4621_v30, %v8440_v59  ;;  %v4659_v18 = vperm.slane %v4618_v15, %v8435_v57 }
 0x4ba   : > { %3528 = vxpose.xlu0.b32.start [1/4] (short) (narrow) %v3512_v45, 16  ;;  %v4654_v23 = vsel %vm4347_vm1, %v4653_v39, %v4652_v7  ;;  %v3514_v41 = vmul.f32 %v8680_v8, %v8622_v37  ;;  %v3515_v37 = vmul.f32 %v8680_v8, %v8633_v13 }
 0x4bb   : > { %v3385_v24 = vsel %vm3355_vm4, %v3341_v58, -inf  ;;  %v4661_v45 = vsel %vm4347_vm1, %v4660_v28, %v4659_v18 }
 0x4bc   : > { %v8684_v32 = vpop.eup %6332  ;;  %v3386_v14 = vmax.f32 %v3384_v22, %v3385_v24  ;;  %v4615_v29 = vpop.permute.xlu1 %4614 }
 0x4bd   : > { %v8690_v61 = vpop.eup %6334  ;;  %v3470_v60 = vsel %vm3355_vm4, %v8684_v32, 0.0  ;;  %v4657_v30 = vperm.slane %v4615_v29, %v8484_v21 }
 0x4be   : > { %v8694_v25 = vpop.eup %6336  ;;  %v3472_v55 = vsel %vm3355_vm4, %v8690_v61, 0.0 }
 0x4bf   : > { %v3469_v40 = vsel %vm3355_vm4, %v8694_v25, 0.0  ;;  %v8702_v38 = vpop.eup %6338 }
 0x4c0   : > { %v3342_v35 = vpop.f32.mrf.mxu0  ;;  %v3471_v27 = vadd.f32 %v3470_v60, %v3469_v40  ;;  %v3474_v1 = vsel %vm3355_vm4, %v8702_v38, 0.0  ;;  %v4624_v39 = vpop.permute.xlu2 %4623 }
 0x4c1   : > { %v3343_v63 = vadd.f32 %v8546_v51, %v3342_v35 }
 0x4c2   : > { %v3473_v12 = vadd.f32 %v3472_v55, %v3471_v27  ;;  %3529 = vxpose.xlu0.b32.cont [2/4] (short) (narrow) %v3513_v6, 16 }
 0x4c3   : > { %v3387_v62 = vsel %vm3355_vm4, %v3343_v63, -inf }
 0x4c4   : > { %v3388_v31 = vmax.f32 %v3386_v14, %v3387_v62  ;;  %v3475_v53 = vadd.f32 %v3474_v1, %v3473_v12  ;;  %v4633_v6 = vpop.permute.xlu1 %4632 }
 0x4c6   : > { %v3389_v3 = vrot.slane %v3388_v31, 4  ;;  %v3476_v47 = vrot.slane %v3475_v53, 4 }
 0x4c8   : > { %v3390_v16 = vmax.f32 %v3388_v31, %v3389_v3  ;;  %v3477_v42 = vadd.f32 %v3476_v47, %v3475_v53  ;;  %v3345_v27 = vpop.f32.mrf.mxu0  ;;  %v4630_v31 = vpop.permute.xlu0 %4629  ;;  %v4655_v3 = vperm.slane %v4612_v44, %v8480_v5 }
 0x4c9   : > { %v4627_v13 = vpop.permute.xlu2 %4626 }
 0x4ca   : > { %v3391_v17 = vrot.slane %v3390_v16, 2  ;;  %v3478_v33 = vrot.slane %v3477_v42, 2  ;;  %3530 = vxpose.xlu0.b32.cont [3/4] (short) (narrow) %v3514_v41, 16  ;;  %v4664_v44 = vperm.slane %v4627_v13, %v8484_v21  ;;  %v4656_v15 = vsel %vm4351_vm2, %v4655_v3, %v4654_v23 }
 0x4cc   : > { %v3392_v60 = vmax.f32 %v3390_v16, %v3391_v17  ;;  %v3479_v4 = vadd.f32 %v3478_v33, %v3477_v42  ;;  %v8736_v42 = vsel %vm4355_vm3, %v4657_v30, %v4656_v15 }
 0x4ce   : > { %v3393_v24 = vrot.slane %v3392_v60, 1  ;;  %v3480_v52 = vrot.slane %v3479_v4, 1 }
 0x4d0   : > { %v3394_v22 = vmax.f32 %v3392_v60, %v3393_v24  ;;  %v3481_v35 = vadd.f32 %v3480_v52, %v3479_v4  ;;  %v3347_v18 = vpop.f32.mrf.mxu0  ;;  %v3346_v24 = vadd.f32 %v8546_v51, %v3345_v27 }
 0x4d1   : > { %v3348_v23 = vadd.f32 %v8546_v51, %v3347_v18 }
 0x4d2   : > { %v3417_v40 = vsub.f32 %v8678_v46, %v3394_v22  ;;  %v3418_v7 = vsub.f32 %v3341_v58, %v3394_v22  ;;  %v3416_v14 = vsub.f32 %v3336_v10, %v3394_v22  ;;  %v3419_v55 = vsub.f32 %v3343_v63, %v3394_v22  ;;  %3531 = vxpose.xlu0.b32.end [4/4] (short) (narrow) %v3515_v37, 16 }
 0x4d3   : > { %6340 = vrcp.f32 %v3481_v35  ;;  %v4666_v46 = vperm.slane %v4630_v31, %v8435_v57  ;;  %v4667_v58 = vperm.slane %v4633_v6, %v8440_v59  ;;  %v4662_v63 = vperm.slane %v4624_v39, %v8480_v5 }
 0x4d4   : > { %v3442_v62 = vmul.f32 1.442695, %v3417_v40  ;;  %v3444_v12 = vmul.f32 1.442695, %v3418_v7  ;;  %v3440_v1 = vmul.f32 1.442695, %v3416_v14 }
 0x4d5   : > { %v3446_v53 = vmul.f32 1.442695, %v3419_v55  ;;  %v8726_v47 = vsel %vm4347_vm1, %v4667_v58, %v4666_v46  ;;  %v4663_v16 = vsel %vm4351_vm2, %v4662_v63, %v4661_v45  ;;  %v3396_v39 = vsel %vm3355_vm4, %v3348_v23, -inf }
 0x4d6   : > { %6342 = vpow2.f32 %v3442_v62  ;;  %v8739_v17 = vsel %vm4355_vm3, %v4664_v44, %v4663_v16  ;;  %v3395_v14 = vsel %vm3355_vm4, %v3346_v24, -inf }
 0x4d7   : > { %6344 = vpow2.f32 %v3444_v12  ;;  %v3397_v62 = vmax.f32 %v3395_v14, %v3396_v39 }
 0x4d8   : > { %6346 = vpow2.f32 %v3440_v1 }
 0x4d9   : > { %v6341_v10 = vpop.eup %6340  ;;  %6348 = vpow2.f32 %v3446_v53 }
 0x4da   : > { %v3516_v8 = vmul.f32 %v6341_v10, %v8694_v25  ;;  %v3517_v22 = vmul.f32 %v6341_v10, %v8684_v32  ;;  %v3518_v3 = vmul.f32 %v6341_v10, %v8690_v61  ;;  %v3519_v16 = vmul.f32 %v6341_v10, %v8702_v38 }
 0x4dc   : > { %v8733_v28 = vpop.eup %6342  ;;  %3560 = vxpose.xlu1.b32.start [1/4] (short) (narrow) %v3516_v8, 16 }
 0x4dd   : > { %v8741_v25 = vpop.eup %6344  ;;  %v3483_v60 = vsel %vm3355_vm4, %v8733_v28, 0.0 }
 0x4de   : > { %v3350_v33 = vpop.f32.mrf.mxu3  ;;  %v6347_v41 = vpop.eup %6346  ;;  %v3485_v35 = vsel %vm3355_vm4, %v8741_v25, 0.0 }
 0x4df   : > { %v3482_v45 = vsel %vm3355_vm4, %v6347_v41, 0.0  ;;  %v8747_v4 = vpop.eup %6348  ;;  %v3351_v29 = vadd.f32 %v8546_v51, %v3350_v33 }
 0x4e0   : > { %v3484_v52 = vadd.f32 %v3483_v60, %v3482_v45  ;;  %v3487_v7 = vsel %vm3355_vm4, %v8747_v4, 0.0 }
 0x4e1   : > { %v3398_v55 = vsel %vm3355_vm4, %v3351_v29, -inf }
 0x4e2   : > { %v3486_v40 = vadd.f32 %v3485_v35, %v3484_v52  ;;  %v3399_v1 = vmax.f32 %v3397_v62, %v3398_v55 }
 0x4e4   : > { %3561 = vxpose.xlu1.b32.cont [2/4] (short) (narrow) %v3517_v22, 16  ;;  %v3488_v27 = vadd.f32 %v3487_v7, %v3486_v40 }
 0x4e6   : > { %v3352_v12 = vpop.f32.mrf.mxu3  ;;  %v3489_v32 = vrot.slane %v3488_v27, 4 }
 0x4e7   : > { %v3353_v37 = vadd.f32 %v8546_v51, %v3352_v12 }
 0x4e8   : > { %v3490_v6 = vadd.f32 %v3489_v32, %v3488_v27 }
 0x4e9   : > { %v3400_v31 = vsel %vm3355_vm4, %v3353_v37, -inf }
 0x4ea   : > { %v3401_v53 = vmax.f32 %v3399_v1, %v3400_v31  ;;  %v3491_v46 = vrot.slane %v3490_v6, 2 }
 0x4ec   : > { %v3402_v58 = vrot.slane %v3401_v53, 4  ;;  %3562 = vxpose.xlu1.b32.cont [3/4] (short) (narrow) %v3518_v3, 16  ;;  %v3492_v63 = vadd.f32 %v3491_v46, %v3490_v6 }
 0x4ee   : > { %v3403_v13 = vmax.f32 %v3401_v53, %v3402_v58  ;;  %v3493_v8 = vrot.slane %v3492_v63, 1 }
 0x4f0   : > { %v3404_v30 = vrot.slane %v3403_v13, 2  ;;  %v3494_v44 = vadd.f32 %v3493_v8, %v3492_v63 }
 0x4f2   : > { %v3405_v15 = vmax.f32 %v3403_v13, %v3404_v30  ;;  %6350 = vrcp.f32 %v3494_v44  ;;  %v6387_v44 = vld [vmem:[%s6835_s30 + $0x70] sm:$0xff] }
 0x4f4   : > { %v3406_v51 = vrot.slane %v3405_v15, 1  ;;  %3563 = vxpose.xlu1.b32.end [4/4] (short) (narrow) %v3519_v16, 16  ;;  %v6389_v16 = vld [vmem:[%s6835_s30 + $0x30] sm:$0xff] }
 0x4f6   : > { %v3407_v18 = vmax.f32 %v3405_v15, %v3406_v51  ;;  %v6388_v15 = vld [vmem:[%s6835_s30 + $0x50] sm:$0xff] }
 0x4f8   : > { %v3421_v33 = vsub.f32 %v3348_v23, %v3407_v18  ;;  %v3422_v60 = vsub.f32 %v3351_v29, %v3407_v18  ;;  %v3420_v45 = vsub.f32 %v3346_v24, %v3407_v18  ;;  %v6351_v52 = vpop.eup %6350  ;;  %v3423_v61 = vsub.f32 %v3353_v37, %v3407_v18  ;;  %v6390_v18 = vld [vmem:[%s6835_s30 + $0x10] sm:$0xff] }
 0x4f9   : > { %v3520_v39 = vmul.f32 %v6351_v52, %v6347_v41  ;;  %v3521_v10 = vmul.f32 %v6351_v52, %v8733_v28  ;;  %v3522_v37 = vmul.f32 %v6351_v52, %v8741_v25  ;;  %v3523_v6 = vmul.f32 %v6351_v52, %v8747_v4  ;;  %v8771_v4 = vpop.permute.xlu0 %4635  ;;  %v6392_v52 = vld [vmem:[%s6835_s30 + $0x58] sm:$0xff] }
 0x4fa   : > { %v3450_v22 = vmul.f32 1.442695, %v3421_v33  ;;  %v3452_v35 = vmul.f32 1.442695, %v3422_v60  ;;  %v3448_v40 = vmul.f32 1.442695, %v3420_v45  ;;  %v8786_v33 = vpop.permute.xlu1 %4641 }
 0x4fb   : > { %3592 = vxpose.xlu2.b32.start [1/4] (short) (narrow) %v3520_v39, 16  ;;  %v3454_v7 = vmul.f32 1.442695, %v3423_v61  ;;  %v6391_v45 = vld [vmem:[%s6835_s30 + $0x78] sm:$0xff]  ;;  %v8800_v39 = vpop.permute.xlu2 %4644 }
 0x4fc   : > { %6352 = vpow2.f32 %v3450_v22  ;;  %v6393_v61 = vld [vmem:[%s6835_s30 + $0x38] sm:$0xff] }
 0x4fd   : > { %6354 = vpow2.f32 %v3452_v35  ;;  %v6394_v35 = vld [vmem:[%s6835_s30 + $0x18] sm:$0xff] }
 0x4fe   : > { %6356 = vpow2.f32 %v3448_v40  ;;  %v6395_v40 = vld [vmem:[%s6835_s30 + $0xf0] sm:$0xff] }
 0x4ff   : > { %6358 = vpow2.f32 %v3454_v7  ;;  %v6396_v7 = vld [vmem:[%s6835_s30 + $0xd0] sm:$0xff] }
 0x502   : > { %v6353_v38 = vpop.eup %6352 }
 0x503   : > { %v6355_v14 = vpop.eup %6354  ;;  %3593 = vxpose.xlu2.b32.cont [2/4] (short) (narrow) %v3521_v10, 16  ;;  %v3496_v23 = vsel %vm3355_vm4, %v6353_v38, 0.0  ;;  %v6397_v10 = vld [vmem:[%s6835_s30 + $0xb0] sm:$0xff] }
 0x504   : > { %v6357_v24 = vpop.eup %6356  ;;  %v3498_v41 = vsel %vm3355_vm4, %v6355_v14, 0.0 }
 0x505   : > { %v3495_v29 = vsel %vm3355_vm4, %v6357_v24, 0.0  ;;  %v6359_v55 = vpop.eup %6358 }
 0x506   : > { %v3497_v27 = vadd.f32 %v3496_v23, %v3495_v29  ;;  %v3500_v12 = vsel %vm3355_vm4, %v6359_v55, 0.0  ;;  %v6399_v23 = vld [vmem:[%s6835_s30 + $0x90] sm:$0xff]  ;;  %v6401_v29 = vld [vmem:[%s6835_s30 + $0xa0] sm:$0xff] }
 0x508   : > { %v3499_v62 = vadd.f32 %v3498_v41, %v3497_v27  ;;  %v6402_v27 = vld [vmem:[%s6835_s30 + $0x80] sm:$0xff]  ;;  %v6403_v41 = vld [vmem:[%s6835_s30 + $0x168] sm:$0xff] }
 0x50a   : > { %v3501_v32 = vadd.f32 %v3500_v12, %v3499_v62  ;;  %v6404_v62 = vld [vmem:[%s6835_s30 + $0x148] sm:$0xff] }
 0x50b   : > { %3594 = vxpose.xlu2.b32.cont [3/4] (short) (narrow) %v3522_v37, 16  ;;  %v6405_v12 = vld [vmem:[%s6835_s30 + $0x128] sm:$0xff]  ;;  %v6406_v37 = vld [vmem:[%s6835_s30 + $0xf8] sm:$0xff] }
 0x50c   : > { %v3502_v1 = vrot.slane %v3501_v32, 4 }
 0x50e   : > { %v3503_v28 = vadd.f32 %v3502_v1, %v3501_v32  ;;  %v6407_v32 = vld [vmem:[%s6835_s30 + $0x108] sm:$0xff]  ;;  %v6408_v1 = vld [vmem:[%s6835_s30 + $0xd8] sm:$0xff] }
 0x510   : > { %v3504_v31 = vrot.slane %v3503_v28, 2 }
 0x512   : > { %v3505_v53 = vadd.f32 %v3504_v31, %v3503_v28  ;;  %v6409_v28 = vld [vmem:[%s6835_s30 + $0xb8] sm:$0xff] }
 0x513   : > { %3595 = vxpose.xlu2.b32.end [4/4] (short) (narrow) %v3523_v6, 16  ;;  %v6410_v31 = vld [vmem:[%s6835_s30 + $0x98] sm:$0xff]  ;;  %v6411_v6 = vld [vmem:[%s6835_s30 + $0x1e0] sm:$0xff] }
 0x514   : > { %v3506_v3 = vrot.slane %v3505_v53, 1 }
 0x516   : > { %v3507_v46 = vadd.f32 %v3506_v3, %v3505_v53  ;;  %v6412_v53 = vld [vmem:[%s6835_s30 + $0x1c0] sm:$0xff] }
 0x517   : > { %v6413_v3 = vld [vmem:[%s6835_s30 + $0x1a0] sm:$0xff] }
 0x518   : > { %6360 = vrcp.f32 %v3507_v46  ;;  %v6414_v46 = vld [vmem:[%s6835_s30 + $0x170] sm:$0xff] }
 0x51e   : > { %v6361_v58 = vpop.eup %6360 }
 0x51f   : > { %v3524_v63 = vmul.f32 %v6361_v58, %v6357_v24  ;;  %v3525_v13 = vmul.f32 %v6361_v58, %v6353_v38  ;;  %v3526_v25 = vmul.f32 %v6361_v58, %v6355_v14  ;;  %v3527_v8 = vmul.f32 %v6361_v58, %v6359_v55  ;;  %v6398_v14 = vld [vmem:[%s6835_s30 + $0xe0] sm:$0xff] }
 0x520   : > { %v6400_v24 = vld [vmem:[%s6835_s30 + $0xc0] sm:$0xff] }
 0x521   : > { %3624 = vxpose.xlu0.b32.start [1/4] (short) (narrow) %v3524_v63, 16  ;;  %v6415_v58 = vld [vmem:[%s6835_s30 + $0x180] sm:$0xff]  ;;  %v6416_v63 = vld [vmem:[%s6835_s30 + $0x150] sm:$0xff] }
 0x529   : > { %3625 = vxpose.xlu0.b32.cont [2/4] (short) (narrow) %v3525_v13, 16  ;;  %v6417_v13 = vld [vmem:[%s6835_s30 + $0x130] sm:$0xff] }
 0x531   : > { %3626 = vxpose.xlu0.b32.cont [3/4] (short) (narrow) %v3526_v25, 16  ;;  %v6418_v25 = vld [vmem:[%s6835_s30 + $0x110] sm:$0xff] }
 0x539   : > { %3627 = vxpose.xlu0.b32.end [4/4] (short) (narrow) %v3527_v8, 16  ;;  %v6419_v8 = vld [vmem:[%s6835_s30 + $0x1f8] sm:$0xff] }
 0x547   : > { %6296 = vset.pattern.permute.xlu1 %v6511_v11 }
 0x55e   : > { %v8773_v30 = vpop.trf.xlu0 }
 0x55f   : > { %5982 = vmatmul.msk.f32.vlgmr.msra.gmra.mxu1 %vm3656_vm5, %v8773_v30 }
 0x560   : > { %3831 = vmatpush.msra.mxu1 %v6387_v44  ;;  %v6420_v44 = vld [vmem:[%s6835_s30 + $0x1d8] sm:$0xff] }
 0x562   : > { %3832 = vmatpush.msra.mxu1 %v6388_v15 }
 0x564   : > { %3833 = vmatpush.msra.mxu1 %v6389_v16  ;;  %v6421_v16 = vld [vmem:[%s6835_s30 + $0x1b8] sm:$0xff] }
 0x566   : > { %v8780_v51 = vpop.trf.xlu0  ;;  %3834 = vmatpush.msra.mxu1 %v6390_v18  ;;  %v6422_v18 = vld [vmem:[%s6835_s30 + $0x1e8] sm:$0xff] }
 0x567   : > { %5983 = vmatmul.msk.f32.gmra.mxu1 %vm3656_vm5, %v8780_v51 }
 0x575   : > { %6295 = vset.pattern.permute.xlu2 %v6510_v9 }
 0x580   : > { %v8788_v60 = vpop.trf.xlu1 }
 0x581   : > { %5984 = vmatmul.msk.f32.vlgmr.msra.gmra.mxu2 %vm3656_vm5, %v8788_v60 }
 0x582   : > { %3854 = vmatpush.msra.mxu2 %v6391_v45  ;;  %v6423_v45 = vld [vmem:[%s6835_s30 + $0xe8] sm:$0xff] }
 0x584   : > { %3855 = vmatpush.msra.mxu2 %v6392_v52  ;;  %v6424_v52 = vld [vmem:[%s6835_s30 + $0x198] sm:$0xff] }
 0x586   : > { %3856 = vmatpush.msra.mxu2 %v6393_v61  ;;  %v6425_v61 = vld [vmem:[%s6835_s30 + $0x1c8] sm:$0xff] }
 0x588   : > { %v8795_v22 = vpop.trf.xlu1  ;;  %3857 = vmatpush.msra.mxu2 %v6394_v35  ;;  %v6426_v35 = vld [vmem:[%s6835_s30 + $0xc8] sm:$0xff] }
 0x589   : > { %5985 = vmatmul.msk.f32.gmra.mxu2 %vm3656_vm5, %v8795_v22 }
 0x591   : > { %5990 = vmatmul.msk.f32.vlgmr.msrb.gmra.mxu2 %vm3656_vm5, %v8773_v30 }
 0x592   : > { %3923 = vmatpush.msrb.mxu2 %v6395_v40  ;;  %v6427_v40 = vld [vmem:[%s6835_s30 + $0x1a8] sm:$0xff] }
 0x594   : > { %3924 = vmatpush.msrb.mxu2 %v6396_v7  ;;  %v8806_v38 = vpop.trf.xlu2  ;;  %v6428_v7 = vld [vmem:[%s6835_s30 + $0xa8] sm:$0xff] }
 0x595   : > { %5986 = vmatmul.msk.f32.vlgmr.msrb.gmra.mxu3 %vm3656_vm5, %v8806_v38 }
 0x596   : > { %3925 = vmatpush.msrb.mxu2 %v6397_v10  ;;  %3877 = vmatpush.msrb.mxu3 %v6398_v14  ;;  %v6429_v10 = vld [vmem:[%s6835_s30 + $0x188] sm:$0xff] }
 0x598   : > { %3926 = vmatpush.msrb.mxu2 %v6399_v23  ;;  %3878 = vmatpush.msrb.mxu3 %v6400_v24  ;;  %v6430_v23 = vld [vmem:[%s6835_s30 + $0x88] sm:$0xff]  ;;  %v6431_v24 = vld [vmem:[%s6835_s30 + $0x160] sm:$0xff] }
 0x599   : > { %5991 = vmatmul.msk.f32.gmra.mxu2 %vm3656_vm5, %v8780_v51 }
 0x59a   : > { %3879 = vmatpush.msrb.mxu3 %v6401_v29  ;;  %v6432_v29 = vld [vmem:[%s6835_s30 + $0x140] sm:$0xff] }
 0x59c   : > { %v8817_v55 = vpop.trf.xlu2  ;;  %3880 = vmatpush.msrb.mxu3 %v6402_v27  ;;  %v6433_v27 = vld [vmem:[%s6835_s30 + $0x120] sm:$0xff] }
 0x59d   : > { %5987 = vmatmul.msk.f32.gmra.mxu3 %vm3656_vm5, %v8817_v55 }
 0x5a1   : > { %5996 = vmatmul.msk.f32.vlgmr.msra.gmra.mxu2 %vm3656_vm5, %v8773_v30 }
 0x5a2   : > { %3992 = vmatpush.msra.mxu2 %v6403_v41  ;;  %v6434_v41 = vld [vmem:[%s6835_s30 + $0x100] sm:$0xff] }
 0x5a4   : > { %3993 = vmatpush.msra.mxu2 %v6404_v62 }
 0x5a5   : > { %5992 = vmatmul.msk.f32.vlgmr.msra.gmra.mxu3 %vm3656_vm5, %v8773_v30 }
 0x5a6   : > { %3994 = vmatpush.msra.mxu2 %v6405_v12  ;;  %3946 = vmatpush.msra.mxu3 %v6406_v37  ;;  %v6435_v37 = vld [vmem:[%s6835_s30 + $0x178] sm:$0xff] }
 0x5a8   : > { %3995 = vmatpush.msra.mxu2 %v6407_v32  ;;  %3947 = vmatpush.msra.mxu3 %v6408_v1  ;;  %v6436_v32 = vld [vmem:[%s6835_s30 + $0x158] sm:$0xff] }
 0x5a9   : > { %5997 = vmatmul.msk.f32.gmra.mxu2 %vm3656_vm5, %v8780_v51  ;;  %v6437_v1 = vld [vmem:[%s6835_s30 + $0x138] sm:$0xff] }
 0x5aa   : > { %3948 = vmatpush.msra.mxu3 %v6409_v28  ;;  %v6438_v28 = vld [vmem:[%s6835_s30 + $0x118] sm:$0xff] }
 0x5ac   : > { %3949 = vmatpush.msra.mxu3 %v6410_v31  ;;  %v6439_v31 = vld [vmem:[%s6835_s30 + $0x1f0] sm:$0xff] }
 0x5ad   : > { %5993 = vmatmul.msk.f32.gmra.mxu3 %vm3656_vm5, %v8780_v51 }
 0x5b1   : > { %6002 = vmatmul.msk.f32.vlgmr.msrb.gmra.mxu2 %vm3656_vm5, %v8788_v60 }
 0x5b2   : > { %4061 = vmatpush.msrb.mxu2 %v6411_v6  ;;  %v6440_v6 = vld [vmem:[%s6835_s30 + $0x1d0] sm:$0xff] }
 0x5b4   : > { %4062 = vmatpush.msrb.mxu2 %v6412_v53  ;;  %v6441_v53 = vld [vmem:[%s6835_s30 + $0x1b0] sm:$0xff] }
 0x5b5   : > { %5998 = vmatmul.msk.f32.vlgmr.msrb.gmra.mxu3 %vm3656_vm5, %v8788_v60 }
 0x5b6   : > { %4063 = vmatpush.msrb.mxu2 %v6413_v3  ;;  %4015 = vmatpush.msrb.mxu3 %v6414_v46  ;;  %v6442_v3 = vld [vmem:[%s6835_s30 + $0x190] sm:$0xff]  ;;  %s5172_s30 = sshll.u32 %s461_s21, 8 }
 0x5b7   : > { %s8953_s14 = scalar_lea.vmem [#allocation2], %s5172_s30 }
 0x5b8   : > { %4064 = vmatpush.msrb.mxu2 %v6415_v58  ;;  %4016 = vmatpush.msrb.mxu3 %v6416_v63  ;;  %s5065_s24 = sshll.u32 %s8953_s14, 4  ;;  %s5066_s24 = int_to_ptr.vmem [resolvable:$true] %s5065_s24 }
 0x5b9   : > { %6003 = vmatmul.msk.f32.gmra.mxu2 %vm3656_vm5, %v8795_v22 }
 0x5ba   : > { %4017 = vmatpush.msrb.mxu3 %v6417_v13 }
 0x5bc   : > { %4018 = vmatpush.msrb.mxu3 %v6418_v25 }
 0x5bd   : > { %5999 = vmatmul.msk.f32.gmra.mxu3 %vm3656_vm5, %v8795_v22 }
 0x5c1   : > { %6008 = vmatmul.msk.f32.vlgmr.msra.gmra.mxu2 %vm3656_vm5, %v8806_v38 }
 0x5c2   : > { %4130 = vmatpush.msra.mxu2 %v6419_v8 }
 0x5c4   : > { %4131 = vmatpush.msra.mxu2 %v6420_v44 }
 0x5c5   : > { %6004 = vmatmul.msk.f32.vlgmr.msra.gmra.mxu3 %vm3656_vm5, %v8788_v60  ;;  %v8860_v15 = vpop.trf.xlu0 }
 0x5c6   : > { %4132 = vmatpush.msra.mxu2 %v6421_v16  ;;  %5988 = vmatmul.msk.f32.vlgmr.msrb.gmra.mxu1 %vm3656_vm5, %v8860_v15 }
 0x5c7   : > { %4084 = vmatpush.msra.mxu3 %v6422_v18  ;;  %3900 = vmatpush.msrb.mxu1 %v6423_v45 }
 0x5c8   : > { %4133 = vmatpush.msra.mxu2 %v6424_v52 }
 0x5c9   : > { %6009 = vmatmul.msk.f32.gmra.mxu2 %vm3656_vm5, %v8817_v55  ;;  %4085 = vmatpush.msra.mxu3 %v6425_v61 }
 0x5ca   : > { %3901 = vmatpush.msrb.mxu1 %v6426_v35 }
 0x5cb   : > { %4086 = vmatpush.msra.mxu3 %v6427_v40 }
 0x5cc   : > { %3902 = vmatpush.msrb.mxu1 %v6428_v7 }
 0x5cd   : > { %4087 = vmatpush.msra.mxu3 %v6429_v10  ;;  %v8877_v14 = vpop.trf.xlu0 }
 0x5ce   : > { %6005 = vmatmul.msk.f32.gmra.mxu3 %vm3656_vm5, %v8795_v22  ;;  %3903 = vmatpush.msrb.mxu1 %v6430_v23 }
 0x5cf   : > { %5989 = vmatmul.msk.f32.gmra.mxu1 %vm3656_vm5, %v8877_v14 }
 0x5d1   : > { %6014 = vmatmul.msk.f32.vlgmr.msrb.gmra.mxu2 %vm3656_vm5, %v8860_v15 }
 0x5d6   : > { %6010 = vmatmul.msk.f32.vlgmr.msrb.gmra.mxu3 %vm3656_vm5, %v8806_v38 }
 0x5d7   : > { %5994 = vmatmul.msk.f32.vlgmr.msra.gmra.mxu1 %vm3656_vm5, %v8773_v30 }
 0x5d8   : > { %3969 = vmatpush.msra.mxu1 %v6431_v24 }
 0x5d9   : > { %6015 = vmatmul.msk.f32.gmra.mxu2 %vm3656_vm5, %v8877_v14 }
 0x5da   : > { %3970 = vmatpush.msra.mxu1 %v6432_v29 }
 0x5dc   : > { %3971 = vmatpush.msra.mxu1 %v6433_v27  ;;  %v3680_v62 = vpop.f32.mrf.mxu1 }
 0x5dd   : > { %4992 = vst.msk [vmem:[%s8897_s17] sm:$0xff] %vm4149_vm0, %v3680_v62  ;;  %4421 = vperm.xlu1 %6296, %v3680_v62   ;;  %4240 = vperm.xlu2 %6295, %v3680_v62   ;;  %v4141_v58 = vmul.f32 %v3680_v62, %v3680_v62 }
 0x5de   : > { %3972 = vmatpush.msra.mxu1 %v6434_v41  ;;  %6011 = vmatmul.msk.f32.gmra.mxu3 %vm3656_vm5, %v8817_v55 }
 0x5df   : > { %5995 = vmatmul.msk.f32.gmra.mxu1 %vm3656_vm5, %v8780_v51  ;;  %v4150_v63 = vsel %vm4149_vm0, %v4141_v58, 0.0 }
 0x5e1   : > { %6020 = vmatmul.msk.f32.vlgmr.msra.gmra.mxu2 %vm3656_vm5, %v8860_v15 }
 0x5e4   : > { %v3683_v12 = vpop.f32.mrf.mxu1 }
 0x5e5   : > { %4993 = vst.msk [vmem:[%s8897_s17 + $0x8] sm:$0xff] %vm4149_vm0, %v3683_v12  ;;  %6297 = vset.pattern.permute.xlu2 %v6512_v54  ;;  %4577 = vperm.xlu0 %6293, %v3683_v12   ;;  %v4142_v8 = vmul.f32 %v3683_v12, %v3683_v12 }
 0x5e6   : > { %6016 = vmatmul.msk.f32.vlgmr.msra.gmra.mxu3 %vm3656_vm5, %v8860_v15  ;;  %4573 = vperm.xlu2 %6297, %v3680_v62  }
 0x5e7   : > { %6000 = vmatmul.msk.f32.vlgmr.msrb.gmra.mxu1 %vm3656_vm5, %v8788_v60  ;;  %6298 = vset.pattern.permute.xlu1 %v6510_v9  ;;  %v4153_v16 = vsel %vm4149_vm0, %v4142_v8, 0.0 }
 0x5e8   : > { %4038 = vmatpush.msrb.mxu1 %v6435_v37 }
 0x5e9   : > { %6021 = vmatmul.msk.f32.gmra.mxu2 %vm3656_vm5, %v8877_v14 }
 0x5ea   : > { %4039 = vmatpush.msrb.mxu1 %v6436_v32 }
 0x5ec   : > { %4040 = vmatpush.msrb.mxu1 %v6437_v1 }
 0x5ed   : > { %6300 = vset.pattern.permute.xlu0 %v6510_v9 }
 0x5ee   : > { %4041 = vmatpush.msrb.mxu1 %v6438_v28  ;;  %6017 = vmatmul.msk.f32.gmra.mxu3 %vm3656_vm5, %v8877_v14 }
 0x5ef   : > { %6001 = vmatmul.msk.f32.gmra.mxu1 %vm3656_vm5, %v8795_v22  ;;  %6299 = vset.pattern.permute.xlu2 %v6511_v11 }
 0x5f0   : > { %4425 = vperm.xlu2 %6299, %v3683_v12  }
 0x5f7   : > { %6006 = vmatmul.msk.f32.vlgmr.msra.gmra.mxu1 %vm3656_vm5, %v8806_v38 }
 0x5f8   : > { %4107 = vmatpush.msra.mxu1 %v6439_v31  ;;  %6303 = vset.pattern.permute.xlu2 %v6510_v9 }
 0x5fa   : > { %4108 = vmatpush.msra.mxu1 %v6440_v6 }
 0x5fc   : > { %4109 = vmatpush.msra.mxu1 %v6441_v53 }
 0x5fe   : > { %4110 = vmatpush.msra.mxu1 %v6442_v3 }
 0x5ff   : > { %6007 = vmatmul.msk.f32.gmra.mxu1 %vm3656_vm5, %v8817_v55 }
 0x604   : > { %v3709_v46 = vpop.f32.mrf.mxu2 }
 0x605   : > { %4994 = vst.msk [vmem:[%s8897_s17 + $0x10] sm:$0xff] %vm4149_vm0, %v3709_v46  ;;  %4250 = vperm.xlu0 %6300, %v3709_v46   ;;  %v4143_v7 = vmul.f32 %v3709_v46, %v3709_v46 }
 0x607   : > { %6012 = vmatmul.msk.f32.vlgmr.msrb.gmra.mxu1 %vm3656_vm5, %v8806_v38  ;;  %4151 = vadd.xlane.f32.xlu1 %v4150_v63  ;;  %v4156_v23 = vsel %vm4149_vm0, %v4143_v7, 0.0 }
 0x60c   : > { %v8942_v13 = vpop.f32.mrf.mxu2 }
 0x60d   : > { %4995 = vst.msk [vmem:[%s8897_s17 + $0x18] sm:$0xff] %vm4149_vm0, %v8942_v13  ;;  %6301 = vset.pattern.permute.xlu0 %v6511_v11  ;;  %v4144_v8 = vmul.f32 %v8942_v13, %v8942_v13 }
 0x60e   : > { %4429 = vperm.xlu0 %6301, %v3709_v46  }
 0x60f   : > { %6013 = vmatmul.msk.f32.gmra.mxu1 %vm3656_vm5, %v8817_v55 }
 0x614   : > { %v3790_v25 = vpop.f32.mrf.mxu2 }
 0x615   : > { %5009 = vst [vmem:[%s8953_s14] sm:$0xff] %v3790_v25 }
 0x616   : > { %6314 = vset.pattern.permute.xlu0 %v6512_v54 }
 0x617   : > { %6018 = vmatmul.msk.f32.vlgmr.msra.gmra.mxu1 %vm3656_vm5, %v8860_v15 }
 0x618   : > { %v8959_v44 = vpop.f32.mrf.mxu3 }
 0x619   : > { %4996 = vst.msk [vmem:[%s8897_s17 + $0x20] sm:$0xff] %vm4149_vm0, %v8959_v44  ;;  %4154 = vadd.xlane.f32.xlu2 %v4153_v16 }
 0x61c   : > { %v3793_v18 = vpop.f32.mrf.mxu2 }
 0x61d   : > { %5013 = vst [vmem:[%s8953_s14 + $0x20] sm:$0xff] %v3793_v18  ;;  %v6443_v18 = vld [vmem:[%s8254_s22 + $0x58] sm:$0xff] }
 0x61f   : > { %6019 = vmatmul.msk.f32.gmra.mxu1 %vm3656_vm5, %v8877_v14 }
 0x620   : > { %v8968_v45 = vpop.f32.mrf.mxu3  ;;  %4245 = vperm.xlu1 %6298, %v3683_v12  }
 0x621   : > { %4997 = vst.msk [vmem:[%s8897_s17 + $0x28] sm:$0xff] %vm4149_vm0, %v8968_v45 }
 0x624   : > { %v3859_v52 = vpop.f32.mrf.mxu2 }
 0x625   : > { %5012 = vst [vmem:[%s8953_s14 + $0x18] sm:$0xff] %v3859_v52  ;;  %v4159_v52 = vsel %vm4149_vm0, %v4144_v8, 0.0 }
 0x628   : > { %v3813_v61 = vpop.f32.mrf.mxu3  ;;  %6302 = vset.pattern.permute.xlu1 %v6512_v54 }
 0x629   : > { %5010 = vst [vmem:[%s8953_s14 + $0x8] sm:$0xff] %v3813_v61  ;;  %4581 = vperm.xlu1 %6302, %v3709_v46  }
 0x62c   : > { %v3862_v35 = vpop.f32.mrf.mxu2 }
 0x62d   : > { %5016 = vst [vmem:[%s8953_s14 + $0x38] sm:$0xff] %v3862_v35 }
 0x630   : > { %v3816_v40 = vpop.f32.mrf.mxu3 }
 0x631   : > { %5014 = vst [vmem:[%s8953_s14 + $0x28] sm:$0xff] %v3816_v40  ;;  %4255 = vperm.xlu2 %6303, %v8942_v13   ;;  %6304 = vset.pattern.permute.xlu1 %v6511_v11 }
 0x632   : > { %4433 = vperm.xlu1 %6304, %v8942_v13  }
 0x634   : > { %v3928_v10 = vpop.f32.mrf.mxu2 }
 0x635   : > { %5019 = vst [vmem:[%s8953_s14 + $0x50] sm:$0xff] %v3928_v10 }
 0x637   : > { %v4241_v62 = vpop.permute.xlu2 %4240 }
 0x638   : > { %4157 = vadd.xlane.f32.xlu0 %v4156_v23  ;;  %v3882_v24 = vpop.f32.mrf.mxu3  ;;  %v4412_v31 = vmul.f32 %v8574_v56, %v4241_v62 }
 0x639   : > { %5017 = vst [vmem:[%s8953_s14 + $0x40] sm:$0xff] %v3882_v24  ;;  %6305 = vset.pattern.permute.xlu2 %v6512_v54 }
 0x63a   : > { %4585 = vperm.xlu2 %6305, %v8942_v13   ;;  %6306 = vset.pattern.permute.xlu1 %v6510_v9 }
 0x63c   : > { %v3931_v29 = vpop.f32.mrf.mxu2 }
 0x63d   : > { %5023 = vst [vmem:[%s8953_s14 + $0x70] sm:$0xff] %v3931_v29 }
 0x640   : > { %v3885_v27 = vpop.f32.mrf.mxu3  ;;  %v4574_v1 = vpop.permute.xlu2 %4573 }
 0x641   : > { %5021 = vst [vmem:[%s8953_s14 + $0x60] sm:$0xff] %v3885_v27  ;;  %v4708_v46 = vmul.f32 %v8736_v42, %v4574_v1 }
 0x642   : > { %6307 = vset.pattern.permute.xlu2 %v6511_v11 }
 0x643   : > { %v8989_v41 = vpop.f32.mrf.mxu1  ;;  %4437 = vperm.xlu2 %6307, %v8959_v44  }
 0x644   : > { %4998 = vst.msk [vmem:[%s8897_s17 + $0x30] sm:$0xff] %vm4149_vm0, %v8989_v41  ;;  %v3997_v3 = vpop.f32.mrf.mxu2 }
 0x645   : > { %5026 = vst [vmem:[%s8953_s14 + $0x88] sm:$0xff] %v3997_v3 }
 0x648   : > { %v3951_v12 = vpop.f32.mrf.mxu3 }
 0x649   : > { %5020 = vst [vmem:[%s8953_s14 + $0x58] sm:$0xff] %v3951_v12 }
 0x64b   : > { %6309 = vset.pattern.permute.xlu2 %v6510_v9 }
 0x64c   : > { %4597 = vperm.xlu0 %6314, %v8989_v41   ;;  %v8998_v37 = vpop.f32.mrf.mxu1  ;;  %4265 = vperm.xlu2 %6309, %v8968_v45  }
 0x64d   : > { %4999 = vst.msk [vmem:[%s8897_s17 + $0x38] sm:$0xff] %vm4149_vm0, %v8998_v37 }
 0x64f   : > { %v4422_v28 = vpop.permute.xlu1 %4421 }
 0x650   : > { %v4556_v6 = vmul.f32 %v8667_v49, %v4422_v28  ;;  %v4147_v28 = vmul.f32 %v8989_v41, %v8989_v41 }
 0x651   : > { %v3954_v32 = vpop.f32.mrf.mxu3 }
 0x652   : > { %5024 = vst [vmem:[%s8953_s14 + $0x78] sm:$0xff] %v3954_v32  ;;  %v4564_v58 = vadd.f32 %v4556_v6, %v4412_v31  ;;  %v4426_v6 = vpop.permute.xlu2 %4425 }
 0x654   : > { %6316 = vset.pattern.permute.xlu0 %v6511_v11  ;;  %v3836_v53 = vpop.f32.mrf.mxu1  ;;  %6311 = vset.pattern.permute.xlu2 %v6512_v54  ;;  %v4716_v63 = vadd.f32 %v4708_v46, %v4564_v58 }
 0x655   : > { %5011 = vst [vmem:[%s8953_s14 + $0x10] sm:$0xff] %v3836_v53  ;;  %4449 = vperm.xlu0 %6316, %v8998_v37   ;;  %4593 = vperm.xlu2 %6311, %v8968_v45   ;;  %v4168_v53 = vsel %vm4149_vm0, %v4147_v28, 0.0 }
 0x656   : > { %v4804_v24 = vmul.f32 2.0, %v4716_v63 }
 0x657   : > { %v4578_v35 = vpop.permute.xlu0 %4577 }
 0x659   : > { %v4020_v25 = vpop.f32.mrf.mxu3 }
 0x65a   : > { %5027 = vst [vmem:[%s8953_s14 + $0x90] sm:$0xff] %v4020_v25  ;;  %v4557_v25 = vmul.f32 %v8667_v49, %v4426_v6 }
 0x65c   : > { %v3839_v16 = vpop.f32.mrf.mxu1  ;;  %4160 = vadd.xlane.f32.xlu1 %v4159_v52  ;;  %v4709_v52 = vmul.f32 %v8736_v42, %v4578_v35 }
 0x65d   : > { %5015 = vst [vmem:[%s8953_s14 + $0x30] sm:$0xff] %v3839_v16  ;;  %6317 = vset.pattern.permute.xlu0 %v6512_v54  ;;  %6313 = vset.pattern.permute.xlu2 %v6511_v11 }
 0x65e   : > { %4638 = vperm.xlu0 %6317, %v6443_v18   ;;  %4445 = vperm.xlu2 %6313, %v8989_v41  }
 0x664   : > { %v3905_v61 = vpop.f32.mrf.mxu1 }
 0x665   : > { %5018 = vst [vmem:[%s8953_s14 + $0x48] sm:$0xff] %v3905_v61 }
 0x666   : > { %6315 = vset.pattern.permute.xlu2 %v6510_v9 }
 0x66c   : > { %v3908_v13 = vpop.f32.mrf.mxu1 }
 0x66d   : > { %5022 = vst [vmem:[%s8953_s14 + $0x68] sm:$0xff] %v3908_v13 }
 0x674   : > { %v3974_v40 = vpop.f32.mrf.mxu1 }
 0x675   : > { %5025 = vst [vmem:[%s8953_s14 + $0x80] sm:$0xff] %v3974_v40  ;;  %4260 = vperm.xlu1 %6306, %v8959_v44  }
 0x677   : > { %v4251_v7 = vpop.permute.xlu0 %4250 }
 0x678   : > { %v4414_v62 = vmul.f32 %v8582_v43, %v4251_v7 }
 0x67a   : > { %v4152_v23 = vpop.xlane.xlu1 %4151 }
 0x67b   : > { %v4796_v29 = vadd.f32 %v8541_v50, %v4152_v23 }
 0x67c   : > { %v3977_v10 = vpop.f32.mrf.mxu1 }
 0x67d   : > { %5029 = vst [vmem:[%s8953_s14 + $0xa0] sm:$0xff] %v3977_v10  ;;  %v4812_v12 = vsub.f32 %v4796_v29, %v4804_v24  ;;  %6308 = vset.pattern.permute.xlu1 %v6512_v54  ;;  %v4000_v29 = vpop.f32.mrf.mxu2 }
 0x67e   : > { %4589 = vperm.xlu1 %6308, %v8959_v44   ;;  %5030 = vst [vmem:[%s8953_s14 + $0xa8] sm:$0xff] %v4000_v29 }
 0x67f   : > { %v9040_v3 = vmax.f32 %v4812_v12, 0.0 }
 0x680   : > { %v4430_v27 = vpop.permute.xlu0 %4429 }
 0x681   : > { %v4558_v32 = vmul.f32 %v8671_v20, %v4430_v27  ;;  %6362 = vrsqrt.f32 %v9040_v3  ;;  %v4023_v27 = vpop.f32.mrf.mxu3  ;;  %vm4835_vm6 = vcmp.eq.f32.partialorder %v9040_v3, inf  ;;  %vm4837_vm7 = vcmp.eq.f32.partialorder %v9040_v3, 0.0 }
 0x682   : > { %5031 = vst [vmem:[%s8953_s14 + $0xb0] sm:$0xff] %v4023_v27 }
 0x683   : > { %v4566_v1 = vadd.f32 %v4558_v32, %v4414_v62  ;;  %v4145_v32 = vmul.f32 %v8959_v44, %v8959_v44 }
 0x684   : > { %v4043_v31 = vpop.f32.mrf.mxu1 }
 0x685   : > { %5028 = vst [vmem:[%s8953_s14 + $0x98] sm:$0xff] %v4043_v31 }
 0x686   : > { %6310 = vset.pattern.permute.xlu1 %v6511_v11 }
 0x687   : > { %4169 = vadd.xlane.f32.xlu2 %v4168_v53  ;;  %v6363_v63 = vpop.eup %6362 }
 0x688   : > { %v4829_v11 = vmul.f32 %v6363_v63, %v9040_v3 }
 0x68a   : > { %v4830_v10 = vmul.f32 %v6363_v63, %v4829_v11 }
 0x68c   : > { %v4155_v46 = vpop.xlane.xlu2 %4154  ;;  %v4046_v18 = vpop.f32.mrf.mxu1  ;;  %v4831_v42 = vmul.f32 0.5, %v4830_v10  ;;  %v4838_v10 = vand.u32 2147483648, %v9040_v3 }
 0x68d   : > { %5032 = vst [vmem:[%s8953_s14 + $0xb8] sm:$0xff] %v4046_v18  ;;  %v4797_v40 = vadd.f32 %v8541_v50, %v4155_v46 }
 0x68e   : > { %v4832_v35 = vsub.f32 1.5, %v4831_v42 }
 0x690   : > { %v4833_v46 = vmul.f32 %v6363_v63, %v4832_v35 }
 0x692   : > { %v4246_v58 = vpop.permute.xlu1 %4245 }
 0x693   : > { %v4413_v8 = vmul.f32 %v8574_v56, %v4246_v58 }
 0x694   : > { %v4256_v16 = vpop.permute.xlu2 %4255 }
 0x695   : > { %v4565_v61 = vadd.f32 %v4557_v25, %v4413_v8  ;;  %v4415_v6 = vmul.f32 %v8582_v43, %v4256_v16  ;;  %v4162_v8 = vsel %vm4149_vm0, %v4145_v32, 0.0 }
 0x697   : > { %v4717_v13 = vadd.f32 %v4709_v52, %v4565_v61  ;;  %v6444_v52 = vld [vmem:[%s8254_s22 + $0x78] sm:$0xff] }
 0x699   : > { %v4805_v7 = vmul.f32 2.0, %v4717_v13 }
 0x69b   : > { %v4813_v23 = vsub.f32 %v4797_v40, %v4805_v7  ;;  %v4582_v24 = vpop.permute.xlu1 %4581 }
 0x69c   : > { %v4586_v49 = vpop.permute.xlu2 %4585  ;;  %v4710_v56 = vmul.f32 %v8739_v17, %v4582_v24 }
 0x69d   : > { %v4821_v62 = vmax.f32 %v4813_v23, 0.0  ;;  %v4711_v58 = vmul.f32 %v8739_v17, %v4586_v49 }
 0x69e   : > { %v4718_v12 = vadd.f32 %v4710_v56, %v4566_v1 }
 0x69f   : > { %4275 = vperm.xlu2 %6315, %v8998_v37   ;;  %6364 = vrsqrt.f32 %v4821_v62  ;;  %vm4847_vm8 = vcmp.eq.f32.partialorder %v4821_v62, inf  ;;  %v4850_v49 = vand.u32 2147483648, %v4821_v62  ;;  %vm4849_vm9 = vcmp.eq.f32.partialorder %v4821_v62, 0.0 }
 0x6a0   : > { %v4806_v61 = vmul.f32 2.0, %v4718_v12 }
 0x6a4   : > { %v9053_v50 = vpop.permute.xlu2 %4437  ;;  %v4434_v28 = vpop.permute.xlu1 %4433 }
 0x6a5   : > { %v6365_v31 = vpop.eup %6364  ;;  %v4559_v53 = vmul.f32 %v8671_v20, %v4434_v28  ;;  %v4834_v20 = vmul.f32 %v4833_v46, %v9040_v3 }
 0x6a6   : > { %v4841_v1 = vmul.f32 %v6365_v31, %v4821_v62 }
 0x6a7   : > { %6319 = vset.pattern.permute.xlu2 %v6512_v54  ;;  %v4567_v25 = vadd.f32 %v4559_v53, %v4415_v6  ;;  %v4836_v17 = vsel %vm4835_vm6, %v9040_v3, %v4834_v20 }
 0x6a8   : > { %4650 = vperm.xlu2 %6319, %v6444_v52   ;;  %4163 = vadd.xlane.f32.xlu1 %v4162_v8  ;;  %v4842_v11 = vmul.f32 %v6365_v31, %v4841_v1  ;;  %v4839_v24 = vsel %vm4837_vm7, %v4838_v10, %v4836_v17  ;;  %v4066_v17 = vpop.f32.mrf.mxu2 }
 0x6a9   : > { %v4719_v43 = vadd.f32 %v4711_v58, %v4567_v25  ;;  %v4924_v12 = vsel %vm3656_vm5, %v4839_v24, inf  ;;  %5033 = vst [vmem:[%s8953_s14 + $0xc0] sm:$0xff] %v4066_v17 }
 0x6aa   : > { %v4843_v63 = vmul.f32 0.5, %v4842_v11 }
 0x6ab   : > { %v4158_v18 = vpop.xlane.xlu0 %4157  ;;  %v4807_v20 = vmul.f32 2.0, %v4719_v43  ;;  %v4112_v43 = vpop.f32.mrf.mxu1 }
 0x6ac   : > { %v4798_v44 = vadd.f32 %v8500_v48, %v4158_v18  ;;  %v9065_v13 = vpop.permute.xlu2 %4265  ;;  %v4844_v40 = vsub.f32 1.5, %v4843_v63  ;;  %5035 = vst [vmem:[%s8953_s14 + $0xd0] sm:$0xff] %v4112_v43 }
 0x6ae   : > { %v4814_v16 = vsub.f32 %v4798_v44, %v4806_v61  ;;  %v4845_v7 = vmul.f32 %v6365_v31, %v4844_v40 }
 0x6b0   : > { %v4846_v23 = vmul.f32 %v4845_v7, %v4821_v62 }
 0x6b2   : > { %v4848_v56 = vsel %vm4847_vm8, %v4821_v62, %v4846_v23  ;;  %v4822_v62 = vmax.f32 %v4814_v16, 0.0 }
 0x6b3   : > { %v4851_v27 = vsel %vm4849_vm9, %v4850_v49, %v4848_v56  ;;  %v4115_v17 = vpop.f32.mrf.mxu1 }
 0x6b4   : > { %v9071_v29 = vpop.permute.xlu2 %4593  ;;  %v4925_v42 = vsel %vm3656_vm5, %v4851_v27, inf  ;;  %6366 = vrsqrt.f32 %v4822_v62  ;;  %vm4859_vm10 = vcmp.eq.f32.partialorder %v4822_v62, inf  ;;  %vm4861_vm11 = vcmp.eq.f32.partialorder %v4822_v62, 0.0  ;;  %5039 = vst [vmem:[%s8953_s14 + $0xf0] sm:$0xff] %v4115_v17 }
 0x6b5   : > { %v4926_v35 = vmin.f32 %v4924_v12, %v4925_v42 }
 0x6b7   : > { %v4927_v32 = vrot.slane %v4926_v35, 4 }
 0x6b9   : > { %v4928_v28 = vmin.f32 %v4926_v35, %v4927_v32  ;;  %v4089_v35 = vpop.f32.mrf.mxu3 }
 0x6ba   : > { %v6367_v61 = vpop.eup %6366  ;;  %5034 = vst [vmem:[%s8953_s14 + $0xc8] sm:$0xff] %v4089_v35 }
 0x6bb   : > { %v4929_v3 = vrot.slane %v4928_v28, 2  ;;  %v4853_v44 = vmul.f32 %v6367_v61, %v4822_v62 }
 0x6bc   : > { %v4446_v6 = vpop.permute.xlu2 %4445 }
 0x6bd   : > { %v9078_v53 = vmul.f32 %v8675_v19, %v4446_v6  ;;  %v4930_v46 = vmin.f32 %v4928_v28, %v4929_v3  ;;  %v4854_v63 = vmul.f32 %v6367_v61, %v4853_v44  ;;  %v4146_v28 = vmul.f32 %v8968_v45, %v8968_v45 }
 0x6be   : > { %v9075_v31 = vpop.permute.xlu0 %4597  ;;  %v4862_v6 = vand.u32 2147483648, %v4822_v62  ;;  %v4560_v3 = vmul.f32 %v8659_v34, %v9053_v50  ;;  %v4669_v50 = vperm.slane %v8771_v4, %v8480_v5 }
 0x6bf   : > { %v4931_v1 = vrot.slane %v4930_v46, 1  ;;  %v4855_v7 = vmul.f32 0.5, %v4854_v63 }
 0x6c1   : > { %4441 = vperm.xlu1 %6310, %v8968_v45   ;;  %v9081_v58 = vmin.f32 %v4930_v46, %v4931_v1 }
 0x6c3   : > { %v4960_v8 = vmul.f32 %v9081_v58, %v8773_v30 }
 0x6c5   : > { %v4968_v52 = vsel %vm3656_vm5, %v4960_v8, 0.0 }
 0x6c6   : > { %4969 = vadd.xlane.f32.xlu0 %v4968_v52 }
 0x6c7   : > { %v4450_v25 = vpop.permute.xlu0 %4449 }
 0x6c8   : > { %v9086_v18 = vmul.f32 %v8675_v19, %v4450_v25  ;;  %v4856_v19 = vsub.f32 1.5, %v4855_v7  ;;  %v4092_v7 = vpop.f32.mrf.mxu3 }
 0x6c9   : > { %6312 = vset.pattern.permute.xlu1 %v6510_v9  ;;  %v4069_v9 = vpop.f32.mrf.mxu2  ;;  %5038 = vst [vmem:[%s8953_s14 + $0xe8] sm:$0xff] %v4092_v7 }
 0x6ca   : > { %v4857_v23 = vmul.f32 %v6367_v61, %v4856_v19  ;;  %5037 = vst [vmem:[%s8953_s14 + $0xe0] sm:$0xff] %v4069_v9 }
 0x6cc   : > { %v4858_v56 = vmul.f32 %v4857_v23, %v4822_v62 }
 0x6ce   : > { %v4860_v12 = vsel %vm4859_vm10, %v4822_v62, %v4858_v56 }
 0x6cf   : > { %v4161_v11 = vpop.xlane.xlu1 %4160  ;;  %v4863_v8 = vsel %vm4861_vm11, %v4862_v6, %v4860_v12 }
 0x6d0   : > { %v4799_v16 = vadd.f32 %v8500_v48, %v4161_v11  ;;  %v4639_v61 = vpop.permute.xlu0 %4638  ;;  %v4165_v11 = vsel %vm4149_vm0, %v4146_v28, 0.0  ;;  %v4933_v62 = vsel %vm3656_vm5, %v4863_v8, inf }
 0x6d1   : > { %v4135_v32 = vpop.f32.mrf.mxu2  ;;  %v4671_v63 = vperm.slane %v4639_v61, %v8484_v21 }
 0x6d2   : > { %v4815_v40 = vsub.f32 %v4799_v16, %v4807_v20  ;;  %5036 = vst [vmem:[%s8953_s14 + $0xd8] sm:$0xff] %v4135_v32 }
 0x6d4   : > { %v4823_v30 = vmax.f32 %v4815_v40, 0.0 }
 0x6d6   : > { %6368 = vrsqrt.f32 %v4823_v30  ;;  %vm4871_vm12 = vcmp.eq.f32.partialorder %v4823_v30, inf  ;;  %v4874_v52 = vand.u32 2147483648, %v4823_v30  ;;  %vm4873_vm13 = vcmp.eq.f32.partialorder %v4823_v30, 0.0 }
 0x6dc   : > { %v6369_v10 = vpop.eup %6368 }
 0x6dd   : > { %v4865_v24 = vmul.f32 %v6369_v10, %v4823_v30 }
 0x6df   : > { %v4866_v49 = vmul.f32 %v6369_v10, %v4865_v24 }
 0x6e1   : > { %v4867_v27 = vmul.f32 0.5, %v4866_v49 }
 0x6e3   : > { %v4868_v48 = vsub.f32 1.5, %v4867_v27 }
 0x6e5   : > { %v4869_v42 = vmul.f32 %v6369_v10, %v4868_v48  ;;  %v4670_v10 = vsel %vm4351_vm2, %v4669_v50, %v8726_v47  ;;  %v6445_v50 = vld [vmem:[%s8254_s22 + $0x70] sm:$0xff]  ;;  %s6232_s22 = sshll.u32 %s6606_s29, 8  ;;  %s5048_s29 = scalar_lea.sflag [#allocation3], %s461_s21 }
 0x6e6   : > { %v4672_v4 = vsel %vm4355_vm3, %v4671_v63, %v4670_v10  ;;  %s5064_s23 = scalar_lea.hbm %s9230_s13, %s6232_s22 }
 0x6e7   : > { %v4261_v46 = vpop.permute.xlu1 %4260  ;;  %v4870_v1 = vmul.f32 %v4869_v42, %v4823_v30  ;;  %s5067_s15 = sshll.u32 %s5064_s23, 4  ;;  %s5068_s15 = int_to_ptr.hbm [resolvable:$true] %s5067_s15 }
 0x6e8   : > { %v4416_v25 = vmul.f32 %v8586_v26, %v4261_v46  ;;  %s6460_s19 = sshra.s32 %s5068_s15, 4  ;;  %s6461_s19 = int_to_ptr.hbm [resolvable:$true] %s6460_s19 }
 0x6e9   : > { %v4872_v44 = vsel %vm4871_vm12, %v4823_v30, %v4870_v1  ;;  %v4138_v30 = vpop.f32.mrf.mxu2  ;;  %s6462_s25 = scalar_lea.hbm %s6461_s19, 256  ;;  %p6467_p1 = scmp.lt.s32.totalorder %s6461_s19, %s9230_s13 }
 0x6ea   : > { %v4568_v45 = vadd.f32 %v4560_v3, %v4416_v25  ;;  %v4875_v16 = vsel %vm4873_vm13, %v4874_v52, %v4872_v44  ;;  %5040 = vst [vmem:[%s8953_s14 + $0xf8] sm:$0xff] %v4138_v30  ;;  %p6463_p12 = scmp.ne.s32.totalorder %s6461_s19, %s6462_s25  ;;  %s6466_s14 = scalar_lea.hbm %s9230_s13, 512 }
 0x6eb   : > { %4166 = vadd.xlane.f32.xlu1 %v4165_v11  ;;  %v4934_v20 = vsel %vm3656_vm5, %v4875_v16, inf  ;;  %p6468_p2 = scmp.lt.s32.totalorder %s6466_s14, %s6462_s25 }
 0x6ec   : > { %v4935_v40 = vmin.f32 %v4933_v62, %v4934_v20  ;;  %p6464_p13 = pnand %p6463_p12, %p6623_p5 }
 0x6ed   : > { %p6469_p3 = por %p6468_p2, %p6467_p1 }
 0x6ee   : > { %v4936_v19 = vrot.slane %v4935_v40, 4  ;;  %p6465_p0 = pneg %p6464_p13 }
 0x6f0   : > { %v4590_v23 = vpop.permute.xlu1 %4589  ;;  %v4937_v24 = vmin.f32 %v4935_v40, %v4936_v19  ;;  %p6470_p4 = pnand %p6469_p3, %p6465_p0 }
 0x6f1   : > { %v4712_v9 = vmul.f32 %v4672_v4, %v4590_v23 }
 0x6f2   : > { %v4938_v49 = vrot.slane %v4937_v24, 2 }
 0x6f3   : > { %v4720_v56 = vadd.f32 %v4712_v9, %v4568_v45 }
 0x6f4   : > { %v4939_v27 = vmin.f32 %v4937_v24, %v4938_v49 }
 0x6f5   : > { %v4808_v1 = vmul.f32 2.0, %v4720_v56 }
 0x6f6   : > { %v4940_v48 = vrot.slane %v4939_v27, 1 }
 0x6f8   : > { %v4941_v43 = vmin.f32 %v4939_v27, %v4940_v48  ;;  %v4961_v27 = vmul.f32 %v9081_v58, %v8780_v51 }
 0x6fa   : > { %v4170_v12 = vpop.xlane.xlu2 %4169  ;;  %v4962_v35 = vmul.f32 %v4941_v43, %v8788_v60  ;;  %v4963_v47 = vmul.f32 %v4941_v43, %v8795_v22 }
 0x6fb   : > { %v9114_v42 = vadd.f32 %v8532_v0, %v4170_v12 }
 0x6fc   : > { %v4974_v32 = vsel %vm3656_vm5, %v4962_v35, 0.0  ;;  %v4977_v46 = vsel %vm3656_vm5, %v4963_v47, 0.0 }
 0x6fd   : > { %4975 = vadd.xlane.f32.xlu2 %v4974_v32 }
 0x702   : > { %v4276_v28 = vpop.permute.xlu2 %4275 }
 0x703   : > { %v4419_v6 = vmul.f32 %v8578_v2, %v4276_v28 }
 0x704   : > { %4270 = vperm.xlu1 %6312, %v8989_v41   ;;  %v4417_v41 = vmul.f32 %v8586_v26, %v9065_v13 }
 0x705   : > { %v9121_v3 = vadd.f32 %v9086_v18, %v4419_v6  ;;  %4978 = vadd.xlane.f32.xlu2 %v4977_v46  ;;  %v4148_v18 = vmul.f32 %v8998_v37, %v8998_v37  ;;  %v4971_v46 = vsel %vm3656_vm5, %v4961_v27, 0.0 }
 0x707   : > { %v4171_v44 = vsel %vm4149_vm0, %v4148_v18, 0.0 }
 0x70a   : > { %v4651_v17 = vpop.permute.xlu2 %4650 }
 0x70c   : > { %6318 = vset.pattern.permute.xlu1 %v6512_v54  ;;  %v4713_v54 = vmul.f32 %v4672_v4, %v9071_v29 }
 0x70d   : > { %4601 = vperm.xlu1 %6318, %v8998_v37  }
 0x71b   : > { %v4164_v60 = vpop.xlane.xlu1 %4163 }
 0x71c   : > { %v4800_v22 = vadd.f32 %v8519_v36, %v4164_v60 }
 0x71e   : > { %v4816_v25 = vsub.f32 %v4800_v22, %v4808_v1 }
 0x720   : > { %v4824_v16 = vmax.f32 %v4816_v25, 0.0 }
 0x722   : > { %6370 = vrsqrt.f32 %v4824_v16  ;;  %vm4883_vm15 = vcmp.eq.f32.partialorder %v4824_v16, inf  ;;  %v4886_v48 = vand.u32 2147483648, %v4824_v16  ;;  %vm4885_vm0 = vcmp.eq.f32.partialorder %v4824_v16, 0.0 }
 0x728   : > { %v6371_v37 = vpop.eup %6370 }
 0x729   : > { %v4877_v62 = vmul.f32 %v6371_v37, %v4824_v16 }
 0x72b   : > { %v4878_v29 = vmul.f32 %v6371_v37, %v4877_v62 }
 0x72d   : > { %v4879_v40 = vmul.f32 0.5, %v4878_v29 }
 0x72f   : > { %v4880_v7 = vsub.f32 1.5, %v4879_v40 }
 0x731   : > { %v4881_v19 = vmul.f32 %v6371_v37, %v4880_v7 }
 0x733   : > { %v4442_v8 = vpop.permute.xlu1 %4441  ;;  %v4882_v24 = vmul.f32 %v4881_v19, %v4824_v16 }
 0x734   : > { %v4561_v52 = vmul.f32 %v8659_v34, %v4442_v8 }
 0x736   : > { %v4569_v61 = vadd.f32 %v4561_v52, %v4417_v41 }
 0x737   : > { %4172 = vadd.xlane.f32.xlu1 %v4171_v44 }
 0x738   : > { %v4721_v45 = vadd.f32 %v4713_v54, %v4569_v61 }
 0x739   : > { %v4970_v11 = vpop.xlane.xlu0 %4969 }
 0x73a   : > { %5001 = vst.msk [vmem:[%s8897_s17] sm:$0xff] %vm5000_vm14, %v4970_v11  ;;  %v4809_v13 = vmul.f32 2.0, %v4721_v45  ;;  %v4673_v11 = vperm.slane %v8786_v33, %v8435_v57 }
 0x750   : > { %4647 = vperm.xlu1 %6318, %v6445_v50   ;;  %v4678_v50 = vperm.slane %v4651_v17, %v8484_v21 }
 0x75e   : > { %v4167_v26 = vpop.xlane.xlu1 %4166 }
 0x75f   : > { %v4801_v34 = vadd.f32 %v8519_v36, %v4167_v26  ;;  %v4884_v36 = vsel %vm4883_vm15, %v4824_v16, %v4882_v24  ;;  %v4674_v16 = vperm.slane %v8800_v39, %v8440_v59 }
 0x760   : > { %v4887_v32 = vsel %vm4885_vm0, %v4886_v48, %v4884_v36 }
 0x761   : > { %v4817_v20 = vsub.f32 %v4801_v34, %v4809_v13  ;;  %v4942_v1 = vsel %vm3656_vm5, %v4887_v32, inf }
 0x763   : > { %v4825_v63 = vmax.f32 %v4817_v20, 0.0 }
 0x765   : > { %6372 = vrsqrt.f32 %v4825_v63  ;;  %vm4895_vm4 = vcmp.eq.f32.partialorder %v4825_v63, inf  ;;  %v4898_v47 = vand.u32 2147483648, %v4825_v63  ;;  %vm4897_vm6 = vcmp.eq.f32.partialorder %v4825_v63, 0.0 }
 0x76b   : > { %v6373_v30 = vpop.eup %6372 }
 0x76c   : > { %v4889_v10 = vmul.f32 %v6373_v30, %v4825_v63 }
 0x76e   : > { %v4890_v23 = vmul.f32 %v6373_v30, %v4889_v10 }
 0x770   : > { %v4976_v4 = vpop.xlane.xlu2 %4975  ;;  %v4891_v9 = vmul.f32 0.5, %v4890_v23 }
 0x771   : > { %5003 = vst.msk [vmem:[%s8897_s17 + $0x10] sm:$0xff] %vm5000_vm14, %v4976_v4 }
 0x772   : > { %v4892_v49 = vsub.f32 1.5, %v4891_v9 }
 0x774   : > { %v4893_v56 = vmul.f32 %v6373_v30, %v4892_v49 }
 0x776   : > { %v4271_v43 = vpop.permute.xlu1 %4270  ;;  %v4894_v12 = vmul.f32 %v4893_v56, %v4825_v63 }
 0x777   : > { %v4418_v35 = vmul.f32 %v8578_v2, %v4271_v43 }
 0x778   : > { %v4896_v28 = vsel %vm4895_vm4, %v4825_v63, %v4894_v12 }
 0x779   : > { %v4570_v6 = vadd.f32 %v9078_v53, %v4418_v35  ;;  %v4899_v60 = vsel %vm4897_vm6, %v4898_v47, %v4896_v28 }
 0x77a   : > { %4972 = vadd.xlane.f32.xlu1 %v4971_v46  ;;  %v4943_v51 = vsel %vm3656_vm5, %v4899_v60, inf  ;;  %v4979_v46 = vpop.xlane.xlu2 %4978 }
 0x77b   : > { %v4944_v58 = vmin.f32 %v4942_v1, %v4943_v51  ;;  %5004 = vst.msk [vmem:[%s8897_s17 + $0x18] sm:$0xff] %vm5000_vm14, %v4979_v46 }
 0x77d   : > { %v4945_v22 = vrot.slane %v4944_v58, 4 }
 0x77f   : > { %v4946_v25 = vmin.f32 %v4944_v58, %v4945_v22  ;;  %v4602_v44 = vpop.permute.xlu1 %4601 }
 0x781   : > { %v4947_v18 = vrot.slane %v4946_v25, 2 }
 0x783   : > { %v4948_v2 = vmin.f32 %v4946_v25, %v4947_v18 }
 0x785   : > { %v4949_v8 = vrot.slane %v4948_v2, 1 }
 0x787   : > { %v4950_v41 = vmin.f32 %v4948_v2, %v4949_v8 }
 0x789   : > { %v4965_v52 = vmul.f32 %v4950_v41, %v8817_v55  ;;  %v4964_v54 = vmul.f32 %v4950_v41, %v8806_v38  ;;  %v4675_v38 = vsel %vm4347_vm1, %v4674_v16, %v4673_v11 }
 0x78b   : > { %v4983_v53 = vsel %vm3656_vm5, %v4965_v52, 0.0  ;;  %v4980_v61 = vsel %vm3656_vm5, %v4964_v54, 0.0 }
 0x78c   : > { %4984 = vadd.xlane.f32.xlu1 %v4983_v53  ;;  %4981 = vadd.xlane.f32.xlu0 %v4980_v61 }
 0x7aa   : > { %v4173_v45 = vpop.xlane.xlu1 %4172 }
 0x7ab   : > { %v4803_v33 = vadd.f32 %v8532_v0, %v4173_v45 }
 0x7c2   : > { %v4648_v37 = vpop.permute.xlu1 %4647 }
 0x7c3   : > { %v4676_v55 = vperm.slane %v4648_v37, %v8480_v5 }
 0x7c5   : > { %v4677_v62 = vsel %vm4351_vm2, %v4676_v55, %v4675_v38 }
 0x7c6   : > { %v4679_v26 = vsel %vm4355_vm3, %v4678_v50, %v4677_v62 }
 0x7c7   : > { %v4714_v34 = vmul.f32 %v4679_v26, %v9075_v31  ;;  %v4715_v13 = vmul.f32 %v4679_v26, %v4602_v44 }
 0x7c9   : > { %v4722_v29 = vadd.f32 %v4714_v34, %v4570_v6  ;;  %v4723_v57 = vadd.f32 %v4715_v13, %v9121_v3 }
 0x7cb   : > { %v4810_v59 = vmul.f32 2.0, %v4722_v29  ;;  %v4811_v39 = vmul.f32 2.0, %v4723_v57 }
 0x7cd   : > { %v4818_v21 = vsub.f32 %v9114_v42, %v4810_v59  ;;  %v4819_v20 = vsub.f32 %v4803_v33, %v4811_v39 }
 0x7cf   : > { %v4826_v5 = vmax.f32 %v4818_v21, 0.0  ;;  %v4827_v63 = vmax.f32 %v4819_v20, 0.0 }
 0x7d1   : > { %6374 = vrsqrt.f32 %v4826_v5  ;;  %vm4907_vm1 = vcmp.eq.f32.partialorder %v4826_v5, inf  ;;  %v4910_v42 = vand.u32 2147483648, %v4826_v5  ;;  %vm4909_vm2 = vcmp.eq.f32.partialorder %v4826_v5, 0.0 }
 0x7d2   : > { %6376 = vrsqrt.f32 %v4827_v63  ;;  %vm4919_vm3 = vcmp.eq.f32.partialorder %v4827_v63, inf  ;;  %v4922_v56 = vand.u32 2147483648, %v4827_v63  ;;  %vm4921_vm7 = vcmp.eq.f32.partialorder %v4827_v63, 0.0 }
 0x7d7   : > { %v6375_v40 = vpop.eup %6374 }
 0x7d8   : > { %v6377_v17 = vpop.eup %6376  ;;  %v4901_v7 = vmul.f32 %v6375_v40, %v4826_v5 }
 0x7d9   : > { %v4913_v30 = vmul.f32 %v6377_v17, %v4827_v63 }
 0x7da   : > { %v4902_v31 = vmul.f32 %v6375_v40, %v4901_v7 }
 0x7db   : > { %v4914_v19 = vmul.f32 %v6377_v17, %v4913_v30 }
 0x7dc   : > { %v4903_v10 = vmul.f32 0.5, %v4902_v31 }
 0x7dd   : > { %v4915_v23 = vmul.f32 0.5, %v4914_v19 }
 0x7de   : > { %v4904_v3 = vsub.f32 1.5, %v4903_v10 }
 0x7df   : > { %v4916_v4 = vsub.f32 1.5, %v4915_v23 }
 0x7e0   : > { %v4905_v0 = vmul.f32 %v6375_v40, %v4904_v3 }
 0x7e1   : > { %v4917_v24 = vmul.f32 %v6377_v17, %v4916_v4 }
 0x7e2   : > { %v4906_v9 = vmul.f32 %v4905_v0, %v4826_v5 }
 0x7e3   : > { %v4918_v49 = vmul.f32 %v4917_v24, %v4827_v63 }
 0x7e4   : > { %v4908_v36 = vsel %vm4907_vm1, %v4826_v5, %v4906_v9 }
 0x7e5   : > { %v4911_v27 = vsel %vm4909_vm2, %v4910_v42, %v4908_v36  ;;  %v4920_v48 = vsel %vm4919_vm3, %v4827_v63, %v4918_v49 }
 0x7e6   : > { %v4923_v43 = vsel %vm4921_vm7, %v4922_v56, %v4920_v48  ;;  %v4951_v12 = vsel %vm3656_vm5, %v4911_v27, inf }
 0x7e7   : > { %v4952_v35 = vsel %vm3656_vm5, %v4923_v43, inf }
 0x7e8   : > { %v4953_v32 = vmin.f32 %v4951_v12, %v4952_v35 }
 0x7ea   : > { %v4954_v47 = vrot.slane %v4953_v32, 4 }
 0x7ec   : > { %v4955_v28 = vmin.f32 %v4953_v32, %v4954_v47 }
 0x7ed   : > { %v4973_v6 = vpop.xlane.xlu1 %4972 }
 0x7ee   : > { %5002 = vst.msk [vmem:[%s8897_s17 + $0x8] sm:$0xff] %vm5000_vm14, %v4973_v6  ;;  %v4956_v60 = vrot.slane %v4955_v28, 2 }
 0x7f0   : > { %v4957_v1 = vmin.f32 %v4955_v28, %v4956_v60 }
 0x7f1   : > { %6473 = shalt.err (!%p6470_p4)
}
 0x7f2   : > { %s6513_s21 = smov 512   ;;  %s6514_s20 = smov 32   ;;  %v4958_v51 = vrot.slane %v4957_v1, 1 }
 0x7f3   : > { %6241 = dma.vmem_to_hbm [thread:$0]  (%p6623_p5), %s5066_s24, 4096, %s5068_s15, %s5048_s29, %s6513_s21, %s6513_s21, %s6514_s20  }
 0x7f4   : > { %v4959_v58 = vmin.f32 %v4957_v1, %v4958_v51 }
 0x7f6   : > { %v4966_v22 = vmul.f32 %v4959_v58, %v8860_v15  ;;  %v4967_v25 = vmul.f32 %v4959_v58, %v8877_v14 }
 0x7f8   : > { %v4986_v18 = vsel %vm3656_vm5, %v4966_v22, 0.0  ;;  %v4989_v2 = vsel %vm3656_vm5, %v4967_v25, 0.0 }
 0x7f9   : > { %4987 = vadd.xlane.f32.xlu2 %v4986_v18  ;;  %4990 = vadd.xlane.f32.xlu0 %v4989_v2 }
 0x7ff   : > { %v4985_v8 = vpop.xlane.xlu1 %4984  ;;  %v4982_v41 = vpop.xlane.xlu0 %4981 }
 0x800   : > { %5006 = vst.msk [vmem:[%s8897_s17 + $0x28] sm:$0xff] %vm5000_vm14, %v4985_v8 }
 0x801   : > { %5005 = vst.msk [vmem:[%s8897_s17 + $0x20] sm:$0xff] %vm5000_vm14, %v4982_v41 }
 0x86c   : > { %v4988_v52 = vpop.xlane.xlu2 %4987  ;;  %v4991_v54 = vpop.xlane.xlu0 %4990 }
 0x86d   : > { %5007 = vst.msk [vmem:[%s8897_s17 + $0x30] sm:$0xff] %vm5000_vm14, %v4988_v52 }
 0x86e   : > { %5008 = vst.msk [vmem:[%s8897_s17 + $0x38] sm:$0xff] %vm5000_vm14, %v4991_v54 }
 0x86f PF: > { %s9243_s18 = sld [smem:[#allocation5_spill]]  ;;  %p6247_p5 = scmp.ge.s32.totalorder %s6508_s28, 2 }
 0x871   : > { %p6244_p7 = pnand %p6247_p5, %p6627_p6 }
 0x873   : > { %p6245_p8 = pneg %p6244_p7 }
 0x875   : > { %s5091_s24 = sand.u32 1, %s9243_s18  }
 0x876   : > { %s5092_s15 = scalar_lea.sflag [#allocation3], %s5091_s24 }
 0x877   : > { %6491 = dma.done.wait (%p6245_p8), %s5092_s15, 4096  }
 0x878   : > { %6493 = vsyncadd (%p6245_p8), %s5092_s15, 4294963200  ;;  %s9245_s28 = sld [smem:[#allocation7_spill]]  ;;  %s9248_s25 = smov %s6500_s26 }
 0x879   : > { %s9246_s29 = sld [smem:[#allocation6_spill]] }
 0x87a   : > { %s9247_s27 = sld [smem:[#allocation8_spill]] }
 0x87e   : > { %p24_p9 = scmp.ge.s32.totalorder %s9245_s28, 4  }
 0x87f   : > { %s9249_s26 = smov %s9246_s29 }
 0x880   :  { %26 = sbr.rel (!%p24_p9) target bundleno = 3 (0x3), region = 118 }
 0x885   :  { %5098 = vsyncpa [#allocation3], 1 }
 0x886   :  { %5100 = vsyncpa [#allocation3 + $0x1], 1 }

</bundles_post_ra>
